<compile_context>
chip_gen: v7x
topology: tpu7x:2x2x1
jax: 0.10.0
libtpu: 0.0.40
codegen_flags: <defaults>
</compile_context>

<pallas_src>
import math
import jax
import jax.numpy as jnp
from jax.experimental import pallas as pl
from jax.experimental.pallas import tpu as pltpu


def _round_up(x, m):
    return ((x + m - 1) // m) * m


def fused_kernel(len_ref,                      # scalar-prefetch: (B,) int32 in SMEM
                 x_ref,                        # (1, C_in, tt)  io dtype (native B,C,T layout)
                 ids_ref,                      # (1, tt, 1)     int32
                 vocab_ref,                    # (1, n_vocab)   int32 (resident iota row)
                 w_ref,                        # (C_in, H)      matmul dtype (resident)
                 tbl_ref,                      # (n_vocab, H)   matmul dtype (resident)
                 cb_ref,                       # (1, H)   f32 conv bias
                 g1_ref, b1_ref,               # (1, C_in) f32 pre-LN affine
                 g2_ref, b2_ref,               # (1, H)   f32 last-LN affine
                 o_ref):                       # (tt, H) io dtype, block of (T_pad, B*H)
    b = pl.program_id(0)
    j = pl.program_id(1)
    tt = o_ref.shape[0]

    mm_dtype = w_ref.dtype
    prec = jax.lax.Precision.HIGHEST if mm_dtype == jnp.float32 else None

    # keep = 1.0 for valid frames (t < lengths[b]), 0.0 for padding.
    length = len_ref[b]
    t_idx = jax.lax.broadcasted_iota(jnp.int32, (tt, 1), 0) + j * tt
    keep = (t_idx < length).astype(jnp.float32)                        # (tt, 1)

    # Native (C_in, tt) tile -> (tt, C_in) on the XLU; no wrapper transpose needed.
    x = jnp.transpose(x_ref[0].astype(jnp.float32), (1, 0))            # (tt, C_in)

    # masked_fill(pad, 0) -> LayerNorm over C_in
    x = x * keep
    mu = jnp.mean(x, axis=-1, keepdims=True)
    xc = x - mu
    var = jnp.mean(xc * xc, axis=-1, keepdims=True)
    xn = xc * jax.lax.rsqrt(var + 1e-5)
    xn = xn * g1_ref[...] + b1_ref[...]

    # 1x1 ConvTBC == (C_in, H) matmul + bias.
    y = jnp.dot(xn.astype(mm_dtype), w_ref[...],
                preferred_element_type=jnp.float32, precision=prec) + cb_ref[...]

    # f0 embedding lookup via one-hot MXU matmul against the resident table
    # (exact 0/1 weights; ids outside [0, n_vocab) silently give a zero row).
    onehot = (ids_ref[0] == vocab_ref[...]).astype(mm_dtype)            # (tt, n_vocab)
    y = y + jnp.dot(onehot, tbl_ref[...],
                    preferred_element_type=jnp.float32, precision=prec)
    y = y * keep

    # TODO(synk): OPERATIONS_ENCODER[8] transformer layers undefined in source -> identity.

    # final LayerNorm over H, then zero padded frames again (last_ln=True path).
    mu2 = jnp.mean(y, axis=-1, keepdims=True)
    yc = y - mu2
    var2 = jnp.mean(yc * yc, axis=-1, keepdims=True)
    yn = yc * jax.lax.rsqrt(var2 + 1e-5)
    yn = yn * g2_ref[...] + b2_ref[...]

    # Lane-dense (tt, H) store straight into the (T, B, H) output (stored flattened
    # as (T_pad, B*H)); no wrapper-side output transpose.
    o_ref[...] = (yn * keep).astype(o_ref.dtype)


def phone_encoder_forward(src_tokens, lengths, f0, params, *,
                          tile_t=1024, io_dtype=jnp.float32):
    """src_tokens: (B, C_in, T); lengths: (B,) int; f0: (B, T) int.

    Returns (T, B, H), matching the PyTorch module's output layout.
    io_dtype=jnp.bfloat16 halves HBM traffic on v6e/v7x; default f32 matches the
    f32 reference exactly (and v5e's f32-only VPU path).
    """
    B, C_in, T = src_tokens.shape
    H = params["conv_w"].shape[-1]
    n_vocab = params["f0_emb"].shape[0]

    if C_in % 8 != 0:
        raise ValueError("in_channels must be a multiple of 8 (module default 128 is fine)")
    if B > 1 and H % 128 != 0:
        raise ValueError("hidden_channels must be a multiple of 128 for batch > 1 "
                         "(module default 512 is fine)")
    mm_dtype = jnp.bfloat16 if io_dtype == jnp.bfloat16 else jnp.float32

    # Time tile: minor dim of the x input block -> multiple of 128, capped at tile_t.
    tt = _round_up(min(tile_t, _round_up(T, 128)), 128)
    T_pad = _round_up(T, tt)
    grid = (B, T_pad // tt)

    x = src_tokens.astype(io_dtype)                                    # native (B, C, T)
    f0 = f0.astype(jnp.int32)
    if T_pad != T:
        x = jnp.pad(x, ((0, 0), (0, 0), (0, T_pad - T)))
        f0 = jnp.pad(f0, ((0, 0), (0, T_pad - T)))                     # rows masked anyway
    ids = f0.reshape(B, T_pad, 1)
    lengths = lengths.astype(jnp.int32)

    vocab = jnp.arange(n_vocab, dtype=jnp.int32).reshape(1, n_vocab)
    w = params["conv_w"][0].astype(mm_dtype)                           # (C_in, H)
    tbl = params["f0_emb"].astype(mm_dtype)                            # (n_vocab, H)
    cb = params["conv_b"].reshape(1, H).astype(jnp.float32)
    g1 = params["pre_ln_g"].reshape(1, C_in).astype(jnp.float32)
    b1 = params["pre_ln_b"].reshape(1, C_in).astype(jnp.float32)
    g2 = params["last_ln_g"].reshape(1, H).astype(jnp.float32)
    b2 = params["last_ln_b"].reshape(1, H).astype(jnp.float32)

    call = pl.pallas_call(
        fused_kernel,
        out_shape=jax.ShapeDtypeStruct((T_pad, B * H), io_dtype),
        grid_spec=pltpu.PrefetchScalarGridSpec(
            num_scalar_prefetch=1,                                     # lengths -> SMEM
            grid=grid,
            in_specs=[
                pl.BlockSpec((1, C_in, tt), lambda b, j, lens: (b, 0, j)),   # x, native layout
                pl.BlockSpec((1, tt, 1),    lambda b, j, lens: (b, j, 0)),   # f0 ids tile
                pl.BlockSpec((1, n_vocab),  lambda b, j, lens: (0, 0)),      # vocab iota (resident)
                pl.BlockSpec((C_in, H),     lambda b, j, lens: (0, 0)),      # conv weight (resident)
                pl.BlockSpec((n_vocab, H),  lambda b, j, lens: (0, 0)),      # f0 table (resident)
                pl.BlockSpec((1, H),        lambda b, j, lens: (0, 0)),      # conv bias
                pl.BlockSpec((1, C_in),     lambda b, j, lens: (0, 0)),      # pre LN gamma
                pl.BlockSpec((1, C_in),     lambda b, j, lens: (0, 0)),      # pre LN beta
                pl.BlockSpec((1, H),        lambda b, j, lens: (0, 0)),      # last LN gamma
                pl.BlockSpec((1, H),        lambda b, j, lens: (0, 0)),      # last LN beta
            ],
            out_specs=pl.BlockSpec((tt, H), lambda b, j, lens: (j, b)),      # (T, B, H) direct
        ),
        compiler_params=pltpu.CompilerParams(
            dimension_semantics=("parallel", "parallel")),
    )
    out = call(lengths, x, ids, vocab, w, tbl, cb, g1, b1, g2, b2)     # (T_pad, B*H)
    out = out.reshape(T_pad, B, H)                                     # metadata-only reshape
    if T_pad != T:
        out = out[:T]
    return out


def init_params(key, in_channels, hidden_channels, p_dropout=0.2):
    k_conv, k_emb = jax.random.split(key)
    kernel_size = 1
    std = math.sqrt(4 * (1.0 - p_dropout) / (kernel_size * in_channels))
    return {
        "pre_ln_g": jnp.ones((in_channels,), jnp.float32),
        "pre_ln_b": jnp.zeros((in_channels,), jnp.float32),
        "conv_w": std * jax.random.normal(
            k_conv, (kernel_size, in_channels, hidden_channels), jnp.float32),
        "conv_b": jnp.zeros((hidden_channels,), jnp.float32),
        "f0_emb": jax.random.normal(k_emb, (256, hidden_channels), jnp.float32),
        "last_ln_g": jnp.ones((hidden_channels,), jnp.float32),
        "last_ln_b": jnp.zeros((hidden_channels,), jnp.float32),
    }


def _reference(src_tokens, lengths, f0, params):
    """Pure-JAX reference of the same (implemented) forward path, (T, B, H)."""
    B, C_in, T = src_tokens.shape
    x = jnp.transpose(src_tokens, (2, 0, 1))                           # (T, B, C)
    pad = (jnp.arange(T)[None, :] >= lengths[:, None])                 # (B, T)
    keep = (1.0 - pad.astype(jnp.float32)).T[..., None]                # (T, B, 1)
    x = x * keep
    mu = x.mean(-1, keepdims=True)
    var = ((x - mu) ** 2).mean(-1, keepdims=True)
    x = (x - mu) * jax.lax.rsqrt(var + 1e-5)
    x = x * params["pre_ln_g"] + params["pre_ln_b"]
    x = jnp.einsum("tbc,ch->tbh", x, params["conv_w"][0],
                   precision=jax.lax.Precision.HIGHEST) + params["conv_b"]
    x = x + jnp.transpose(params["f0_emb"][f0], (1, 0, 2))
    x = x * keep
    mu = x.mean(-1, keepdims=True)
    var = ((x - mu) ** 2).mean(-1, keepdims=True)
    x = (x - mu) * jax.lax.rsqrt(var + 1e-5)
    x = x * params["last_ln_g"] + params["last_ln_b"]
    return x * keep


if __name__ == "__main__":
    # Small shapes, module-faithful channel counts (in_channels default is 128);
    # T=20 deliberately not a multiple of the tile to exercise the padded tail,
    # and lengths[1] < T to exercise the padding mask.
    B, C_IN, H, T = 2, 128, 256, 20

    key = jax.random.PRNGKey(0)
    k_x, k_f0, k_p = jax.random.split(key, 3)

    src_tokens = jax.random.normal(k_x, (B, C_IN, T), jnp.float32)     # (B, C, T)
    lengths = jnp.array([T, 13], dtype=jnp.int32)
    f0 = jax.random.randint(k_f0, (B, T), 0, 256, dtype=jnp.int32)
    params = init_params(k_p, C_IN, H)

    out = phone_encoder_forward(src_tokens, lengths, f0, params)
    out = jax.block_until_ready(out)

    ref = _reference(src_tokens, lengths, f0, params)
    assert out.shape == (T, B, H)
    max_err = float(jnp.max(jnp.abs(out - ref)))
    assert jnp.allclose(out, ref, rtol=2e-3, atol=2e-3), max_err

    print("KERNEL_OK")
</pallas_src>

<mosaic_0001>
module attributes {stable_mosaic.version = 11 : i64} {
  func.func @fused_kernel(%arg0: i32, %arg1: i32, %arg2: memref<2xi32, #tpu.memory_space<smem>>, %arg3: memref<1x128x128xf32, #tpu.memory_space<vmem>>, %arg4: memref<1x128x1xi32, #tpu.memory_space<vmem>>, %arg5: memref<1x256xi32, #tpu.memory_space<vmem>>, %arg6: memref<128x256xf32, #tpu.memory_space<vmem>>, %arg7: memref<256x256xf32, #tpu.memory_space<vmem>>, %arg8: memref<1x256xf32, #tpu.memory_space<vmem>>, %arg9: memref<1x128xf32, #tpu.memory_space<vmem>>, %arg10: memref<1x128xf32, #tpu.memory_space<vmem>>, %arg11: memref<1x256xf32, #tpu.memory_space<vmem>>, %arg12: memref<1x256xf32, #tpu.memory_space<vmem>>, %arg13: memref<128x256xf32, #tpu.memory_space<vmem>>) attributes {dimension_semantics = [#tpu.dimension_semantics<parallel>, #tpu.dimension_semantics<parallel>], iteration_bounds = array<i64: 2, 1>, scalar_prefetch = 1 : i64, scratch_operands = 0 : i64, tpu.core_type = #tpu.core_type<tc>, window_params = [{transform_indices = @transform_0, window_bounds = array<i64: 1, 128, 128>}, {transform_indices = @transform_1, window_bounds = array<i64: 1, 128, 1>}, {pipeline_mode = #tpu.pipeline_mode<synchronous>, transform_indices = @transform_2, window_bounds = array<i64: 1, 256>}, {pipeline_mode = #tpu.pipeline_mode<synchronous>, transform_indices = @transform_3, window_bounds = array<i64: 128, 256>}, {pipeline_mode = #tpu.pipeline_mode<synchronous>, transform_indices = @transform_4, window_bounds = array<i64: 256, 256>}, {pipeline_mode = #tpu.pipeline_mode<synchronous>, transform_indices = @transform_5, window_bounds = array<i64: 1, 256>}, {pipeline_mode = #tpu.pipeline_mode<synchronous>, transform_indices = @transform_6, window_bounds = array<i64: 1, 128>}, {pipeline_mode = #tpu.pipeline_mode<synchronous>, transform_indices = @transform_7, window_bounds = array<i64: 1, 128>}, {pipeline_mode = #tpu.pipeline_mode<synchronous>, transform_indices = @transform_8, window_bounds = array<i64: 1, 256>}, {pipeline_mode = #tpu.pipeline_mode<synchronous>, transform_indices = @transform_9, window_bounds = array<i64: 1, 256>}, {transform_indices = @transform_10, window_bounds = array<i64: 128, 256>}]} {
    %0 = arith.index_cast %arg0 : i32 to index
    %1 = memref.load %arg2[%0] : memref<2xi32, #tpu.memory_space<smem>>
    %2 = tpu.iota {dimensions = array<i32: 0>} : vector<128x1xi32>
    %c128_i32 = arith.constant 128 : i32
    %3 = arith.muli %arg1, %c128_i32 : i32
    %4 = vector.broadcast %3 : i32 to vector<128x1xi32>
    %5 = arith.addi %2, %4 : vector<128x1xi32>
    %6 = vector.broadcast %1 : i32 to vector<128x1xi32>
    %7 = arith.cmpi slt, %5, %6 : vector<128x1xi32>
    %8 = arith.extui %7 : vector<128x1xi1> to vector<128x1xi32>
    %9 = arith.sitofp %8 : vector<128x1xi32> to vector<128x1xf32>
    %c0 = arith.constant 0 : index
    %c0_0 = arith.constant 0 : index
    %c0_1 = arith.constant 0 : index
    %10 = vector.load %arg3[%c0, %c0_0, %c0_1] : memref<1x128x128xf32, #tpu.memory_space<vmem>>, vector<1x128x128xf32>
    %11 = vector.shape_cast %10 : vector<1x128x128xf32> to vector<128x128xf32>
    %12 = tpu.transpose %11, [1, 0] : vector<128x128xf32> -> vector<128x128xf32>
    %13 = vector.broadcast %9 : vector<128x1xf32> to vector<128x128xf32>
    %14 = arith.mulf %12, %13 : vector<128x128xf32>
    %cst = arith.constant dense<0.000000e+00> : vector<128xf32>
    %15 = vector.multi_reduction <add>, %14, %cst [1] : vector<128x128xf32> to vector<128xf32>
    %16 = vector.shape_cast %15 : vector<128xf32> to vector<128x1xf32>
    %cst_2 = arith.constant 1.280000e+02 : f32
    %17 = vector.broadcast %cst_2 : f32 to vector<128x1xf32>
    %18 = arith.divf %16, %17 : vector<128x1xf32>
    %19 = vector.broadcast %18 : vector<128x1xf32> to vector<128x128xf32>
    %20 = arith.subf %14, %19 : vector<128x128xf32>
    %21 = arith.mulf %20, %20 : vector<128x128xf32>
    %cst_3 = arith.constant dense<0.000000e+00> : vector<128xf32>
    %22 = vector.multi_reduction <add>, %21, %cst_3 [1] : vector<128x128xf32> to vector<128xf32>
    %23 = vector.shape_cast %22 : vector<128xf32> to vector<128x1xf32>
    %cst_4 = arith.constant 1.280000e+02 : f32
    %24 = vector.broadcast %cst_4 : f32 to vector<128x1xf32>
    %25 = arith.divf %23, %24 : vector<128x1xf32>
    %cst_5 = arith.constant 9.99999974E-6 : f32
    %26 = vector.broadcast %cst_5 : f32 to vector<128x1xf32>
    %27 = arith.addf %25, %26 : vector<128x1xf32>
    %28 = math.rsqrt %27 : vector<128x1xf32>
    %29 = vector.broadcast %28 : vector<128x1xf32> to vector<128x128xf32>
    %30 = arith.mulf %20, %29 : vector<128x128xf32>
    %c0_6 = arith.constant 0 : index
    %c0_7 = arith.constant 0 : index
    %31 = vector.load %arg9[%c0_6, %c0_7] : memref<1x128xf32, #tpu.memory_space<vmem>>, vector<1x128xf32>
    %32 = vector.broadcast %31 : vector<1x128xf32> to vector<128x128xf32>
    %33 = arith.mulf %30, %32 : vector<128x128xf32>
    %c0_8 = arith.constant 0 : index
    %c0_9 = arith.constant 0 : index
    %34 = vector.load %arg10[%c0_8, %c0_9] : memref<1x128xf32, #tpu.memory_space<vmem>>, vector<1x128xf32>
    %35 = vector.broadcast %34 : vector<1x128xf32> to vector<128x128xf32>
    %36 = arith.addf %33, %35 : vector<128x128xf32>
    %c0_10 = arith.constant 0 : index
    %c0_11 = arith.constant 0 : index
    %37 = vector.load %arg6[%c0_10, %c0_11] : memref<128x256xf32, #tpu.memory_space<vmem>>, vector<128x256xf32>
    %cst_12 = arith.constant dense<0.000000e+00> : vector<128x256xf32>
    %38 = tpu.matmul %36, %37, %cst_12 {dimension_numbers = #tpu.dot_dimension_numbers<[1], [0], [0], [1], [0, 0, 1, 1], [], []>, precision = #tpu.contract_precision<fp32>} : vector<128x128xf32>, vector<128x256xf32>, vector<128x256xf32> -> vector<128x256xf32>
    %c0_13 = arith.constant 0 : index
    %c0_14 = arith.constant 0 : index
    %39 = vector.load %arg8[%c0_13, %c0_14] : memref<1x256xf32, #tpu.memory_space<vmem>>, vector<1x256xf32>
    %40 = vector.broadcast %39 : vector<1x256xf32> to vector<128x256xf32>
    %41 = arith.addf %38, %40 : vector<128x256xf32>
    %c0_15 = arith.constant 0 : index
    %c0_16 = arith.constant 0 : index
    %c0_17 = arith.constant 0 : index
    %42 = vector.load %arg4[%c0_15, %c0_16, %c0_17] : memref<1x128x1xi32, #tpu.memory_space<vmem>>, vector<1x128x1xi32>
    %43 = vector.shape_cast %42 : vector<1x128x1xi32> to vector<128x1xi32>
    %c0_18 = arith.constant 0 : index
    %c0_19 = arith.constant 0 : index
    %44 = vector.load %arg5[%c0_18, %c0_19] : memref<1x256xi32, #tpu.memory_space<vmem>>, vector<1x256xi32>
    %45 = vector.broadcast %43 : vector<128x1xi32> to vector<128x256xi32>
    %46 = vector.broadcast %44 : vector<1x256xi32> to vector<128x256xi32>
    %47 = arith.cmpi eq, %45, %46 : vector<128x256xi32>
    %48 = arith.extui %47 : vector<128x256xi1> to vector<128x256xi32>
    %49 = arith.sitofp %48 : vector<128x256xi32> to vector<128x256xf32>
    %c0_20 = arith.constant 0 : index
    %c0_21 = arith.constant 0 : index
    %50 = vector.load %arg7[%c0_20, %c0_21] : memref<256x256xf32, #tpu.memory_space<vmem>>, vector<256x256xf32>
    %cst_22 = arith.constant dense<0.000000e+00> : vector<128x256xf32>
    %51 = tpu.matmul %49, %50, %cst_22 {dimension_numbers = #tpu.dot_dimension_numbers<[1], [0], [0], [1], [0, 0, 1, 1], [], []>, precision = #tpu.contract_precision<fp32>} : vector<128x256xf32>, vector<256x256xf32>, vector<128x256xf32> -> vector<128x256xf32>
    %52 = arith.addf %41, %51 : vector<128x256xf32>
    %53 = vector.broadcast %9 : vector<128x1xf32> to vector<128x256xf32>
    %54 = arith.mulf %52, %53 : vector<128x256xf32>
    %cst_23 = arith.constant dense<0.000000e+00> : vector<128xf32>
    %55 = vector.multi_reduction <add>, %54, %cst_23 [1] : vector<128x256xf32> to vector<128xf32>
    %56 = vector.shape_cast %55 : vector<128xf32> to vector<128x1xf32>
    %cst_24 = arith.constant 2.560000e+02 : f32
    %57 = vector.broadcast %cst_24 : f32 to vector<128x1xf32>
    %58 = arith.divf %56, %57 : vector<128x1xf32>
    %59 = vector.broadcast %58 : vector<128x1xf32> to vector<128x256xf32>
    %60 = arith.subf %54, %59 : vector<128x256xf32>
    %61 = arith.mulf %60, %60 : vector<128x256xf32>
    %cst_25 = arith.constant dense<0.000000e+00> : vector<128xf32>
    %62 = vector.multi_reduction <add>, %61, %cst_25 [1] : vector<128x256xf32> to vector<128xf32>
    %63 = vector.shape_cast %62 : vector<128xf32> to vector<128x1xf32>
    %cst_26 = arith.constant 2.560000e+02 : f32
    %64 = vector.broadcast %cst_26 : f32 to vector<128x1xf32>
    %65 = arith.divf %63, %64 : vector<128x1xf32>
    %cst_27 = arith.constant 9.99999974E-6 : f32
    %66 = vector.broadcast %cst_27 : f32 to vector<128x1xf32>
    %67 = arith.addf %65, %66 : vector<128x1xf32>
    %68 = math.rsqrt %67 : vector<128x1xf32>
    %69 = vector.broadcast %68 : vector<128x1xf32> to vector<128x256xf32>
    %70 = arith.mulf %60, %69 : vector<128x256xf32>
    %c0_28 = arith.constant 0 : index
    %c0_29 = arith.constant 0 : index
    %71 = vector.load %arg11[%c0_28, %c0_29] : memref<1x256xf32, #tpu.memory_space<vmem>>, vector<1x256xf32>
    %72 = vector.broadcast %71 : vector<1x256xf32> to vector<128x256xf32>
    %73 = arith.mulf %70, %72 : vector<128x256xf32>
    %c0_30 = arith.constant 0 : index
    %c0_31 = arith.constant 0 : index
    %74 = vector.load %arg12[%c0_30, %c0_31] : memref<1x256xf32, #tpu.memory_space<vmem>>, vector<1x256xf32>
    %75 = vector.broadcast %74 : vector<1x256xf32> to vector<128x256xf32>
    %76 = arith.addf %73, %75 : vector<128x256xf32>
    %77 = vector.broadcast %9 : vector<128x1xf32> to vector<128x256xf32>
    %78 = arith.mulf %76, %77 : vector<128x256xf32>
    %c0_32 = arith.constant 0 : index
    %c0_33 = arith.constant 0 : index
    %79 = vector.load %arg13[%c0_32, %c0_33] : memref<128x256xf32, #tpu.memory_space<vmem>>, vector<128x256xf32>
    tpu.vector_store %arg13[%c0_32, %c0_33], %78 {strides = array<i32>} : memref<128x256xf32, #tpu.memory_space<vmem>>, vector<128x256xf32>,
    return
  }
  func.func @transform_0(%arg0: i32, %arg1: i32, %arg2: memref<2xi32, #tpu.memory_space<smem>>) -> (i32, i32, i32) {
    %c0_i32 = arith.constant 0 : i32
    %c0_i32_0 = arith.constant 0 : i32
    return %arg0, %c0_i32, %arg1 : i32, i32, i32
  }
  func.func @transform_1(%arg0: i32, %arg1: i32, %arg2: memref<2xi32, #tpu.memory_space<smem>>) -> (i32, i32, i32) {
    %c0_i32 = arith.constant 0 : i32
    %c0_i32_0 = arith.constant 0 : i32
    return %arg0, %arg1, %c0_i32 : i32, i32, i32
  }
  func.func @transform_2(%arg0: i32, %arg1: i32, %arg2: memref<2xi32, #tpu.memory_space<smem>>) -> (i32, i32) {
    %c0_i32 = arith.constant 0 : i32
    %c0_i32_0 = arith.constant 0 : i32
    %c0_i32_1 = arith.constant 0 : i32
    return %c0_i32, %c0_i32_0 : i32, i32
  }
  func.func @transform_3(%arg0: i32, %arg1: i32, %arg2: memref<2xi32, #tpu.memory_space<smem>>) -> (i32, i32) {
    %c0_i32 = arith.constant 0 : i32
    %c0_i32_0 = arith.constant 0 : i32
    %c0_i32_1 = arith.constant 0 : i32
    return %c0_i32, %c0_i32_0 : i32, i32
  }
  func.func @transform_4(%arg0: i32, %arg1: i32, %arg2: memref<2xi32, #tpu.memory_space<smem>>) -> (i32, i32) {
    %c0_i32 = arith.constant 0 : i32
    %c0_i32_0 = arith.constant 0 : i32
    %c0_i32_1 = arith.constant 0 : i32
    return %c0_i32, %c0_i32_0 : i32, i32
  }
  func.func @transform_5(%arg0: i32, %arg1: i32, %arg2: memref<2xi32, #tpu.memory_space<smem>>) -> (i32, i32) {
    %c0_i32 = arith.constant 0 : i32
    %c0_i32_0 = arith.constant 0 : i32
    %c0_i32_1 = arith.constant 0 : i32
    return %c0_i32, %c0_i32_0 : i32, i32
  }
  func.func @transform_6(%arg0: i32, %arg1: i32, %arg2: memref<2xi32, #tpu.memory_space<smem>>) -> (i32, i32) {
    %c0_i32 = arith.constant 0 : i32
    %c0_i32_0 = arith.constant 0 : i32
    %c0_i32_1 = arith.constant 0 : i32
    return %c0_i32, %c0_i32_0 : i32, i32
  }
  func.func @transform_7(%arg0: i32, %arg1: i32, %arg2: memref<2xi32, #tpu.memory_space<smem>>) -> (i32, i32) {
    %c0_i32 = arith.constant 0 : i32
    %c0_i32_0 = arith.constant 0 : i32
    %c0_i32_1 = arith.constant 0 : i32
    return %c0_i32, %c0_i32_0 : i32, i32
  }
  func.func @transform_8(%arg0: i32, %arg1: i32, %arg2: memref<2xi32, #tpu.memory_space<smem>>) -> (i32, i32) {
    %c0_i32 = arith.constant 0 : i32
    %c0_i32_0 = arith.constant 0 : i32
    %c0_i32_1 = arith.constant 0 : i32
    return %c0_i32, %c0_i32_0 : i32, i32
  }
  func.func @transform_9(%arg0: i32, %arg1: i32, %arg2: memref<2xi32, #tpu.memory_space<smem>>) -> (i32, i32) {
    %c0_i32 = arith.constant 0 : i32
    %c0_i32_0 = arith.constant 0 : i32
    %c0_i32_1 = arith.constant 0 : i32
    return %c0_i32, %c0_i32_0 : i32, i32
  }
  func.func @transform_10(%arg0: i32, %arg1: i32, %arg2: memref<2xi32, #tpu.memory_space<smem>>) -> (i32, i32) {
    %c0_i32 = arith.constant 0 : i32
    return %arg1, %arg0 : i32, i32
  }
}

</mosaic_0001>

<bundles_post_ra>
// kernel: tpu_custom_call.1
= control target key start
LH: loop header
LB: loop body
LE: loop exit
PB: predicated region body
PF: predicated region fallthrough
CT: control target
= control target key end

     0   :  { %s11555_s0 = inlined_call_operand.vmem [shape: s32[2], index: 0, kind: input, shape index: {}]   ;;  %s11556_s1 = inlined_call_operand.vmem [shape: f32[2,128,128], index: 1, kind: input, shape index: {}]   ;;  %s11557_s2 = inlined_call_operand.vmem [shape: s32[2,128,1], index: 2, kind: input, shape index: {}]   ;;  %s11558_s3 = inlined_call_operand.vmem [shape: s32[1,256], index: 3, kind: input, shape index: {}]   ;;  %s11559_s4 = inlined_call_operand.hbm [shape: f32[128,256], index: 4, kind: input, shape index: {}]   ;;  %s11560_s5 = inlined_call_operand.hbm [shape: f32[256,256], index: 5, kind: input, shape index: {}]   ;;  %s11561_s6 = inlined_call_operand.vmem [shape: f32[1,256], index: 6, kind: input, shape index: {}]   ;;  %s11562_s7 = inlined_call_operand.vmem [shape: f32[1,128], index: 7, kind: input, shape index: {}]   ;;  %s11563_s8 = inlined_call_operand.vmem [shape: f32[1,128], index: 8, kind: input, shape index: {}]   ;;  %s11564_s9 = inlined_call_operand.vmem [shape: f32[1,256], index: 9, kind: input, shape index: {}]   ;;  %s11565_s10 = inlined_call_operand.vmem [shape: f32[1,256], index: 10, kind: input, shape index: {}]   ;;  %s11566_s11 = inlined_call_operand.hbm [shape: f32[128,512], index: 11, kind: output, shape index: {}]  }
   0x1   :  { %s16_s19 = sshll.u32 %s11555_s0, 4  ;;  %s17_s19 = int_to_ptr.vmem [resolvable:$true] %s16_s19 }
   0x2   :  { %s6799_s20 = scalar_lea.vmem %s17_s19, 16  ;;  %p6804_p1 = scmp.lt.s32.totalorder %s17_s19, %s17_s19 }
   0x3   :  { %p6800_p0 = scmp.ne.s32.totalorder %s17_s19, %s6799_s20  ;;  %p6805_p2 = scmp.lt.s32.totalorder %s6799_s20, %s6799_s20 }
   0x5   :  { %p6806_p3 = por %p6805_p2, %p6804_p1 }
   0x7   :  { %p6807_p4 = pnand %p6806_p3, %p6800_p0 }
   0x9   :  { %6810 = shalt.err (!%p6807_p4)  }
   0xa   :  { %s6957_s21 = smov [#allocation3]  }
   0xb   :  { %19 = dma.vmem_to_smem %s17_s19, 16, %s6957_s21, [#allocation2] }
   0xc   :  { %6919 = dma.done.wait [#allocation2], 16 }
   0xd   :  { %6920 = vsyncadd [#allocation2], 4294967280 }
   0xe   :  { %21 = sfence }
   0xf   :  { %22 = vsyncpa [#allocation5], 0 }
  0x10   :  { %23 = vsyncpa [#allocation8], 0 }
  0x11   :  { %24 = vsyncpa [#allocation6], 0 }
  0x12   :  { %26 = vsyncpa [#allocation6 + $0x1], 0  ;;  %s7032_s22 = smov 0   ;;  %s7034_s0 = smov 0  }
  0x13   :  { %s7036_s23 = smov 0   ;;  %s7038_s24 = smov 0  }
  0x14   :  { %s7040_s25 = smov 0   ;;  %s7042_s26 = smov 0  }
  0x15 LB: > { %12164 = sst [smem:[#allocation14_spill]] %s6935_s22  ;;  %s5520_s27 = sadd.s32 4294967295, %s6955_s26   ;;  %s6955_s26 = sphi %s7042_s26, %s32_s26   ;;  %s6951_s25 = sphi %s7040_s25, %s13395_s25   ;;  %s6947_s24 = sphi %s7038_s24, %s13394_s24   ;;  %s6943_s23 = sphi %s7036_s23, %s13393_s23   ;;  %s6939_s0 = sphi %s7034_s0, %s13397_s0   ;;  %s6935_s22 = sphi %s7032_s22, %s13396_s22  }
  0x16   : > { %12165 = sst [smem:[#allocation15_spill]] %s6943_s23  ;;  %s5521_s28 = sadd.s32 4294967294, %s6955_s26  }
  0x17   : > { %12166 = sst [smem:[#allocation16_spill]] %s6951_s25  ;;  %s44_s29 = sadd.s32 1, %s6951_s25 }
  0x18   : > { %s277_s30 = sadd.s32 1, %s6943_s23  ;;  %p46_p5 = scmp.ge.s32.totalorder %s44_s29, 2 }
  0x19   : > { %p287_p6 = scmp.ne.s32.totalorder %s6943_s23, %s6939_s0  ;;  %p288_p7 = scmp.eq.s32.totalorder %s5520_s27, 1 }
  0x1a   : > { %p293_p8 = scmp.ne.s32.totalorder %s6939_s0, %s6935_s22  ;;  %s13399_s29 = smov (%p46_p5, %s44_s29), 0 }
  0x1b   : > { %12167 = sst [smem:[#allocation17_spill]] %s13399_s29  ;;  %p7072_p9 = por %p288_p7, %p287_p6 }
  0x1c   : > { %p294_p10 = scmp.eq.s32.totalorder %s5521_s28, 1  ;;  %s273_s13 = ssub.s32 %s6951_s25, %s13399_s29 }
  0x1d   : > { %s12168_s12 = scalar_select %p7072_p9, 1, 0 }
  0x1e   : > { %p5522_p11 = scmp.ge.s32.totalorder %s6955_s26, 1  ;;  %p275_p12 = scmp.eq.s32.totalorder %s273_s13, 0 }
  0x1f   : > { %p7079_p13 = por %p294_p10, %p293_p8  ;;  %p301_p0 = scmp.lt.s32.totalorder %s6955_s26, 3 }
  0x20   : > { %s7085_s15 = scalar_select %p275_p12, %s6943_s23, %s277_s30  }
  0x21   : > { %s12169_s14 = scalar_select %p7079_p13, 1, 0 }
  0x22   : > { %12171 = sst [smem:[#allocation19_spill]] %s7085_s15  ;;  %p7087_p1 = pnand %p5522_p11, %p301_p0 }
  0x23   : > { %12170 = sst [smem:[#allocation18_spill]] %s12169_s14  ;;  %p7091_p2 = scmp.eq.s32.totalorder %s5520_s27, 0 }
  0x24   : > { %s12172_s16 = scalar_select %p7087_p1, 1, 0 }
  0x25   : > { %s12173_s17 = scalar_select %p7091_p2, 1, 0 }
  0x26   : > { %p6658_p3 = pneg %p7087_p1  ;;  %s6958_s18 = smov [#allocation4]  }
  0x27   : > { %s316_s19 = sshll.u32 %s6958_s18, 4  ;;  %s6959_s21 = smov [#allocation7]   ;;  %s317_s19 = int_to_ptr.vmem [resolvable:$true] %s316_s19 }
  0x28   : > { %p7099_p4 = pnand %p7091_p2, %p6658_p3  ;;  %s329_s28 = sshll.u32 %s6959_s21, 4  ;;  %s7103_s28 = int_to_ptr.vmem [resolvable:$true] %s329_s28 }
  0x29   : > { %s6811_s13 = scalar_lea.hbm %s11559_s4, 4096 }
  0x2a   : > { %p6812_p5 = scmp.ne.s32.totalorder %s11559_s4, %s6811_s13  ;;  %p6813_p6 = pneg %p7099_p4 }
  0x2b   : > { %p6818_p10 = scmp.lt.u32.totalorder %s6811_s13, %s11559_s4 }
  0x2c   : > { %p6814_p7 = pnand %p6813_p6, %p6812_p5 }
  0x2e   : > { %p6815_p8 = pneg %p6814_p7 }
  0x30   : > { %p6820_p11 = pnand %p6818_p10, %p6815_p8 }
  0x32   : > { %6823 = shalt.err (!%p6820_p11)
}
  0x33   : > { %s6824_s21 = scalar_lea.vmem %s317_s19, 4096  ;;  %p6832_p13 = scmp.lt.s32.totalorder %s317_s19, %s317_s19 }
  0x34   : > { %p6825_p12 = scmp.ne.s32.totalorder %s317_s19, %s6824_s21  ;;  %p6833_p9 = scmp.lt.s32.totalorder %s6824_s21, %s6824_s21 }
  0x36   : > { %p6827_p0 = pnand %p6825_p12, %p6813_p6  ;;  %p6834_p2 = por %p6833_p9, %p6832_p13 }
  0x38   : > { %p6828_p3 = pneg %p6827_p0 }
  0x3a   : > { %p6835_p1 = pnand %p6834_p2, %p6828_p3 }
  0x3c   : > { %6838 = shalt.err (!%p6835_p1)
}
  0x3d   : > { %s6960_s25 = smov 256   ;;  %s6961_s29 = smov 16  }
  0x3e   : > { %6661 = dma.hbm_to_vmem [thread:$0]  (!%p7099_p4), %s11559_s4, 4096, %s317_s19, [#allocation5], %s6960_s25, %s6960_s25, %s6961_s29  }
  0x3f   : > { %s6839_s18 = scalar_lea.hbm %s11560_s5, 8192 }
  0x40   : > { %p6840_p5 = scmp.ne.s32.totalorder %s11560_s5, %s6839_s18  ;;  %p6846_p1 = scmp.lt.u32.totalorder %s6839_s18, %s11560_s5 }
  0x42   : > { %p6842_p9 = pnand %p6840_p5, %p6813_p6 }
  0x44   : > { %p6843_p13 = pneg %p6842_p9 }
  0x46   : > { %p6848_p2 = pnand %p6846_p1, %p6843_p13 }
  0x48   : > { %6851 = shalt.err (!%p6848_p2)
}
  0x49   : > { %s6852_s19 = scalar_lea.vmem %s7103_s28, 8192  ;;  %p6860_p11 = scmp.lt.s32.totalorder %s7103_s28, %s7103_s28 }
  0x4a   : > { %p6853_p7 = scmp.ne.s32.totalorder %s7103_s28, %s6852_s19  ;;  %p6861_p12 = scmp.lt.s32.totalorder %s6852_s19, %s6852_s19 }
  0x4c   : > { %p6855_p8 = pnand %p6853_p7, %p6813_p6  ;;  %p6862_p0 = por %p6861_p12, %p6860_p11 }
  0x4e   : > { %p6856_p10 = pneg %p6855_p8 }
  0x50   : > { %p6863_p3 = pnand %p6862_p0, %p6856_p10 }
  0x52   : > { %6866 = shalt.err (!%p6863_p3)
}
  0x53   : > { %6664 = dma.hbm_to_vmem [thread:$0]  (!%p7099_p4), %s11560_s5, 8192, %s7103_s28, [#allocation8], %s6960_s25, %s6960_s25, %s6961_s29  }
  0x54   : > { %p12175_p5 = scmp.ne.s32.totalorder %s12172_s16, 0 }
  0x56   : > { %384 = sbr.rel (%p12175_p5) target bundleno = 1494 (0x5d6), region = 60 }
  0x5d   : > { %p12176_p9 = scmp.ne.s32.totalorder %s12173_s17, 0 }
  0x5f   : > { %6922 = dma.done.wait (%p12176_p9), [#allocation5], 4096  }
  0x60   : > { %6924 = vsyncadd (%p12176_p9), [#allocation5], 4294963200 }
  0x61   : > { %6926 = dma.done.wait (%p12176_p9), [#allocation8], 8192  }
  0x62   : > { %6928 = vsyncadd (%p12176_p9), [#allocation8], 4294959104  ;;  %p438_p6 = scmp.lt.s32.totalorder %s6947_s24, 1  ;;  %v11576_v0 = vmov 0.0   ;;  %s458_s17 = sld [smem:[#allocation3 + %s6947_s24]]  ;;  %v459_v17 = vlaneseq }
  0x63   : > { %2351 = vmatprep.mubr.f32.mxu0 %v11576_v0  ;;  %970 = vmatprep.mubr.f32.mxu1 %v11576_v0  ;;  %p13388_p13 = scmp.ne.s32.totalorder %s12168_s12, 0  ;;  %s6965_s22 = smov [#allocation9]  }
  0x64   : > { %s7166_s14 = scalar_select %p438_p6, %s6947_s24, 1  ;;  %v7193_v18 = vshrl.u32 %v459_v17, 7 }
  0x65   : > { %s6871_s23 = sshll.u32 %s6965_s22, 4  ;;  %s6872_s23 = int_to_ptr.vmem [resolvable:$false] %s6871_s23 }
  0x66   : > { %s5685_s16 = sshll.u32 %s7166_s14, 7  ;;  %12177 = vst [vmem:[#allocation20_spill] sm:$0xff] %v7193_v18  ;;  %v461_v20 = vadd.s32 8, %v7193_v18  ;;  %v462_v22 = vadd.s32 16, %v7193_v18  ;;  %v463_v26 = vadd.s32 24, %v7193_v18  ;;  %v464_v30 = vadd.s32 32, %v7193_v18 }
  0x67   : > { %s7174_s25 = scalar_lea.vmem %s11556_s1, %s5685_s16  ;;  %v465_v34 = vadd.s32 40, %v7193_v18  ;;  %v466_v38 = vadd.s32 48, %v7193_v18  ;;  %v467_v42 = vadd.s32 56, %v7193_v18  ;;  %v468_v46 = vadd.s32 64, %v7193_v18  ;;  %s7822_s27 = scalar_lea.vmem %s11557_s2, %s5685_s16 }
  0x68   : > { %v543_v1 = vld [vmem:[%s7174_s25] sm:$0xff]  ;;  %v544_v2 = vld [vmem:[%s7174_s25 + $0x8] sm:$0xff]  ;;  %v545_v3 = vld [vmem:[%s7174_s25 + $0x10] sm:$0xff]  ;;  %v7195_v19 = vstv %s458_s17  ;;  %v469_v50 = vadd.s32 72, %v7193_v18  ;;  %v470_v54 = vadd.s32 80, %v7193_v18  ;;  %v471_v58 = vadd.s32 88, %v7193_v18 }
  0x69   : > { %559 = vxpose.xlu0.b32.start [1/16] %v543_v1, 128  ;;  %v546_v4 = vld [vmem:[%s7174_s25 + $0x18] sm:$0xff]  ;;  %v547_v5 = vld [vmem:[%s7174_s25 + $0x20] sm:$0xff]  ;;  %v548_v6 = vld [vmem:[%s7174_s25 + $0x28] sm:$0xff]  ;;  %vm495_vm0 = vcmp.lt.s32.totalorder %v7193_v18, %v7195_v19  ;;  %vm496_vm1 = vcmp.lt.s32.totalorder %v461_v20, %v7195_v19  ;;  %vm497_vm2 = vcmp.lt.s32.totalorder %v462_v22, %v7195_v19  ;;  %vm498_vm3 = vcmp.lt.s32.totalorder %v463_v26, %v7195_v19  ;;  %s435_s17 = sand.u32 1, %s6939_s0   ;;  %s6873_s14 = scalar_lea.vmem %s6872_s23, 8192 }
  0x6a   : > { %v549_v7 = vld [vmem:[%s7174_s25 + $0x30] sm:$0xff]  ;;  %v550_v8 = vld [vmem:[%s7174_s25 + $0x38] sm:$0xff]  ;;  %v551_v9 = vld [vmem:[%s7174_s25 + $0x40] sm:$0xff]  ;;  %v7201_v21 = vsel %vm495_vm0, 1.0, %v11576_v0  ;;  %v7209_v25 = vsel %vm496_vm1, 1.0, %v11576_v0  ;;  %v7218_v29 = vsel %vm497_vm2, 1.0, %v11576_v0  ;;  %vm499_vm4 = vcmp.lt.s32.totalorder %v464_v30, %v7195_v19 }
  0x6b   : > { %v552_v10 = vld [vmem:[%s7174_s25 + $0x48] sm:$0xff]  ;;  %v553_v11 = vld [vmem:[%s7174_s25 + $0x50] sm:$0xff]  ;;  %v554_v12 = vld [vmem:[%s7174_s25 + $0x58] sm:$0xff]  ;;  %12178 = vst [vmem:[#allocation21_spill] sm:$0xff] %v7201_v21  ;;  %v7227_v33 = vsel %vm498_vm3, 1.0, %v11576_v0  ;;  %v7236_v37 = vsel %vm499_vm4, 1.0, %v11576_v0  ;;  %vm500_vm5 = vcmp.lt.s32.totalorder %v465_v34, %v7195_v19  ;;  %vm501_vm6 = vcmp.lt.s32.totalorder %v466_v38, %v7195_v19 }
  0x6c   : > { %v555_v13 = vld [vmem:[%s7174_s25 + $0x60] sm:$0xff]  ;;  %v556_v14 = vld [vmem:[%s7174_s25 + $0x68] sm:$0xff]  ;;  %v557_v15 = vld [vmem:[%s7174_s25 + $0x70] sm:$0xff]  ;;  %12179 = vst [vmem:[#allocation22_spill] sm:$0xff] %v7209_v25  ;;  %v7245_v41 = vsel %vm500_vm5, 1.0, %v11576_v0  ;;  %v7254_v45 = vsel %vm501_vm6, 1.0, %v11576_v0  ;;  %vm502_vm7 = vcmp.lt.s32.totalorder %v467_v42, %v7195_v19  ;;  %vm503_vm8 = vcmp.lt.s32.totalorder %v468_v46, %v7195_v19 }
  0x6d   : > { %560 = vxpose.xlu0.b32.cont [2/16] %v544_v2, 128  ;;  %v558_v16 = vld [vmem:[%s7174_s25 + $0x78] sm:$0xff]  ;;  %12180 = vst [vmem:[#allocation23_spill] sm:$0xff] %v7218_v29  ;;  %12181 = vst [vmem:[#allocation24_spill] sm:$0xff] %v7227_v33  ;;  %v7263_v49 = vsel %vm502_vm7, 1.0, %v11576_v0  ;;  %v7272_v53 = vsel %vm503_vm8, 1.0, %v11576_v0  ;;  %vm504_vm9 = vcmp.lt.s32.totalorder %v469_v50, %v7195_v19  ;;  %vm505_vm10 = vcmp.lt.s32.totalorder %v470_v54, %v7195_v19  ;;  %v831_v26 = vld [vmem:[#allocation4 + $0x8] sm:$0xff] }
  0x6e   : > { %12182 = vst [vmem:[#allocation25_spill] sm:$0xff] %v7236_v37  ;;  %12183 = vst [vmem:[#allocation26_spill] sm:$0xff] %v7245_v41  ;;  %v7281_v57 = vsel %vm504_vm9, 1.0, %v11576_v0  ;;  %v7290_v61 = vsel %vm505_vm10, 1.0, %v11576_v0  ;;  %vm506_vm11 = vcmp.lt.s32.totalorder %v471_v58, %v7195_v19  ;;  %v472_v62 = vadd.s32 96, %v7193_v18  ;;  %v832_v34 = vld [vmem:[#allocation4 + $0x10] sm:$0xff] }
  0x6f   : > { %12184 = vst [vmem:[#allocation27_spill] sm:$0xff] %v7254_v45  ;;  %12185 = vst [vmem:[#allocation28_spill] sm:$0xff] %v7263_v49  ;;  %v7299_v2 = vsel %vm506_vm11, 1.0, %v11576_v0  ;;  %v874_v30 = vand.u32 4294901760, %v831_v26  ;;  %v835_v38 = vld [vmem:[#allocation4 + $0x28] sm:$0xff]  ;;  %v880_v42 = vand.u32 4294901760, %v832_v34 }
  0x70   : > { %12186 = vst [vmem:[#allocation29_spill] sm:$0xff] %v7272_v53  ;;  %12187 = vst [vmem:[#allocation30_spill] sm:$0xff] %v7281_v57  ;;  %vm507_vm12 = vcmp.lt.s32.totalorder %v472_v62, %v7195_v19  ;;  %v836_v50 = vld [vmem:[#allocation4 + $0x30] sm:$0xff]  ;;  %v841_v62 = vld [vmem:[#allocation4 + $0x58] sm:$0xff]  ;;  %s5529_s29 = sshll.u32 %s435_s17, 8  ;;  %s11509_s21 = scalar_lea.sflag [#allocation6], %s435_s17 }
  0x71   : > { %561 = vxpose.xlu0.b32.cont [3/16] %v545_v3, 128  ;;  %12188 = vst [vmem:[#allocation31_spill] sm:$0xff] %v7290_v61  ;;  %12189 = vst [vmem:[#allocation32_spill] sm:$0xff] %v7299_v2  ;;  %v473_v3 = vadd.s32 104, %v7193_v18  ;;  %s11348_s15 = scalar_lea.vmem [#allocation9], %s5529_s29 }
  0x72   : > { %s5401_s30 = sshll.u32 %s11348_s15, 4  ;;  %s11501_s30 = int_to_ptr.vmem [resolvable:$true] %s5401_s30 }
  0x73   : > { %vm508_vm13 = vcmp.lt.s32.totalorder %v473_v3, %v7195_v19  ;;  %v7351_v3 = vsub.f32 %v832_v34, %v880_v42  ;;  %s6867_s19 = scalar_lea.vmem %s11501_s30, 4096  ;;  %p6874_p7 = scmp.lt.s32.totalorder %s11501_s30, %s6872_s23 }
  0x74   : > { %p6868_p4 = scmp.ne.s32.totalorder %s11501_s30, %s6867_s19  ;;  %p6875_p8 = scmp.lt.s32.totalorder %s6873_s14, %s6867_s19 }
  0x75   : > { %562 = vxpose.xlu0.b32.cont [4/16] %v546_v4, 128  ;;  %12199 = vst [vmem:[#allocation42_spill] sm:$0xff] %v7351_v3 }
  0x76   : > { %p6869_p1 = pnand %p6868_p4, %p13388_p13  ;;  %p6876_p10 = por %p6875_p8, %p6874_p7 }
  0x78   : > { %p6870_p2 = pneg %p6869_p1 }
  0x79   : > { %563 = vxpose.xlu0.b32.cont [5/16] %v547_v5, 128 }
  0x7a   : > { %p6877_p11 = pnand %p6876_p10, %p6870_p2 }
  0x7d   : > { %564 = vxpose.xlu0.b32.cont [6/16] %v548_v6, 128  ;;  %v7308_v6 = vsel %vm507_vm12, 1.0, %v11576_v0 }
  0x7e   : > { %12190 = vst [vmem:[#allocation33_spill] sm:$0xff] %v7308_v6 }
  0x81   : > { %565 = vxpose.xlu0.b32.cont [7/16] %v549_v7, 128  ;;  %v474_v7 = vadd.s32 112, %v7193_v18 }
  0x83   : > { %vm509_vm14 = vcmp.lt.s32.totalorder %v474_v7, %v7195_v19 }
  0x85   : > { %566 = vxpose.xlu0.b32.cont [8/16] %v550_v8, 128 }
  0x89   : > { %567 = vxpose.xlu0.b32.cont [9/16] %v551_v9, 128 }
  0x8d   : > { %568 = vxpose.xlu0.b32.cont [10/16] %v552_v10, 128  ;;  %v7317_v10 = vsel %vm508_vm13, 1.0, %v11576_v0 }
  0x8e   : > { %12191 = vst [vmem:[#allocation34_spill] sm:$0xff] %v7317_v10 }
  0x91   : > { %569 = vxpose.xlu0.b32.cont [11/16] %v553_v11, 128  ;;  %v475_v11 = vadd.s32 120, %v7193_v18 }
  0x93   : > { %vm510_vm15 = vcmp.lt.s32.totalorder %v475_v11, %v7195_v19  ;;  %v833_v19 = vld [vmem:[#allocation4 + $0x18] sm:$0xff] }
  0x94   : > { %v7334_v17 = vsel %vm510_vm15, 1.0, %v11576_v0 }
  0x95   : > { %570 = vxpose.xlu0.b32.cont [12/16] %v554_v12, 128  ;;  %12193 = vst [vmem:[#allocation36_spill] sm:$0xff] %v7334_v17 }
  0x99   : > { %571 = vxpose.xlu0.b32.cont [13/16] %v555_v13, 128 }
  0x9d   : > { %572 = vxpose.xlu0.b32.cont [14/16] %v556_v14, 128  ;;  %v7326_v14 = vsel %vm509_vm14, 1.0, %v11576_v0 }
  0x9e   : > { %12192 = vst [vmem:[#allocation35_spill] sm:$0xff] %v7326_v14 }
  0xa1   : > { %573 = vxpose.xlu0.b32.cont [15/16] %v557_v15, 128 }
  0xa5   : > { %574 = vxpose.xlu0.b32.end [16/16] %v558_v16, 128 }
  0xe9   : > { %v575_v23 = vpop.trf.xlu0 }
  0xea   : > { %v7206_v24 = vmul.f32 %v7201_v21, %v575_v23  ;;  %v6963_v23 = vmov 0  }
  0xeb   : > { %6733 = vset.pattern.permute.xlu1 %v6963_v23  ;;  %6734 = vset.pattern.permute.xlu0 %v6963_v23 }
  0xec   : > { %607 = vadd.xlane.f32.xlu1 %v7206_v24 }
  0xed   : > { %v576_v27 = vpop.trf.xlu0 }
  0xee   : > { %v7215_v28 = vmul.f32 %v7209_v25, %v576_v27  ;;  %v830_v27 = vld [vmem:[#allocation4] sm:$0xff]  ;;  %v7517_v25 = vld [vmem:[#allocation7 + $0x8] sm:$0xff] }
  0xef   : > { %12220 = vst [vmem:[#allocation63_spill] sm:$0xff] %v7517_v25 }
  0xf0   : > { %609 = vadd.xlane.f32.xlu1 %v7215_v28 }
  0xf1   : > { %v577_v31 = vpop.trf.xlu0 }
  0xf2   : > { %v7224_v32 = vmul.f32 %v7218_v29, %v577_v31  ;;  %v878_v31 = vand.u32 4294901760, %v833_v19  ;;  %v7515_v29 = vld [vmem:[#allocation4 + $0xd8] sm:$0xff] }
  0xf4   : > { %611 = vadd.xlane.f32.xlu1 %v7224_v32  ;;  %v7341_v54 = vpack.c.bf16 %v878_v31, %v874_v30  ;;  %v7345_v58 = vsub.f32 %v833_v19, %v878_v31 }
  0xf5   : > { %v578_v35 = vpop.trf.xlu0 }
  0xf6   : > { %v7233_v36 = vmul.f32 %v7227_v33, %v578_v35  ;;  %v876_v35 = vand.u32 4294901760, %v830_v27  ;;  %12194 = vst [vmem:[#allocation37_spill] sm:$0xff] %v7341_v54  ;;  %12196 = vst [vmem:[#allocation39_spill] sm:$0xff] %v7345_v58  ;;  %5849 = vmatprep.subr.bf16.mxu0 %v7341_v54  ;;  %5689 = vmatprep.subr.bf16.mxu1 %v7341_v54  ;;  %v7513_v33 = vld [vmem:[#allocation4 + $0xc8] sm:$0xff] }
  0xf8   : > { %613 = vadd.xlane.f32.xlu1 %v7233_v36 }
  0xf9   : > { %v579_v39 = vpop.trf.xlu0 }
  0xfa   : > { %v7242_v40 = vmul.f32 %v7236_v37, %v579_v39  ;;  %v837_v39 = vld [vmem:[#allocation4 + $0x38] sm:$0xff] }
  0xfb   : > { %v886_v46 = vand.u32 4294901760, %v837_v39 }
  0xfc   : > { %615 = vadd.xlane.f32.xlu1 %v7242_v40 }
  0xfd   : > { %v580_v43 = vpop.trf.xlu0 }
  0xfe   : > { %v7251_v44 = vmul.f32 %v7245_v41, %v580_v43  ;;  %v882_v43 = vand.u32 4294901760, %v835_v38 }
 0x100   : > { %617 = vadd.xlane.f32.xlu1 %v7251_v44  ;;  %v7355_v7 = vsub.f32 %v835_v38, %v882_v43 }
 0x101   : > { %v581_v47 = vpop.trf.xlu0 }
 0x102   : > { %v7260_v48 = vmul.f32 %v7254_v45, %v581_v47  ;;  %v834_v47 = vld [vmem:[#allocation4 + $0x20] sm:$0xff]  ;;  %12201 = vst [vmem:[#allocation44_spill] sm:$0xff] %v7355_v7 }
 0x103   : > { %v884_v11 = vand.u32 4294901760, %v834_v47 }
 0x104   : > { %619 = vadd.xlane.f32.xlu1 %v7260_v48 }
 0x105   : > { %v582_v51 = vpop.trf.xlu0 }
 0x106   : > { %v7269_v52 = vmul.f32 %v7263_v49, %v582_v51  ;;  %v839_v51 = vld [vmem:[#allocation4 + $0x48] sm:$0xff] }
 0x108   : > { %621 = vadd.xlane.f32.xlu1 %v7269_v52 }
 0x109   : > { %v583_v55 = vpop.trf.xlu0 }
 0x10a   : > { %v7278_v56 = vmul.f32 %v7272_v53, %v583_v55  ;;  %v7343_v55 = vsub.f32 %v831_v26, %v874_v30  ;;  %v7366_v26 = vsub.f32 %v834_v47, %v884_v11  ;;  %v7482_v53 = vld [vmem:[#allocation4 + $0xb8] sm:$0xff] }
 0x10c   : > { %623 = vadd.xlane.f32.xlu1 %v7278_v56  ;;  %12195 = vst [vmem:[#allocation38_spill] sm:$0xff] %v7343_v55  ;;  %12204 = vst [vmem:[#allocation47_spill] sm:$0xff] %v7366_v26 }
 0x10d   : > { %v584_v59 = vpop.trf.xlu0 }
 0x10e   : > { %v7287_v60 = vmul.f32 %v7281_v57, %v584_v59  ;;  %v7347_v59 = vsub.f32 %v830_v27, %v876_v35  ;;  %v7480_v57 = vld [vmem:[#allocation4 + $0xa8] sm:$0xff] }
 0x110   : > { %625 = vadd.xlane.f32.xlu1 %v7287_v60  ;;  %12197 = vst [vmem:[#allocation40_spill] sm:$0xff] %v7347_v59 }
 0x111   : > { %v585_v63 = vpop.trf.xlu0 }
 0x112   : > { %v7296_v1 = vmul.f32 %v7290_v61, %v585_v63  ;;  %v7349_v63 = vpack.c.bf16 %v880_v42, %v876_v35 }
 0x114   : > { %627 = vadd.xlane.f32.xlu1 %v7296_v1  ;;  %12198 = vst [vmem:[#allocation41_spill] sm:$0xff] %v7349_v63  ;;  %5851 = vmatpush1.bf16.msra.mxu0 %v7349_v63 }
 0x115   : > { %v586_v4 = vpop.trf.xlu0  ;;  %5691 = vmatpush1.bf16.msra.mxu1 %v7349_v63 }
 0x116   : > { %v7305_v5 = vmul.f32 %v7299_v2, %v586_v4  ;;  %v7353_v4 = vpack.c.bf16 %v886_v46, %v882_v43 }
 0x118   : > { %629 = vadd.xlane.f32.xlu1 %v7305_v5  ;;  %12200 = vst [vmem:[#allocation43_spill] sm:$0xff] %v7353_v4  ;;  %5853 = vmatprep.subr.bf16.mxu0 %v7353_v4 }
 0x119   : > { %v587_v8 = vpop.trf.xlu0  ;;  %5693 = vmatprep.subr.bf16.mxu1 %v7353_v4  ;;  %v7582_v4 = vld [vmem:[#allocation4 + $0xe0] sm:$0xff] }
 0x11a   : > { %v7314_v9 = vmul.f32 %v7308_v6, %v587_v8  ;;  %v7358_v8 = vsub.f32 %v837_v39, %v886_v46 }
 0x11c   : > { %631 = vadd.xlane.f32.xlu1 %v7314_v9  ;;  %12202 = vst [vmem:[#allocation45_spill] sm:$0xff] %v7358_v8 }
 0x11d   : > { %v588_v12 = vpop.trf.xlu0 }
 0x11e   : > { %v7323_v13 = vmul.f32 %v7317_v10, %v588_v12  ;;  %v888_v12 = vand.u32 4294901760, %v836_v50 }
 0x120   : > { %633 = vadd.xlane.f32.xlu1 %v7323_v13  ;;  %v7364_v23 = vpack.c.bf16 %v888_v12, %v884_v11  ;;  %v7368_v19 = vsub.f32 %v836_v50, %v888_v12 }
 0x121   : > { %v589_v15 = vpop.trf.xlu0 }
 0x122   : > { %v7331_v16 = vmul.f32 %v7326_v14, %v589_v15  ;;  %v890_v15 = vand.u32 4294901760, %v839_v51  ;;  %12203 = vst [vmem:[#allocation46_spill] sm:$0xff] %v7364_v23  ;;  %12205 = vst [vmem:[#allocation48_spill] sm:$0xff] %v7368_v19  ;;  %5855 = vmatpush1.bf16.msra.mxu0 %v7364_v23  ;;  %5695 = vmatpush1.bf16.msra.mxu1 %v7364_v23  ;;  %v7449_v14 = vld [vmem:[#allocation4 + $0x98] sm:$0xff] }
 0x124   : > { %635 = vadd.xlane.f32.xlu1 %v7331_v16  ;;  %v7370_v27 = vsub.f32 %v839_v51, %v890_v15 }
 0x125   : > { %v590_v20 = vpop.trf.xlu0 }
 0x126   : > { %v7338_v22 = vmul.f32 %v7334_v17, %v590_v20  ;;  %v894_v20 = vand.u32 4294901760, %v841_v62  ;;  %12206 = vst [vmem:[#allocation49_spill] sm:$0xff] %v7370_v27  ;;  %v7447_v17 = vld [vmem:[#allocation4 + $0x88] sm:$0xff] }
 0x128   : > { %637 = vadd.xlane.f32.xlu1 %v7338_v22  ;;  %v7372_v31 = vpack.c.bf16 %v894_v20, %v890_v15  ;;  %v7374_v34 = vsub.f32 %v841_v62, %v894_v20  ;;  %v7399_v20 = vld [vmem:[#allocation4 + $0x40] sm:$0xff] }
 0x12a   : > { %12207 = vst [vmem:[#allocation50_spill] sm:$0xff] %v7372_v31  ;;  %12208 = vst [vmem:[#allocation51_spill] sm:$0xff] %v7374_v34  ;;  %5857 = vmatprep.subr.bf16.mxu0 %v7372_v31  ;;  %5697 = vmatprep.subr.bf16.mxu1 %v7372_v31  ;;  %v7557_v31 = vld [vmem:[#allocation4 + $0xe8] sm:$0xff] }
 0x179   : > { %v608_v30 = vpop.xlane.xlu1 %607 }
 0x17a   : > { %v640_v35 = vmul.f32 0.0078125, %v608_v30  ;;  %v7401_v30 = vld [vmem:[#allocation4 + $0x50] sm:$0xff] }
 0x17c   : > { %v7380_v38 = vsub.f32 %v7206_v24, %v640_v35 }
 0x17d   : > { %v610_v39 = vpop.xlane.xlu1 %609 }
 0x17e   : > { %v641_v42 = vmul.f32 0.0078125, %v610_v39  ;;  %v672_v43 = vmul.f32 %v7380_v38, %v7380_v38 }
 0x180   : > { %688 = vadd.xlane.f32.xlu0 %v672_v43  ;;  %v7387_v46 = vsub.f32 %v7215_v28, %v641_v42  ;;  %v11578_v42 = vand.u32 4294901760, %v7401_v30 }
 0x181   : > { %v612_v47 = vpop.xlane.xlu1 %611 }
 0x182   : > { %v642_v50 = vmul.f32 0.0078125, %v612_v47  ;;  %v673_v51 = vmul.f32 %v7387_v46, %v7387_v46  ;;  %v7416_v47 = vld [vmem:[#allocation4 + $0x68] sm:$0xff] }
 0x184   : > { %690 = vadd.xlane.f32.xlu1 %v673_v51  ;;  %v7392_v24 = vsub.f32 %v7224_v32, %v642_v50  ;;  %v11579_v32 = vand.u32 4294901760, %v7399_v20  ;;  %v7418_v50 = vld [vmem:[#allocation4 + $0x78] sm:$0xff] }
 0x185   : > { %v614_v62 = vpop.xlane.xlu1 %613 }
 0x186   : > { %v643_v11 = vmul.f32 0.0078125, %v614_v62  ;;  %v674_v12 = vmul.f32 %v7392_v24, %v7392_v24  ;;  %v11587_v62 = vand.u32 4294901760, %v7416_v47 }
 0x188   : > { %692 = vadd.xlane.f32.xlu1 %v674_v12  ;;  %v7397_v15 = vsub.f32 %v7233_v36, %v643_v11  ;;  %v7414_v36 = vpack.c.bf16 %v11578_v42, %v11579_v32  ;;  %v11586_v11 = vand.u32 4294901760, %v7418_v50  ;;  %v7422_v12 = vld [vmem:[#allocation4 + $0x60] sm:$0xff] }
 0x189   : > { %v616_v28 = vpop.xlane.xlu1 %615  ;;  %v12241_v18 = vand.u32 4294901760, %v7422_v12 }
 0x18a   : > { %v644_v35 = vmul.f32 0.0078125, %v616_v28  ;;  %v675_v39 = vmul.f32 %v7397_v15, %v7397_v15  ;;  %12210 = vst [vmem:[#allocation53_spill] sm:$0xff] %v7414_v36  ;;  %v7424_v28 = vld [vmem:[#allocation4 + $0x70] sm:$0xff]  ;;  %5859 = vmatpush1.bf16.msra.mxu0 %v7414_v36  ;;  %5699 = vmatpush1.bf16.msra.mxu1 %v7414_v36  ;;  %v7436_v42 = vpack.c.bf16 %v11586_v11, %v11587_v62  ;;  %v11603_v11 = vand.u32 4294901760, %v7447_v17  ;;  %v7454_v62 = vld [vmem:[#allocation4 + $0x80] sm:$0xff] }
 0x18b   : > { %v11588_v0 = vand.u32 4294901760, %v7424_v28 }
 0x18c   : > { %694 = vadd.xlane.f32.xlu1 %v675_v39  ;;  %v7408_v43 = vsub.f32 %v7242_v40, %v644_v35  ;;  %v11589_v39 = vand.u32 4294901760, %v7422_v12  ;;  %12211 = vst [vmem:[#allocation54_spill] sm:$0xff] %v7436_v42  ;;  %5861 = vmatprep.subr.bf16.mxu0 %v7436_v42 }
 0x18d   : > { %v618_v51 = vpop.xlane.xlu1 %617  ;;  %5701 = vmatprep.subr.bf16.mxu1 %v7436_v42 }
 0x18e   : > { %12209 = vst [vmem:[#allocation52_spill] sm:$0xff] %v7408_v43  ;;  %v645_v40 = vmul.f32 0.0078125, %v618_v51  ;;  %v676_v35 = vmul.f32 %v7408_v43, %v7408_v43  ;;  %v7445_v32 = vpack.c.bf16 %v11588_v0, %v11589_v39  ;;  %v11605_v39 = vand.u32 4294901760, %v7454_v62 }
 0x190   : > { %696 = vadd.xlane.f32.xlu1 %v676_v35  ;;  %v7439_v51 = vsub.f32 %v7251_v44, %v645_v40  ;;  %12213 = vst [vmem:[#allocation56_spill] sm:$0xff] %v7445_v32  ;;  %v11602_v35 = vand.u32 4294901760, %v7449_v14  ;;  %v7456_v44 = vld [vmem:[#allocation4 + $0x90] sm:$0xff]  ;;  %5863 = vmatpush1.bf16.msra.mxu0 %v7445_v32 }
 0x191   : > { %v620_v10 = vpop.xlane.xlu1 %619  ;;  %v11604_v6 = vand.u32 4294901760, %v7456_v44  ;;  %5703 = vmatpush1.bf16.msra.mxu1 %v7445_v32 }
 0x192   : > { %12212 = vst [vmem:[#allocation55_spill] sm:$0xff] %v7439_v51  ;;  %v646_v40 = vmul.f32 0.0078125, %v620_v10  ;;  %v677_v0 = vmul.f32 %v7439_v51, %v7439_v51  ;;  %v7469_v2 = vpack.c.bf16 %v11602_v35, %v11603_v11  ;;  %v11623_v35 = vand.u32 4294901760, %v7480_v57  ;;  %v7487_v11 = vld [vmem:[#allocation4 + $0xa0] sm:$0xff] }
 0x193   : > { %v7478_v61 = vpack.c.bf16 %v11604_v6, %v11605_v39  ;;  %v11622_v39 = vand.u32 4294901760, %v7487_v11 }
 0x194   : > { %12214 = vst [vmem:[#allocation57_spill] sm:$0xff] %v7469_v2  ;;  %698 = vadd.xlane.f32.xlu1 %v677_v0  ;;  %v7472_v10 = vsub.f32 %v7260_v48, %v646_v40  ;;  %5865 = vmatprep.subr.bf16.mxu0 %v7469_v2  ;;  %v11620_v0 = vand.u32 4294901760, %v7482_v53  ;;  %v7489_v48 = vld [vmem:[#allocation4 + $0xb0] sm:$0xff] }
 0x195   : > { %12216 = vst [vmem:[#allocation59_spill] sm:$0xff] %v7478_v61  ;;  %v622_v49 = vpop.xlane.xlu1 %621  ;;  %5705 = vmatprep.subr.bf16.mxu1 %v7469_v2  ;;  %5867 = vmatpush1.bf16.msra.mxu0 %v7478_v61  ;;  %v11621_v45 = vand.u32 4294901760, %v7489_v48  ;;  %v12222_v2 = vand.u32 4294901760, %v7513_v33 }
 0x196   : > { %12215 = vst [vmem:[#allocation58_spill] sm:$0xff] %v7472_v10  ;;  %v647_v40 = vmul.f32 0.0078125, %v622_v49  ;;  %v678_v6 = vmul.f32 %v7472_v10, %v7472_v10  ;;  %5707 = vmatpush1.bf16.msra.mxu1 %v7478_v61  ;;  %v7502_v41 = vpack.c.bf16 %v11620_v0, %v11623_v35 }
 0x197   : > { %v7511_v49 = vpack.c.bf16 %v11621_v45, %v11622_v39  ;;  %v7527_v45 = vld [vmem:[#allocation7 + $0x18] sm:$0xff]  ;;  %v12229_v39 = vand.u32 4294901760, %v7399_v20 }
 0x198   : > { %12217 = vst [vmem:[#allocation60_spill] sm:$0xff] %v7502_v41  ;;  %v7505_v37 = vsub.f32 %v7269_v52, %v647_v40  ;;  %700 = vadd.xlane.f32.xlu1 %v678_v6  ;;  %5869 = vmatprep.subr.bf16.mxu0 %v7502_v41  ;;  %v7522_v6 = vld [vmem:[#allocation4 + $0xc0] sm:$0xff]  ;;  %v7524_v40 = vld [vmem:[#allocation4 + $0xd0] sm:$0xff]  ;;  %12221 = vst [vmem:[#allocation64_spill] sm:$0xff] %v7527_v45 }
 0x199   : > { %12219 = vst [vmem:[#allocation62_spill] sm:$0xff] %v7511_v49  ;;  %v624_v21 = vpop.xlane.xlu1 %623  ;;  %5709 = vmatprep.subr.bf16.mxu1 %v7502_v41  ;;  %5871 = vmatpush1.bf16.msra.mxu0 %v7511_v49  ;;  %v11633_v0 = vand.u32 4294901760, %v7522_v6  ;;  %v11632_v52 = vand.u32 4294901760, %v7524_v40  ;;  %v12223_v41 = vand.u32 4294901760, %v7515_v29 }
 0x19a   : > { %12218 = vst [vmem:[#allocation61_spill] sm:$0xff] %v7505_v37  ;;  %v648_v35 = vmul.f32 0.0078125, %v624_v21  ;;  %v679_v61 = vmul.f32 %v7505_v37, %v7505_v37  ;;  %5711 = vmatpush1.bf16.msra.mxu1 %v7511_v49  ;;  %v12225_v21 = vand.u32 4294901760, %v7517_v25 }
 0x19b   : > { %v7540_v32 = vpack.c.bf16 %v12223_v41, %v12222_v2  ;;  %v7555_v49 = vpack.c.bf16 %v11632_v52, %v11633_v0  ;;  %v7559_v41 = vld [vmem:[#allocation4 + $0xf8] sm:$0xff]  ;;  %v12235_v0 = vand.u32 4294901760, %v7418_v50 }
 0x19c   : > { %v7546_v42 = vsub.f32 %v7517_v25, %v12225_v21  ;;  %v7549_v36 = vsub.f32 %v7278_v56, %v648_v35  ;;  %702 = vadd.xlane.f32.xlu1 %v679_v61  ;;  %v7564_v21 = vsub.f32 %v7399_v20, %v12229_v39  ;;  %v12231_v56 = vand.u32 4294901760, %v7401_v30  ;;  %v7584_v20 = vld [vmem:[#allocation4 + $0xf0] sm:$0xff] }
 0x19d   : > { %12224 = vst [vmem:[#allocation65_spill] sm:$0xff] %v7540_v32  ;;  %12228 = vst [vmem:[#allocation68_spill] sm:$0xff] %v7555_v49  ;;  %v626_v2 = vpop.xlane.xlu1 %625  ;;  %v12233_v35 = vand.u32 4294901760, %v7416_v47  ;;  %v7579_v23 = vsub.f32 %v7418_v50, %v12235_v0  ;;  %5873 = vmatprep.subr.bf16.mxu0 %v7540_v32  ;;  %5713 = vmatprep.subr.bf16.mxu1 %v7540_v32  ;;  %v932_v50 = vand.u32 4294901760, %v7582_v4  ;;  %v936_v0 = vand.u32 4294901760, %v7584_v20 }
 0x19e   : > { %12226 = vst [vmem:[#allocation66_spill] sm:$0xff] %v7546_v42  ;;  %12227 = vst [vmem:[#allocation67_spill] sm:$0xff] %v7549_v36  ;;  %v7569_v61 = vsub.f32 %v7401_v30, %v12231_v56  ;;  %v649_v39 = vmul.f32 0.0078125, %v626_v2  ;;  %v680_v30 = vmul.f32 %v7549_v36, %v7549_v36  ;;  %5875 = vmatpush1.bf16.msra.mxu0 %v7555_v49  ;;  %v934_v56 = vand.u32 4294901760, %v7559_v41 }
 0x19f   : > { %12230 = vst [vmem:[#allocation69_spill] sm:$0xff] %v7564_v21  ;;  %v7574_v52 = vsub.f32 %v7416_v47, %v12233_v35  ;;  %12236 = vst [vmem:[#allocation72_spill] sm:$0xff] %v7579_v23  ;;  %v930_v47 = vand.u32 4294901760, %v7557_v31  ;;  %5715 = vmatpush1.bf16.msra.mxu1 %v7555_v49  ;;  %v12237_v2 = vand.u32 4294901760, %v7527_v45  ;;  %v7609_v36 = vsub.f32 %v7422_v12, %v12241_v18 }
 0x1a0   : > { %12232 = vst [vmem:[#allocation70_spill] sm:$0xff] %v7569_v61  ;;  %v7602_v25 = vsub.f32 %v7287_v60, %v649_v39  ;;  %704 = vadd.xlane.f32.xlu1 %v680_v30  ;;  %v12243_v49 = vand.u32 4294901760, %v7424_v28  ;;  %v12246_v60 = vand.u32 4294901760, %v7449_v14  ;;  %v7629_v12 = vpack.c.bf16 %v936_v0, %v932_v50 }
 0x1a1   : > { %12234 = vst [vmem:[#allocation71_spill] sm:$0xff] %v7574_v52  ;;  %v7599_v63 = vsub.f32 %v7527_v45, %v12237_v2  ;;  %v7604_v54 = vpack.c.bf16 %v934_v56, %v930_v47  ;;  %v628_v32 = vpop.xlane.xlu1 %627  ;;  %12242 = vst [vmem:[#allocation76_spill] sm:$0xff] %v7609_v36  ;;  %v12245_v2 = vand.u32 4294901760, %v7447_v17 }
 0x1a2   : > { %12239 = vst [vmem:[#allocation74_spill] sm:$0xff] %v7602_v25  ;;  %v7614_v35 = vsub.f32 %v7424_v28, %v12243_v49  ;;  %v7624_v39 = vsub.f32 %v7449_v14, %v12246_v60  ;;  %v650_v30 = vmul.f32 0.0078125, %v628_v32  ;;  %v681_v18 = vmul.f32 %v7602_v25, %v7602_v25  ;;  %12248 = vst [vmem:[#allocation79_spill] sm:$0xff] %v7629_v12 }
 0x1a3   : > { %12238 = vst [vmem:[#allocation73_spill] sm:$0xff] %v7599_v63  ;;  %12240 = vst [vmem:[#allocation75_spill] sm:$0xff] %v7604_v54  ;;  %v7619_v45 = vsub.f32 %v7447_v17, %v12245_v2  ;;  %5877 = vmatprep.subr.bf16.mxu0 %v7604_v54  ;;  %v12249_v28 = vand.u32 4294901760, %v7546_v42  ;;  %5717 = vmatprep.subr.bf16.mxu1 %v7604_v54  ;;  %v12251_v32 = vand.u32 4294901760, %v7454_v62  ;;  %v12253_v25 = vand.u32 4294901760, %v7456_v44 }
 0x1a4   : > { %12244 = vst [vmem:[#allocation77_spill] sm:$0xff] %v7614_v35  ;;  %12247 = vst [vmem:[#allocation78_spill] sm:$0xff] %v7624_v39  ;;  %v7637_v2 = vsub.f32 %v7296_v1, %v650_v30  ;;  %706 = vadd.xlane.f32.xlu1 %v681_v18  ;;  %5879 = vmatpush1.bf16.msra.mxu0 %v7629_v12  ;;  %v12255_v54 = vand.u32 4294901760, %v7480_v57  ;;  %v12256_v1 = vand.u32 4294901760, %v7482_v53 }
 0x1a5   : > { %v3085_v49 = vsub.f32 %v7546_v42, %v12249_v28  ;;  %v630_v14 = vpop.xlane.xlu1 %629  ;;  %v7643_v60 = vsub.f32 %v7454_v62, %v12251_v32  ;;  %v7648_v28 = vsub.f32 %v7456_v44, %v12253_v25  ;;  %5719 = vmatpush1.bf16.msra.mxu1 %v7629_v12  ;;  %v12257_v25 = vand.u32 4294901760, %v7599_v63 }
 0x1a6   : > { %12250 = vst [vmem:[#allocation80_spill] sm:$0xff] %v7637_v2  ;;  %v7653_v17 = vsub.f32 %v7480_v57, %v12255_v54  ;;  %v7658_v30 = vsub.f32 %v7482_v53, %v12256_v1  ;;  %v651_v18 = vmul.f32 0.0078125, %v630_v14  ;;  %v682_v62 = vmul.f32 %v7637_v2, %v7637_v2  ;;  %v7912_v2 = vld [vmem:[#allocation7 + $0x98] sm:$0xff] }
 0x1a7   : > { %12252 = vst [vmem:[#allocation81_spill] sm:$0xff] %v7643_v60  ;;  %12254 = vst [vmem:[#allocation82_spill] sm:$0xff] %v7648_v28  ;;  %v3086_v32 = vand.u32 4294901760, %v3085_v49  ;;  %v3097_v44 = vsub.f32 %v7599_v63, %v12257_v25  ;;  %v12259_v53 = vand.u32 4294901760, %v7487_v11  ;;  %v12261_v14 = vand.u32 4294901760, %v7489_v48 }
 0x1a8   : > { %v7667_v42 = vsub.f32 %v7305_v5, %v651_v18  ;;  %708 = vadd.xlane.f32.xlu1 %v682_v62  ;;  %v12263_v49 = vand.u32 4294901760, %v7513_v33  ;;  %v12265_v5 = vand.u32 4294901760, %v7515_v29  ;;  %12331 = vst [vmem:[#allocation127_spill] sm:$0xff] %v7912_v2 }
 0x1a9   : > { %v3098_v57 = vand.u32 4294901760, %v3097_v44  ;;  %v632_v54 = vpop.xlane.xlu1 %631  ;;  %v7672_v1 = vsub.f32 %v7487_v11, %v12259_v53  ;;  %v7677_v12 = vsub.f32 %v7489_v48, %v12261_v14  ;;  %v12268_v14 = vand.u32 4294901760, %v7522_v6 }
 0x1aa   : > { %12258 = vst [vmem:[#allocation83_spill] sm:$0xff] %v7667_v42  ;;  %v7682_v25 = vsub.f32 %v7513_v33, %v12263_v49  ;;  %v7687_v18 = vsub.f32 %v7515_v29, %v12265_v5  ;;  %v652_v62 = vmul.f32 0.0078125, %v632_v54  ;;  %v683_v11 = vmul.f32 %v7667_v42, %v7667_v42 }
 0x1ab   : > { %12260 = vst [vmem:[#allocation84_spill] sm:$0xff] %v7672_v1  ;;  %12262 = vst [vmem:[#allocation85_spill] sm:$0xff] %v7677_v12  ;;  %v5944_v44 = vpack.c.bf16 %v3098_v57, %v3086_v32  ;;  %v7697_v33 = vsub.f32 %v7522_v6, %v12268_v14  ;;  %v12270_v49 = vand.u32 4294901760, %v7524_v40  ;;  %v7705_v54 = vsub.f32 %v7557_v31, %v930_v47 }
 0x1ac   : > { %12264 = vst [vmem:[#allocation86_spill] sm:$0xff] %v7682_v25  ;;  %12266 = vst [vmem:[#allocation87_spill] sm:$0xff] %v7687_v18  ;;  %v7692_v53 = vsub.f32 %v7314_v9, %v652_v62  ;;  %710 = vadd.xlane.f32.xlu1 %v683_v11  ;;  %v7708_v32 = vsub.f32 %v7559_v41, %v934_v56  ;;  %v7716_v62 = vsub.f32 %v7582_v4, %v932_v50  ;;  %v7726_v11 = vld [vmem:[#allocation7] sm:$0xff]  ;;  %v7730_v4 = vld [vmem:[#allocation7 + $0x10] sm:$0xff] }
 0x1ad   : > { %5945 = vmatprep.subr.bf16.mxu0 %v5944_v44  ;;  %v634_v48 = vpop.xlane.xlu1 %633  ;;  %12269 = vst [vmem:[#allocation89_spill] sm:$0xff] %v7697_v33  ;;  %v7702_v29 = vsub.f32 %v7524_v40, %v12270_v49  ;;  %12272 = vst [vmem:[#allocation91_spill] sm:$0xff] %v7705_v54  ;;  %v7719_v40 = vsub.f32 %v7584_v20, %v936_v0  ;;  %v7732_v50 = vld [vmem:[#allocation7 + $0x28] sm:$0xff]  ;;  %v7734_v20 = vld [vmem:[#allocation7 + $0x38] sm:$0xff] }
 0x1ae   : > { %12267 = vst [vmem:[#allocation88_spill] sm:$0xff] %v7692_v53  ;;  %12273 = vst [vmem:[#allocation92_spill] sm:$0xff] %v7708_v32  ;;  %v653_v9 = vmul.f32 0.0078125, %v634_v48  ;;  %v684_v57 = vmul.f32 %v7692_v53, %v7692_v53  ;;  %v7736_v0 = vld [vmem:[#allocation7 + $0x20] sm:$0xff]  ;;  %v7738_v48 = vld [vmem:[#allocation7 + $0x30] sm:$0xff] }
 0x1af   : > { %12271 = vst [vmem:[#allocation90_spill] sm:$0xff] %v7702_v29  ;;  %12275 = vst [vmem:[#allocation94_spill] sm:$0xff] %v7716_v62  ;;  %v7744_v49 = vld [vmem:[#allocation7 + $0x48] sm:$0xff] }
 0x1b0   : > { %v7713_v5 = vsub.f32 %v7323_v13, %v653_v9  ;;  %712 = vadd.xlane.f32.xlu1 %v684_v57  ;;  %12276 = vst [vmem:[#allocation95_spill] sm:$0xff] %v7719_v40  ;;  %12278 = vst [vmem:[#allocation97_spill] sm:$0xff] %v7726_v11  ;;  %v7746_v9 = vld [vmem:[#allocation7 + $0x58] sm:$0xff]  ;;  %v12293_v57 = vand.u32 4294901760, %v7732_v50 }
 0x1b1   : > { %v636_v6 = vpop.xlane.xlu1 %635  ;;  %12279 = vst [vmem:[#allocation98_spill] sm:$0xff] %v7730_v4  ;;  %12280 = vst [vmem:[#allocation99_spill] sm:$0xff] %v7732_v50 }
 0x1b2   : > { %12274 = vst [vmem:[#allocation93_spill] sm:$0xff] %v7713_v5  ;;  %v654_v31 = vmul.f32 0.0078125, %v636_v6  ;;  %v685_v41 = vmul.f32 %v7713_v5, %v7713_v5  ;;  %12281 = vst [vmem:[#allocation100_spill] sm:$0xff] %v7734_v20  ;;  %v7772_v5 = vld [vmem:[#allocation7 + $0x50] sm:$0xff] }
 0x1b3   : > { %12282 = vst [vmem:[#allocation101_spill] sm:$0xff] %v7736_v0  ;;  %12283 = vst [vmem:[#allocation102_spill] sm:$0xff] %v7738_v48 }
 0x1b4   : > { %v7724_v47 = vsub.f32 %v7331_v16, %v654_v31  ;;  %714 = vadd.xlane.f32.xlu0 %v685_v41  ;;  %12285 = vst [vmem:[#allocation104_spill] sm:$0xff] %v7744_v49  ;;  %12286 = vst [vmem:[#allocation105_spill] sm:$0xff] %v7746_v9  ;;  %v11655_v31 = vand.u32 4294901760, %v7343_v55  ;;  %v11656_v41 = vand.u32 4294901760, %v7345_v58 }
 0x1b5   : > { %v638_v56 = vpop.xlane.xlu1 %637  ;;  %12290 = vst [vmem:[#allocation108_spill] sm:$0xff] %v7772_v5 }
 0x1b6   : > { %12277 = vst [vmem:[#allocation96_spill] sm:$0xff] %v7724_v47  ;;  %v655_v13 = vmul.f32 0.0078125, %v638_v56  ;;  %v686_v44 = vmul.f32 %v7724_v47, %v7724_v47  ;;  %v1150_v14 = vsub.f32 %v7343_v55, %v11655_v31  ;;  %v1162_v6 = vsub.f32 %v7345_v58, %v11656_v41  ;;  %v7770_v47 = vld [vmem:[#allocation7 + $0x40] sm:$0xff] }
 0x1b7   : > { %12289 = vst [vmem:[#allocation107_spill] sm:$0xff] %v7770_v47  ;;  %v12291_v31 = vand.u32 4294901760, %v7730_v4  ;;  %v12301_v58 = vand.u32 4294901760, %v7744_v49 }
 0x1b8   : > { %v7741_v16 = vsub.f32 %v7338_v22, %v655_v13  ;;  %716 = vadd.xlane.f32.xlu1 %v686_v44  ;;  %v1151_v13 = vand.u32 4294901760, %v1150_v14  ;;  %v1163_v44 = vand.u32 4294901760, %v1162_v6  ;;  %v12297_v6 = vand.u32 4294901760, %v7736_v0 }
 0x1b9   : > { %v7777_v41 = vsub.f32 %v7730_v4, %v12291_v31 }
 0x1ba   : > { %12284 = vst [vmem:[#allocation103_spill] sm:$0xff] %v7741_v16  ;;  %v687_v56 = vmul.f32 %v7741_v16, %v7741_v16  ;;  %v12287_v16 = vand.u32 4294901760, %v7726_v11  ;;  %v7792_v63 = vsub.f32 %v7736_v0, %v12297_v6  ;;  %v5720_v4 = vpack.c.bf16 %v1163_v44, %v1151_v13  ;;  %v2464_v0 = vld [vmem:[%s7822_s27] sm:$0xff] }
 0x1bb   : > { %12292 = vst [vmem:[#allocation109_spill] sm:$0xff] %v7777_v41  ;;  %v11670_v6 = vand.u32 4294901760, %v7770_v47 }
 0x1bc   : > { %718 = vadd.xlane.f32.xlu0 %v687_v56  ;;  %v7768_v22 = vsub.f32 %v7726_v11, %v12287_v16  ;;  %v7782_v56 = vsub.f32 %v7732_v50, %v12293_v57  ;;  %v12295_v16 = vand.u32 4294901760, %v7734_v20  ;;  %12298 = vst [vmem:[#allocation112_spill] sm:$0xff] %v7792_v63  ;;  %v12299_v11 = vand.u32 4294901760, %v7738_v48  ;;  %5721 = vmatprep.subr.bf16.mxu1 %v5720_v4 }
 0x1bd   : > { %v7802_v57 = vsub.f32 %v7744_v49, %v12301_v58  ;;  %v12303_v50 = vand.u32 4294901760, %v7746_v9  ;;  %v7815_v58 = vld [vmem:[#allocation7 + $0x68] sm:$0xff]  ;;  %v7834_v13 = vsub.f32 %v7770_v47, %v11670_v6  ;;  %v12315_v4 = vand.u32 4294901760, %v7792_v63 }
 0x1be   : > { %12288 = vst [vmem:[#allocation106_spill] sm:$0xff] %v7768_v22  ;;  %12294 = vst [vmem:[#allocation110_spill] sm:$0xff] %v7782_v56  ;;  %v7787_v14 = vsub.f32 %v7734_v20, %v12295_v16  ;;  %v7797_v31 = vsub.f32 %v7738_v48, %v12299_v11  ;;  %v11667_v20 = vand.u32 4294901760, %v7768_v22  ;;  %v12310_v11 = vand.u32 4294901760, %v7777_v41 }
 0x1bf   : > { %12302 = vst [vmem:[#allocation114_spill] sm:$0xff] %v7802_v57  ;;  %v7807_v16 = vsub.f32 %v7746_v9, %v12303_v50  ;;  %12305 = vst [vmem:[#allocation116_spill] sm:$0xff] %v7815_v58  ;;  %v12307_v9 = vand.u32 4294901760, %v7772_v5  ;;  %v7841_v50 = vld [vmem:[#allocation7 + $0x78] sm:$0xff]  ;;  %v3115_v55 = vsub.f32 %v7792_v63, %v12315_v4  ;;  %v12321_v10 = vand.u32 4294901760, %v7834_v13 }
 0x1c0   : > { %12296 = vst [vmem:[#allocation111_spill] sm:$0xff] %v7787_v14  ;;  %12300 = vst [vmem:[#allocation113_spill] sm:$0xff] %v7797_v31  ;;  %v3091_v44 = vsub.f32 %v7768_v22, %v11667_v20  ;;  %v3103_v48 = vsub.f32 %v7777_v41, %v12310_v11  ;;  %v12311_v20 = vand.u32 4294901760, %v7782_v56  ;;  %v12312_v6 = vand.u32 4294901760, %v7787_v14 }
 0x1c1   : > { %12304 = vst [vmem:[#allocation115_spill] sm:$0xff] %v7807_v16  ;;  %12306 = vst [vmem:[#allocation117_spill] sm:$0xff] %v7834_v13  ;;  %v7839_v49 = vsub.f32 %v7772_v5, %v12307_v9  ;;  %v7854_v9 = vld [vmem:[#allocation7 + $0x60] sm:$0xff]  ;;  %v7856_v5 = vld [vmem:[#allocation7 + $0x70] sm:$0xff]  ;;  %v12316_v53 = vand.u32 4294901760, %v7797_v31  ;;  %v12317_v41 = vand.u32 4294901760, %v7802_v57 }
 0x1c2   : > { %12309 = vst [vmem:[#allocation119_spill] sm:$0xff] %v7841_v50  ;;  %v3109_v22 = vsub.f32 %v7782_v56, %v12311_v20  ;;  %v3121_v47 = vsub.f32 %v7787_v14, %v12312_v6  ;;  %12313 = vst [vmem:[#allocation120_spill] sm:$0xff] %v7854_v9  ;;  %v12318_v56 = vand.u32 4294901760, %v7807_v16  ;;  %v3092_v14 = vand.u32 4294901760, %v3091_v44 }
 0x1c3   : > { %12308 = vst [vmem:[#allocation118_spill] sm:$0xff] %v7839_v49  ;;  %12314 = vst [vmem:[#allocation121_spill] sm:$0xff] %v7856_v5  ;;  %v3127_v11 = vsub.f32 %v7797_v31, %v12316_v53  ;;  %v3133_v20 = vsub.f32 %v7802_v57, %v12317_v41  ;;  %v12319_v53 = vand.u32 4294901760, %v7815_v58  ;;  %v3104_v44 = vand.u32 4294901760, %v3103_v48 }
 0x1c4   : > { %v3145_v6 = vsub.f32 %v7807_v16, %v12318_v56  ;;  %v2466_v56 = vld [vmem:[%s7822_s27 + $0x10] sm:$0xff]  ;;  %v3110_v16 = vand.u32 4294901760, %v3109_v22  ;;  %v3122_v42 = vand.u32 4294901760, %v3121_v47  ;;  %v3116_v37 = vand.u32 4294901760, %v3115_v55  ;;  %v7894_v22 = vld [vmem:[#allocation7 + $0x88] sm:$0xff] }
 0x1c5   : > { %v7877_v31 = vsub.f32 %v7815_v58, %v12319_v53  ;;  %v3134_v4 = vand.u32 4294901760, %v3133_v20  ;;  %v3139_v53 = vsub.f32 %v7834_v13, %v12321_v10  ;;  %v12322_v41 = vand.u32 4294901760, %v7839_v49  ;;  %12325 = vst [vmem:[#allocation124_spill] sm:$0xff] %v7894_v22  ;;  %v2465_v58 = vld [vmem:[%s7822_s27 + $0x8] sm:$0xff] }
 0x1c6   : > { %v3146_v63 = vand.u32 4294901760, %v3145_v6  ;;  %v12323_v48 = vand.u32 4294901760, %v7841_v50  ;;  %v12326_v55 = vand.u32 4294901760, %v7347_v59  ;;  %v12327_v10 = vand.u32 4294901760, %v7854_v9 }
 0x1c7   : > { %12320 = vst [vmem:[#allocation122_spill] sm:$0xff] %v7877_v31  ;;  %v3151_v57 = vsub.f32 %v7839_v49, %v12322_v41  ;;  %v12329_v41 = vand.u32 4294901760, %v7856_v5  ;;  %v7923_v49 = vpack.c.bf16 %v3122_v42, %v3110_v16  ;;  %v3140_v13 = vand.u32 4294901760, %v3139_v53  ;;  %v2468_v42 = vld [vmem:[%s7822_s27 + $0x20] sm:$0xff] }
 0x1c8   : > { %v7892_v47 = vsub.f32 %v7841_v50, %v12323_v48  ;;  %v7905_v6 = vsub.f32 %v7854_v9, %v12327_v10  ;;  %v7915_v50 = vpack.c.bf16 %v3104_v44, %v3092_v14  ;;  %v7927_v9 = vpack.c.bf16 %v3146_v63, %v3134_v4  ;;  %v7951_v14 = vld [vmem:[#allocation7 + $0xb8] sm:$0xff] }
 0x1c9   : > { %2482 = vperm.xlu1 %6733, %v2464_v0   ;;  %v3128_v0 = vand.u32 4294901760, %v3127_v11  ;;  %v7899_v11 = vsub.f32 %v7347_v59, %v12326_v55  ;;  %v7910_v48 = vsub.f32 %v7856_v5, %v12329_v41  ;;  %v12332_v55 = vand.u32 4294901760, %v7351_v3  ;;  %v7930_v5 = vld [vmem:[#allocation7 + $0x80] sm:$0xff]  ;;  %12338 = vst [vmem:[#allocation132_spill] sm:$0xff] %v7951_v14 }
 0x1ca   : > { %12324 = vst [vmem:[#allocation123_spill] sm:$0xff] %v7892_v47  ;;  %12328 = vst [vmem:[#allocation125_spill] sm:$0xff] %v7905_v6  ;;  %v3152_v59 = vand.u32 4294901760, %v3151_v57  ;;  %v12336_v63 = vand.u32 4294901760, %v7877_v31  ;;  %v7953_v41 = vld [vmem:[#allocation7 + $0xa0] sm:$0xff]  ;;  %v12345_v4 = vand.u32 4294901760, %v7912_v2 }
 0x1cb   : > { %12330 = vst [vmem:[#allocation126_spill] sm:$0xff] %v7910_v48  ;;  %v7920_v20 = vsub.f32 %v7351_v3, %v12332_v55  ;;  %v7925_v10 = vpack.c.bf16 %v3128_v0, %v3116_v37  ;;  %12333 = vst [vmem:[#allocation128_spill] sm:$0xff] %v7927_v9  ;;  %v7934_v55 = vld [vmem:[#allocation7 + $0x90] sm:$0xff]  ;;  %v7945_v0 = vld [vmem:[#allocation7 + $0xa8] sm:$0xff] }
 0x1cc   : > { %12334 = vst [vmem:[#allocation129_spill] sm:$0xff] %v7930_v5  ;;  %12335 = vst [vmem:[#allocation130_spill] sm:$0xff] %v7934_v55  ;;  %v7941_v16 = vsub.f32 %v7877_v31, %v12336_v63  ;;  %v2473_v63 = vld [vmem:[%s7822_s27 + $0x48] sm:$0xff]  ;;  %v7966_v37 = vpack.c.bf16 %v3152_v59, %v3140_v13  ;;  %v12344_v31 = vand.u32 4294901760, %v7892_v47  ;;  %v7974_v57 = vsub.f32 %v7912_v2, %v12345_v4  ;;  %v2475_v13 = vld [vmem:[%s7822_s27 + $0x58] sm:$0xff] }
 0x1cd   : > { %2488 = vperm.xlu1 %6733, %v2466_v56   ;;  %v2467_v56 = vld [vmem:[%s7822_s27 + $0x18] sm:$0xff]  ;;  %12337 = vst [vmem:[#allocation131_spill] sm:$0xff] %v7945_v0  ;;  %v1169_v53 = vand.u32 4294901760, %v7920_v20  ;;  %12339 = vst [vmem:[#allocation133_spill] sm:$0xff] %v7953_v41  ;;  %v12349_v4 = vand.u32 4294901760, %v7355_v7 }
 0x1ce   : > { %12343 = vst [vmem:[#allocation136_spill] sm:$0xff] %v7966_v37  ;;  %v3169_v3 = vsub.f32 %v7892_v47, %v12344_v31  ;;  %12346 = vst [vmem:[#allocation137_spill] sm:$0xff] %v7974_v57  ;;  %v2469_v47 = vld [vmem:[%s7822_s27 + $0x28] sm:$0xff]  ;;  %v12353_v31 = vand.u32 4294901760, %v7366_v26  ;;  %v12357_v37 = vand.u32 4294901760, %v7945_v0 }
 0x1cf   : > { %v1174_v2 = vsub.f32 %v7355_v7, %v12349_v4  ;;  %v12359_v7 = vand.u32 4294901760, %v7951_v14 }
 0x1d1   : > { %2491 = vperm.xlu1 %6733, %v2467_v56   ;;  %v7964_v56 = vld [vmem:[#allocation7 + $0xb0] sm:$0xff] }
 0x1d2   : > { %2485 = vperm.xlu0 %6734, %v2465_v58   ;;  %v12340_v58 = vand.u32 4294901760, %v7894_v22  ;;  %12342 = vst [vmem:[#allocation135_spill] sm:$0xff] %v7964_v56 }
 0x1d4   : > { %v7961_v20 = vsub.f32 %v7894_v22, %v12340_v58  ;;  %v12347_v58 = vand.u32 4294901760, %v7905_v6  ;;  %v12348_v22 = vand.u32 4294901760, %v7910_v48 }
 0x1d5   : > { %2494 = vperm.xlu1 %6733, %v2468_v42   ;;  %v12350_v42 = vand.u32 4294901760, %v7358_v8 }
 0x1d6   : > { %12341 = vst [vmem:[#allocation134_spill] sm:$0xff] %v7961_v20  ;;  %v3163_v44 = vsub.f32 %v7905_v6, %v12347_v58  ;;  %v3175_v59 = vsub.f32 %v7910_v48, %v12348_v22  ;;  %2509 = vperm.xlu0 %6734, %v2473_v63   ;;  %v12351_v58 = vand.u32 4294901760, %v7930_v5  ;;  %v1180_v63 = vsub.f32 %v7366_v26, %v12353_v31 }
 0x1d7   : > { %v1186_v51 = vsub.f32 %v7358_v8, %v12350_v42  ;;  %v12354_v48 = vand.u32 4294901760, %v7368_v19  ;;  %v12355_v42 = vand.u32 4294901760, %v7934_v55  ;;  %v3170_v22 = vand.u32 4294901760, %v3169_v3 }
 0x1d8   : > { %v7995_v6 = vsub.f32 %v7930_v5, %v12351_v58  ;;  %v3158_v58 = vand.u32 4294901760, %v7941_v16  ;;  %v8016_v31 = vsub.f32 %v7945_v0, %v12357_v37  ;;  %v8021_v26 = vsub.f32 %v7951_v14, %v12359_v7  ;;  %v8028_v16 = vld [vmem:[#allocation7 + $0xc8] sm:$0xff]  ;;  %v8030_v5 = vld [vmem:[#allocation7 + $0xd8] sm:$0xff] }
 0x1d9   : > { %v1192_v4 = vsub.f32 %v7368_v19, %v12354_v48  ;;  %v8009_v8 = vsub.f32 %v7934_v55, %v12355_v42  ;;  %2497 = vperm.xlu1 %6733, %v2469_v47   ;;  %v3164_v48 = vand.u32 4294901760, %v3163_v44  ;;  %v3176_v19 = vand.u32 4294901760, %v3175_v59  ;;  %12363 = vst [vmem:[#allocation143_spill] sm:$0xff] %v8028_v16  ;;  %12364 = vst [vmem:[#allocation144_spill] sm:$0xff] %v8030_v5  ;;  %v2470_v55 = vld [vmem:[%s7822_s27 + $0x30] sm:$0xff]  ;;  %v2477_v14 = vld [vmem:[%s7822_s27 + $0x68] sm:$0xff] }
 0x1da   : > { %12352 = vst [vmem:[#allocation138_spill] sm:$0xff] %v7995_v6  ;;  %12358 = vst [vmem:[#allocation140_spill] sm:$0xff] %v8016_v31  ;;  %v12361_v42 = vand.u32 4294901760, %v7953_v41  ;;  %2515 = vperm.xlu0 %6734, %v2475_v13   ;;  %v1175_v37 = vand.u32 4294901760, %v1174_v2  ;;  %v1187_v47 = vand.u32 4294901760, %v1186_v51  ;;  %v12365_v59 = vand.u32 4294901760, %v7964_v56 }
 0x1db   : > { %12356 = vst [vmem:[#allocation139_spill] sm:$0xff] %v8009_v8  ;;  %12360 = vst [vmem:[#allocation141_spill] sm:$0xff] %v8021_v26  ;;  %v1181_v0 = vand.u32 4294901760, %v1180_v63  ;;  %v12368_v2 = vand.u32 4294901760, %v7974_v57  ;;  %v12369_v63 = vand.u32 4294901760, %v7899_v11  ;;  %v12370_v44 = vand.u32 4294901760, %v7995_v6 }
 0x1dc   : > { %v8026_v3 = vsub.f32 %v7953_v41, %v12361_v42  ;;  %v8037_v7 = vsub.f32 %v7964_v56, %v12365_v59  ;;  %v1193_v42 = vand.u32 4294901760, %v1192_v4  ;;  %v12367_v41 = vand.u32 4294901760, %v7961_v20 }
 0x1dd   : > { %v3193_v51 = vsub.f32 %v7974_v57, %v12368_v2  ;;  %v11737_v59 = vand.u32 4294901760, %v8030_v5  ;;  %2500 = vperm.xlu1 %6733, %v2470_v55   ;;  %v8052_v4 = vpack.c.bf16 %v1169_v53, %v12369_v63  ;;  %v8054_v56 = vpack.c.bf16 %v3170_v22, %v3158_v58  ;;  %v2479_v53 = vld [vmem:[%s7822_s27 + $0x78] sm:$0xff] }
 0x1de   : > { %12362 = vst [vmem:[#allocation142_spill] sm:$0xff] %v8026_v3  ;;  %12366 = vst [vmem:[#allocation145_spill] sm:$0xff] %v8037_v7  ;;  %v3181_v43 = vsub.f32 %v7961_v20, %v12367_v41  ;;  %v11741_v41 = vand.u32 4294901760, %v8021_v26  ;;  %v2471_v20 = vld [vmem:[%s7822_s27 + $0x38] sm:$0xff]  ;;  %2521 = vperm.xlu0 %6734, %v2477_v14   ;;  %v8059_v2 = vpack.c.bf16 %v3176_v19, %v3164_v48  ;;  %v12371_v58 = vand.u32 4294901760, %v8009_v8  ;;  %v8074_v14 = vld [vmem:[#allocation7 + $0xc0] sm:$0xff] }
 0x1df   : > { %v8061_v13 = vpack.c.bf16 %v1187_v47, %v1175_v37  ;;  %v3187_v55 = vsub.f32 %v7995_v6, %v12370_v44  ;;  %v8068_v63 = vpack.c.bf16 %v1193_v42, %v1181_v0  ;;  %12372 = vst [vmem:[#allocation146_spill] sm:$0xff] %v8074_v14  ;;  %v8076_v48 = vld [vmem:[#allocation7 + $0xd0] sm:$0xff]  ;;  %v3194_v37 = vand.u32 4294901760, %v3193_v51 }
 0x1e0   : > { %v3182_v22 = vand.u32 4294901760, %v3181_v43  ;;  %v3199_v9 = vsub.f32 %v8009_v8, %v12371_v58  ;;  %12373 = vst [vmem:[#allocation147_spill] sm:$0xff] %v8076_v48  ;;  %v12374_v47 = vand.u32 4294901760, %v8016_v31  ;;  %v12375_v0 = vand.u32 4294901760, %v8028_v16  ;;  %v8091_v58 = vld [vmem:[#allocation7 + $0xe8] sm:$0xff] }
 0x1e1   : > { %v8089_v42 = vsub.f32 %v8030_v5, %v11737_v59  ;;  %12378 = vst [vmem:[#allocation150_spill] sm:$0xff] %v8091_v58  ;;  %2503 = vperm.xlu1 %6733, %v2471_v20   ;;  %v3217_v51 = vsub.f32 %v8021_v26, %v11741_v41  ;;  %v12379_v19 = vand.u32 4294901760, %v8026_v3  ;;  %v3188_v59 = vand.u32 4294901760, %v3187_v55  ;;  %v8116_v55 = vld [vmem:[#allocation7 + $0xe0] sm:$0xff] }
 0x1e2   : > { %v3205_v44 = vsub.f32 %v8016_v31, %v12374_v47  ;;  %v8084_v43 = vsub.f32 %v8028_v16, %v12375_v0  ;;  %v8101_v16 = vld [vmem:[#allocation7 + $0xf8] sm:$0xff]  ;;  %v2472_v31 = vld [vmem:[%s7822_s27 + $0x40] sm:$0xff]  ;;  %2527 = vperm.xlu0 %6734, %v2479_v53   ;;  %v12381_v5 = vand.u32 4294901760, %v8037_v7  ;;  %v3200_v26 = vand.u32 4294901760, %v3199_v9  ;;  %12383 = vst [vmem:[#allocation152_spill] sm:$0xff] %v8116_v55 }
 0x1e3   : > { %12377 = vst [vmem:[#allocation149_spill] sm:$0xff] %v8089_v42  ;;  %v3211_v47 = vsub.f32 %v8026_v3, %v12379_v19  ;;  %12380 = vst [vmem:[#allocation151_spill] sm:$0xff] %v8101_v16  ;;  %v12382_v19 = vand.u32 4294901760, %v7370_v27  ;;  %v3218_v9 = vand.u32 4294901760, %v3217_v51  ;;  %v12384_v6 = vand.u32 4294901760, %v7374_v34 }
 0x1e4   : > { %12376 = vst [vmem:[#allocation148_spill] sm:$0xff] %v8084_v43  ;;  %v3223_v20 = vsub.f32 %v8037_v7, %v12381_v5  ;;  %v3206_v3 = vand.u32 4294901760, %v3205_v44  ;;  %v12385_v0 = vand.u32 4294901760, %v7564_v21  ;;  %v12386_v5 = vand.u32 4294901760, %v8074_v14 }
 0x1e5   : > { %v8112_v11 = vsub.f32 %v7370_v27, %v12382_v19  ;;  %2506 = vperm.xlu1 %6733, %v2472_v31   ;;  %v3212_v41 = vand.u32 4294901760, %v3211_v47  ;;  %v1210_v19 = vsub.f32 %v7374_v34, %v12384_v6  ;;  %v2474_v27 = vld [vmem:[%s7822_s27 + $0x50] sm:$0xff]  ;;  %v12388_v31 = vand.u32 4294901760, %v8076_v48 }
 0x1e6   : > { %v8127_v53 = vsub.f32 %v7564_v21, %v12385_v0  ;;  %v3224_v44 = vand.u32 4294901760, %v3223_v20  ;;  %v8133_v8 = vsub.f32 %v8074_v14, %v12386_v5  ;;  %v8140_v47 = vld [vmem:[#allocation7 + $0xf0] sm:$0xff]  ;;  %v8143_v7 = vpack.c.bf16 %v3194_v37, %v3182_v22 }
 0x1e7   : > { %v8138_v51 = vsub.f32 %v8076_v48, %v12388_v31  ;;  %12390 = vst [vmem:[#allocation155_spill] sm:$0xff] %v8140_v47  ;;  %v1199_v0 = vand.u32 4294901760, %v8112_v11  ;;  %v12391_v20 = vand.u32 4294901760, %v7569_v61  ;;  %v12392_v5 = vand.u32 4294901760, %v8091_v58 }
 0x1e8   : > { %12387 = vst [vmem:[#allocation153_spill] sm:$0xff] %v8133_v8  ;;  %v8154_v31 = vpack.c.bf16 %v3200_v26, %v3188_v59  ;;  %v12394_v48 = vand.u32 4294901760, %v8084_v43  ;;  %v12395_v22 = vand.u32 4294901760, %v8089_v42  ;;  %v12396_v11 = vand.u32 4294901760, %v8101_v16 }
 0x1e9   : > { %12389 = vst [vmem:[#allocation154_spill] sm:$0xff] %v8138_v51  ;;  %v1216_v21 = vsub.f32 %v7569_v61, %v12391_v20  ;;  %v8152_v14 = vsub.f32 %v8091_v58, %v12392_v5  ;;  %2512 = vperm.xlu1 %6733, %v2474_v27   ;;  %v8167_v20 = vpack.c.bf16 %v3218_v9, %v3206_v3  ;;  %v1211_v5 = vand.u32 4294901760, %v1210_v19  ;;  %v2476_v58 = vld [vmem:[%s7822_s27 + $0x60] sm:$0xff] }
 0x1ea   : > { %v3229_v34 = vsub.f32 %v8084_v43, %v12394_v48  ;;  %v3241_v37 = vsub.f32 %v8089_v42, %v12395_v22  ;;  %v8165_v6 = vsub.f32 %v8101_v16, %v12396_v11  ;;  %v1205_v26 = vand.u32 4294901760, %v8127_v53  ;;  %v8191_v22 = vld [vmem:[#allocation7 + $0x108] sm:$0xff] }
 0x1eb   : > { %12393 = vst [vmem:[#allocation156_spill] sm:$0xff] %v8152_v14  ;;  %12398 = vst [vmem:[#allocation158_spill] sm:$0xff] %v8167_v20  ;;  %v11763_v59 = vand.u32 4294901760, %v8140_v47  ;;  %v8172_v61 = vpack.c.bf16 %v3224_v44, %v3212_v41  ;;  %v12400_v42 = vand.u32 4294901760, %v8116_v55  ;;  %v1217_v27 = vand.u32 4294901760, %v1216_v21  ;;  %v8193_v21 = vld [vmem:[#allocation7 + $0x118] sm:$0xff] }
 0x1ec   : > { %12397 = vst [vmem:[#allocation157_spill] sm:$0xff] %v8165_v6  ;;  %v11767_v53 = vand.u32 4294901760, %v7619_v45  ;;  %v11770_v9 = vand.u32 4294901760, %v7624_v39  ;;  %v3230_v19 = vand.u32 4294901760, %v3229_v34  ;;  %v3242_v41 = vand.u32 4294901760, %v3241_v37  ;;  %12403 = vst [vmem:[#allocation162_spill] sm:$0xff] %v8191_v22 }
 0x1ed   : > { %12399 = vst [vmem:[#allocation159_spill] sm:$0xff] %v8172_v61  ;;  %v8179_v11 = vsub.f32 %v8116_v55, %v12400_v42  ;;  %2518 = vperm.xlu1 %6733, %v2476_v58   ;;  %v8189_v42 = vsub.f32 %v8140_v47, %v11763_v59  ;;  %12404 = vst [vmem:[#allocation163_spill] sm:$0xff] %v8193_v21  ;;  %v2478_v58 = vld [vmem:[%s7822_s27 + $0x70] sm:$0xff]  ;;  %v12405_v44 = vand.u32 4294901760, %v8133_v8  ;;  %v12406_v48 = vand.u32 4294901760, %v8138_v51  ;;  %s5687_s27 = sshll.u32 %s6947_s24, 8 }
 0x1ee   : > { %v1246_v3 = vsub.f32 %v7619_v45, %v11767_v53  ;;  %v1258_v34 = vsub.f32 %v7624_v39, %v11770_v9  ;;  %v12407_v16 = vand.u32 4294901760, %v7643_v60  ;;  %v12408_v43 = vand.u32 4294901760, %v8152_v14  ;;  %s11499_s24 = scalar_lea.hbm %s11566_s11, %s5687_s27 }
 0x1ef   : > { %12401 = vst [vmem:[#allocation160_spill] sm:$0xff] %v8179_v11  ;;  %12402 = vst [vmem:[#allocation161_spill] sm:$0xff] %v8189_v42  ;;  %v3235_v59 = vsub.f32 %v8133_v8, %v12405_v44  ;;  %v3247_v47 = vsub.f32 %v8138_v51, %v12406_v48  ;;  %v12409_v61 = vand.u32 4294901760, %v7648_v28  ;;  %v8222_v51 = vld [vmem:[#allocation7 + $0x100] sm:$0xff]  ;;  %v11785_v48 = vand.u32 4294901760, %v7579_v23 }
 0x1f0   : > { %v1252_v53 = vsub.f32 %v7643_v60, %v12407_v16  ;;  %v3253_v9 = vsub.f32 %v8152_v14, %v12408_v43  ;;  %v1247_v37 = vand.u32 4294901760, %v1246_v3  ;;  %v1259_v57 = vand.u32 4294901760, %v1258_v34  ;;  %12410 = vst [vmem:[#allocation164_spill] sm:$0xff] %v8222_v51  ;;  %v8240_v60 = vld [vmem:[#allocation7 + $0x110] sm:$0xff] }
 0x1f1   : > { %v1264_v44 = vsub.f32 %v7648_v28, %v12409_v61  ;;  %2524 = vperm.xlu1 %6733, %v2478_v58   ;;  %v12411_v16 = vand.u32 4294901760, %v8165_v6  ;;  %v11783_v3 = vand.u32 4294901760, %v8189_v42  ;;  %v8230_v61 = vpack.c.bf16 %v1211_v5, %v1199_v0  ;;  %12414 = vst [vmem:[#allocation166_spill] sm:$0xff] %v8240_v60 }
 0x1f2   : > { %v1253_v20 = vand.u32 4294901760, %v1252_v53  ;;  %v8228_v34 = vpack.c.bf16 %v1259_v57, %v1247_v37  ;;  %v3236_v8 = vand.u32 4294901760, %v3235_v59  ;;  %v3248_v28 = vand.u32 4294901760, %v3247_v47  ;;  %v8243_v57 = vld [vmem:[#allocation7 + $0x128] sm:$0xff] }
 0x1f3   : > { %v3265_v43 = vsub.f32 %v8165_v6, %v12411_v16  ;;  %v1265_v14 = vand.u32 4294901760, %v1264_v44  ;;  %v8233_v55 = vpack.c.bf16 %v1217_v27, %v1205_v26  ;;  %v12413_v53 = vand.u32 4294901760, %v8179_v11  ;;  %12415 = vst [vmem:[#allocation167_spill] sm:$0xff] %v8243_v57 }
 0x1f4   : > { %12412 = vst [vmem:[#allocation165_spill] sm:$0xff] %v8228_v34  ;;  %v8247_v0 = vpack.c.bf16 %v3242_v41, %v3230_v19  ;;  %v12417_v47 = vand.u32 4294901760, %v7574_v52  ;;  %v12418_v26 = vand.u32 4294901760, %v8191_v22  ;;  %v12420_v27 = vand.u32 4294901760, %v8193_v21 }
 0x1f5   : > { %v8238_v58 = vsub.f32 %v8179_v11, %v12413_v53  ;;  %v8245_v37 = vpack.c.bf16 %v1265_v14, %v1253_v20  ;;  %v8264_v53 = vld [vmem:[#allocation7 + $0x138] sm:$0xff]  ;;  %v3254_v14 = vand.u32 4294901760, %v3253_v9  ;;  %v3266_v20 = vand.u32 4294901760, %v3265_v43  ;;  %v8281_v9 = vld [vmem:[#allocation7 + $0x120] sm:$0xff] }
 0x1f6   : > { %v8252_v5 = vsub.f32 %v7574_v52, %v12417_v47  ;;  %v8257_v59 = vsub.f32 %v8191_v22, %v12418_v26  ;;  %v8262_v44 = vsub.f32 %v8193_v21, %v12420_v27  ;;  %12422 = vst [vmem:[#allocation171_spill] sm:$0xff] %v8264_v53  ;;  %v8269_v19 = vsub.f32 %v8189_v42, %v11783_v3  ;;  %v8370_v52 = vld [vmem:[#allocation7 + $0x150] sm:$0xff] }
 0x1f7   : > { %12416 = vst [vmem:[#allocation168_spill] sm:$0xff] %v8245_v37  ;;  %v8272_v47 = vpack.c.bf16 %v3248_v28, %v3236_v8  ;;  %v8277_v26 = vsub.f32 %v7579_v23, %v11785_v48  ;;  %12424 = vst [vmem:[#allocation173_spill] sm:$0xff] %v8281_v9  ;;  %v3260_v43 = vand.u32 4294901760, %v8238_v58  ;;  %v12425_v21 = vand.u32 4294901760, %v8222_v51 }
 0x1f8   : > { %12419 = vst [vmem:[#allocation169_spill] sm:$0xff] %v8257_v59  ;;  %12421 = vst [vmem:[#allocation170_spill] sm:$0xff] %v8262_v44  ;;  %v1223_v48 = vand.u32 4294901760, %v8252_v5  ;;  %v11794_v16 = vand.u32 4294901760, %v7653_v17  ;;  %v8295_v22 = vpack.c.bf16 %v3266_v20, %v3254_v14  ;;  %v3272_v58 = vand.u32 4294901760, %v8269_v19 }
 0x1f9   : > { %12423 = vst [vmem:[#allocation172_spill] sm:$0xff] %v8272_v47  ;;  %v8288_v8 = vsub.f32 %v8222_v51, %v12425_v21  ;;  %v12428_v3 = vand.u32 4294901760, %v7609_v36  ;;  %v8301_v21 = vld [vmem:[#allocation7 + $0x130] sm:$0xff]  ;;  %v1235_v5 = vand.u32 4294901760, %v8277_v26  ;;  %v12430_v41 = vand.u32 4294901760, %v8240_v60  ;;  %12447 = vst [vmem:[#allocation185_spill] sm:$0xff] %v8370_v52 }
 0x1fa   : > { %12427 = vst [vmem:[#allocation175_spill] sm:$0xff] %v8295_v22  ;;  %12429 = vst [vmem:[#allocation176_spill] sm:$0xff] %v8301_v21  ;;  %v12432_v14 = vand.u32 4294901760, %v8243_v57  ;;  %v12434_v19 = vand.u32 4294901760, %v7614_v35  ;;  %v12435_v51 = vand.u32 4294901760, %v8264_v53  ;;  %v12438_v11 = vand.u32 4294901760, %v8262_v44 }
 0x1fb   : > { %12426 = vst [vmem:[#allocation174_spill] sm:$0xff] %v8288_v8  ;;  %v1228_v42 = vsub.f32 %v7609_v36, %v12428_v3  ;;  %v8308_v27 = vsub.f32 %v8240_v60, %v12430_v41  ;;  %v1270_v3 = vsub.f32 %v7653_v17, %v11794_v16  ;;  %v11809_v60 = vand.u32 4294901760, %v7658_v30 }
 0x1fc   : > { %v8313_v20 = vsub.f32 %v8243_v57, %v12432_v14  ;;  %v1240_v28 = vsub.f32 %v7614_v35, %v12434_v19  ;;  %v8325_v41 = vsub.f32 %v8264_v53, %v12435_v51  ;;  %v12437_v14 = vand.u32 4294901760, %v8257_v59 }
 0x1fd   : > { %12431 = vst [vmem:[#allocation177_spill] sm:$0xff] %v8308_v27  ;;  %v3289_v16 = vsub.f32 %v8262_v44, %v12438_v11  ;;  %v11810_v19 = vand.u32 4294901760, %v7672_v1  ;;  %v12439_v26 = vand.u32 4294901760, %v8281_v9  ;;  %v1271_v51 = vand.u32 4294901760, %v1270_v3  ;;  %v8353_v3 = vld [vmem:[#allocation7 + $0x158] sm:$0xff] }
 0x1fe   : > { %12433 = vst [vmem:[#allocation178_spill] sm:$0xff] %v8313_v20  ;;  %12436 = vst [vmem:[#allocation179_spill] sm:$0xff] %v8325_v41  ;;  %v3277_v57 = vsub.f32 %v8257_v59, %v12437_v14  ;;  %v1282_v53 = vsub.f32 %v7658_v30, %v11809_v60  ;;  %v11813_v14 = vand.u32 4294901760, %v7677_v12  ;;  %v1229_v59 = vand.u32 4294901760, %v1228_v42 }
 0x1ff   : > { %v8339_v35 = vsub.f32 %v8281_v9, %v12439_v26  ;;  %v1276_v6 = vsub.f32 %v7672_v1, %v11810_v19  ;;  %v1241_v44 = vand.u32 4294901760, %v1240_v28  ;;  %v8351_v9 = vld [vmem:[#allocation7 + $0x148] sm:$0xff]  ;;  %12442 = vst [vmem:[#allocation182_spill] sm:$0xff] %v8353_v3  ;;  %v12443_v36 = vand.u32 4294901760, %v8288_v8  ;;  %v8368_v26 = vld [vmem:[#allocation7 + $0x140] sm:$0xff] }
 0x200   : > { %12441 = vst [vmem:[#allocation181_spill] sm:$0xff] %v8351_v9  ;;  %v1283_v23 = vand.u32 4294901760, %v1282_v53  ;;  %v1288_v42 = vsub.f32 %v7677_v12, %v11813_v14  ;;  %v3278_v60 = vand.u32 4294901760, %v3277_v57  ;;  %v12444_v19 = vand.u32 4294901760, %v8301_v21  ;;  %12446 = vst [vmem:[#allocation184_spill] sm:$0xff] %v8368_v26  ;;  %v8373_v14 = vld [vmem:[#allocation7 + $0x168] sm:$0xff] }
 0x201   : > { %12440 = vst [vmem:[#allocation180_spill] sm:$0xff] %v8339_v35  ;;  %v8361_v11 = vsub.f32 %v8288_v8, %v12443_v36  ;;  %v1277_v53 = vand.u32 4294901760, %v1276_v6  ;;  %v3290_v37 = vand.u32 4294901760, %v3289_v16  ;;  %12448 = vst [vmem:[#allocation186_spill] sm:$0xff] %v8373_v14  ;;  %v8375_v57 = vld [vmem:[#allocation7 + $0x178] sm:$0xff]  ;;  %v12451_v8 = vand.u32 4294901760, %v8308_v27 }
 0x202   : > { %v8366_v28 = vsub.f32 %v8301_v21, %v12444_v19  ;;  %12449 = vst [vmem:[#allocation187_spill] sm:$0xff] %v8375_v57  ;;  %v8377_v22 = vpack.c.bf16 %v1283_v23, %v1271_v51  ;;  %v1289_v36 = vand.u32 4294901760, %v1288_v42  ;;  %v12452_v21 = vand.u32 4294901760, %v8313_v20 }
 0x203   : > { %v8382_v19 = vsub.f32 %v8308_v27, %v12451_v8  ;;  %v12453_v34 = vand.u32 4294901760, %v8325_v41  ;;  %v8400_v27 = vpack.c.bf16 %v3272_v58, %v3260_v43  ;;  %v11827_v6 = vand.u32 4294901760, %v8375_v57 }
 0x204   : > { %12445 = vst [vmem:[#allocation183_spill] sm:$0xff] %v8366_v28  ;;  %12450 = vst [vmem:[#allocation188_spill] sm:$0xff] %v8377_v22  ;;  %v8387_v47 = vsub.f32 %v8313_v20, %v12452_v21  ;;  %v8398_v8 = vpack.c.bf16 %v1289_v36, %v1277_v53  ;;  %v11823_v21 = vand.u32 4294901760, %v8366_v28  ;;  %v11825_v20 = vand.u32 4294901760, %v8373_v14 }
 0x205   : > { %v8394_v23 = vsub.f32 %v8325_v41, %v12453_v34  ;;  %12455 = vst [vmem:[#allocation190_spill] sm:$0xff] %v8400_v27  ;;  %v8405_v16 = vpack.c.bf16 %v1235_v5, %v1223_v48  ;;  %v8407_v22 = vpack.c.bf16 %v1241_v44, %v1229_v59  ;;  %v12456_v51 = vand.u32 4294901760, %v8339_v35  ;;  %v8428_v44 = vld [vmem:[#allocation7 + $0x160] sm:$0xff]  ;;  %v8430_v5 = vld [vmem:[#allocation7 + $0x170] sm:$0xff] }
 0x206   : > { %12454 = vst [vmem:[#allocation189_spill] sm:$0xff] %v8398_v8  ;;  %v8415_v53 = vpack.c.bf16 %v3290_v37, %v3278_v60  ;;  %v12458_v58 = vand.u32 4294901760, %v8351_v9  ;;  %v12460_v48 = vand.u32 4294901760, %v8353_v3  ;;  %12462 = vst [vmem:[#allocation194_spill] sm:$0xff] %v8428_v44  ;;  %v12464_v37 = vand.u32 4294901760, %v8368_v26 }
 0x207   : > { %v8413_v42 = vsub.f32 %v8339_v35, %v12456_v51  ;;  %12463 = vst [vmem:[#allocation195_spill] sm:$0xff] %v8430_v5  ;;  %v8452_v51 = vsub.f32 %v8373_v14, %v11825_v20  ;;  %v11830_v60 = vand.u32 4294901760, %v7682_v25  ;;  %v12472_v35 = vand.u32 4294901760, %v8430_v5 }
 0x208   : > { %12457 = vst [vmem:[#allocation191_spill] sm:$0xff] %v8415_v53  ;;  %v8421_v36 = vsub.f32 %v8351_v9, %v12458_v58  ;;  %v8426_v59 = vsub.f32 %v8353_v3, %v12460_v48  ;;  %v8437_v43 = vsub.f32 %v8368_v26, %v12464_v37  ;;  %v12466_v58 = vand.u32 4294901760, %v8370_v52 }
 0x209   : > { %v8447_v48 = vsub.f32 %v8366_v28, %v11823_v21  ;;  %12468 = vst [vmem:[#allocation198_spill] sm:$0xff] %v8452_v51  ;;  %v8457_v37 = vsub.f32 %v8375_v57, %v11827_v6  ;;  %v11835_v21 = vand.u32 4294901760, %v7687_v18  ;;  %v1294_v14 = vsub.f32 %v7682_v25, %v11830_v60 }
 0x20a   : > { %12459 = vst [vmem:[#allocation192_spill] sm:$0xff] %v8421_v36  ;;  %12461 = vst [vmem:[#allocation193_spill] sm:$0xff] %v8426_v59  ;;  %v8442_v34 = vsub.f32 %v8370_v52, %v12466_v58  ;;  %v11838_v6 = vand.u32 4294901760, %v7697_v33  ;;  %v12470_v57 = vand.u32 4294901760, %v8428_v44  ;;  %v8491_v52 = vld [vmem:[#allocation7 + $0x188] sm:$0xff] }
 0x20b   : > { %12465 = vst [vmem:[#allocation196_spill] sm:$0xff] %v8437_v43  ;;  %12469 = vst [vmem:[#allocation199_spill] sm:$0xff] %v8457_v37  ;;  %v1306_v26 = vsub.f32 %v7687_v18, %v11835_v21  ;;  %v1295_v9 = vand.u32 4294901760, %v1294_v14  ;;  %v8489_v21 = vsub.f32 %v8430_v5, %v12472_v35  ;;  %v12475_v14 = vand.u32 4294901760, %v7702_v29 }
 0x20c   : > { %12467 = vst [vmem:[#allocation197_spill] sm:$0xff] %v8442_v34  ;;  %v1300_v60 = vsub.f32 %v7697_v33, %v11838_v6  ;;  %v8484_v58 = vsub.f32 %v8428_v44, %v12470_v57  ;;  %12474 = vst [vmem:[#allocation202_spill] sm:$0xff] %v8491_v52  ;;  %v12476_v6 = vand.u32 4294901760, %v8421_v36  ;;  %v12477_v57 = vand.u32 4294901760, %v8426_v59  ;;  %v8508_v33 = vld [vmem:[#allocation7 + $0x198] sm:$0xff] }
 0x20d   : > { %v689_v28 = vpop.xlane.xlu0 %688  ;;  %12473 = vst [vmem:[#allocation201_spill] sm:$0xff] %v8489_v21  ;;  %v1307_v3 = vand.u32 4294901760, %v1306_v26  ;;  %v1312_v20 = vsub.f32 %v7702_v29, %v12475_v14  ;;  %v12478_v35 = vand.u32 4294901760, %v8437_v43  ;;  %v12479_v26 = vand.u32 4294901760, %v8442_v34  ;;  %12480 = vst [vmem:[#allocation203_spill] sm:$0xff] %v8508_v33 }
 0x20e   : > { %12471 = vst [vmem:[#allocation200_spill] sm:$0xff] %v8484_v58  ;;  %v720_v41 = vmul.f32 0.0078125, %v689_v28  ;;  %v3325_v8 = vsub.f32 %v8421_v36, %v12476_v6  ;;  %v3337_v44 = vsub.f32 %v8426_v59, %v12477_v57  ;;  %v1301_v53 = vand.u32 4294901760, %v1300_v60  ;;  %v8517_v59 = vld [vmem:[#allocation7 + $0x180] sm:$0xff] }
 0x20f   : > { %v3331_v5 = vsub.f32 %v8437_v43, %v12478_v35  ;;  %v3343_v27 = vsub.f32 %v8442_v34, %v12479_v26  ;;  %v8510_v28 = vpack.c.bf16 %v1307_v3, %v1295_v9  ;;  %v1313_v14 = vand.u32 4294901760, %v1312_v20  ;;  %12483 = vst [vmem:[#allocation205_spill] sm:$0xff] %v8517_v59 }
 0x210   : > { %v736_v29 = vadd.f32 1e-05, %v720_v41  ;;  %v3320_v6 = vand.u32 4294901760, %v8447_v48  ;;  %v12482_v36 = vand.u32 4294901760, %v8452_v51  ;;  %v12484_v43 = vand.u32 4294901760, %v8457_v37  ;;  %v8524_v41 = vld [vmem:[#allocation7 + $0x190] sm:$0xff] }
 0x211   : > { %12481 = vst [vmem:[#allocation204_spill] sm:$0xff] %v8510_v28  ;;  %v691_v35 = vpop.xlane.xlu1 %690  ;;  %12485 = vst [vmem:[#allocation206_spill] sm:$0xff] %v8524_v41  ;;  %v8526_v3 = vpack.c.bf16 %v1313_v14, %v1301_v53  ;;  %v11860_v57 = vand.u32 4294901760, %v8508_v33  ;;  %v3332_v34 = vand.u32 4294901760, %v3331_v5  ;;  %v3344_v28 = vand.u32 4294901760, %v3343_v27 }
 0x212   : > { %v3349_v60 = vsub.f32 %v8452_v51, %v12482_v36  ;;  %v3361_v26 = vsub.f32 %v8457_v37, %v12484_v43  ;;  %6735 = vrsqrt.f32 %v736_v29  ;;  %v721_v48 = vmul.f32 0.0078125, %v691_v35 }
 0x213   : > { %12486 = vst [vmem:[#allocation207_spill] sm:$0xff] %v8526_v3  ;;  %v3326_v36 = vand.u32 4294901760, %v3325_v8  ;;  %v3338_v51 = vand.u32 4294901760, %v3337_v44  ;;  %v11859_v18 = vand.u32 4294901760, %v8517_v59  ;;  %v12487_v43 = vand.u32 4294901760, %v8361_v11 }
 0x214   : > { %v737_v25 = vadd.f32 1e-05, %v721_v48  ;;  %v12488_v9 = vand.u32 4294901760, %v8382_v19  ;;  %v12489_v53 = vand.u32 4294901760, %v8491_v52  ;;  %v3350_v44 = vand.u32 4294901760, %v3349_v60 }
 0x215   : > { %v693_v14 = vpop.xlane.xlu1 %692  ;;  %v3362_v5 = vand.u32 4294901760, %v3361_v26  ;;  %v12491_v27 = vand.u32 4294901760, %v8484_v58  ;;  %v12492_v11 = vand.u32 4294901760, %v8489_v21  ;;  %v12493_v48 = vand.u32 4294901760, %v8387_v47  ;;  %v8576_v47 = vld [vmem:[#allocation7 + $0x1a8] sm:$0xff] }
 0x216   : > { %v8534_v20 = vpack.c.bf16 %v12488_v9, %v12487_v43  ;;  %v8539_v29 = vsub.f32 %v8491_v52, %v12489_v53  ;;  %6737 = vrsqrt.f32 %v737_v25  ;;  %v722_v9 = vmul.f32 0.0078125, %v693_v14  ;;  %12501 = vst [vmem:[#allocation214_spill] sm:$0xff] %v8576_v47  ;;  %v8621_v52 = vld [vmem:[%s11563_s8] ss:$0 sm:$0xff] }
 0x217   : > { %v8545_v35 = vsub.f32 %v8484_v58, %v12491_v27  ;;  %v8550_v19 = vsub.f32 %v8489_v21, %v12492_v11  ;;  %v12494_v43 = vand.u32 4294901760, %v8394_v23  ;;  %v8561_v60 = vsub.f32 %v8508_v33, %v11860_v57 }
 0x218   : > { %12490 = vst [vmem:[#allocation208_spill] sm:$0xff] %v8539_v29  ;;  %v12496_v26 = vand.u32 4294901760, %v8413_v42  ;;  %v8567_v8 = vpack.c.bf16 %v3338_v51, %v3326_v36  ;;  %v8569_v11 = vpack.c.bf16 %v3344_v28, %v3332_v34  ;;  %v8574_v25 = vsub.f32 %v8517_v59, %v11859_v18 }
 0x219   : > { %v8556_v53 = vpack.c.bf16 %v12494_v43, %v12493_v48  ;;  %12495 = vst [vmem:[#allocation209_spill] sm:$0xff] %v8561_v60  ;;  %v738_v23 = vadd.f32 1e-05, %v722_v9  ;;  %v12502_v48 = vand.u32 4294901760, %v8524_v41  ;;  %v695_v51 = vpop.xlane.xlu1 %694  ;;  %v8587_v28 = vpack.c.bf16 %v3362_v5, %v3350_v44 }
 0x21a   : > { %v8565_v27 = vpack.c.bf16 %v3320_v6, %v12496_v26  ;;  %12498 = vst [vmem:[#allocation211_spill] sm:$0xff] %v8567_v8  ;;  %12499 = vst [vmem:[#allocation212_spill] sm:$0xff] %v8569_v11  ;;  %v8584_v6 = vld [vmem:[#allocation7 + $0x1b8] sm:$0xff]  ;;  %v8591_v26 = vld [vmem:[#allocation7 + $0x1a0] sm:$0xff]  ;;  %v11862_v9 = vand.u32 4294901760, %v7708_v32  ;;  %v723_v18 = vmul.f32 0.0078125, %v695_v51 }
 0x21b   : > { %12500 = vst [vmem:[#allocation213_spill] sm:$0xff] %v8574_v25  ;;  %v8582_v42 = vsub.f32 %v8524_v41, %v12502_v48  ;;  %12504 = vst [vmem:[#allocation216_spill] sm:$0xff] %v8584_v6  ;;  %6739 = vrsqrt.f32 %v738_v23  ;;  %v12507_v44 = vand.u32 4294901760, %v7705_v54  ;;  %v8607_v23 = vld [vmem:[%s11562_s7] ss:$0 sm:$0xff]  ;;  %v12508_v51 = vand.u32 4294901760, %v8539_v29 }
 0x21c   : > { %12497 = vst [vmem:[#allocation210_spill] sm:$0xff] %v8565_v27  ;;  %12505 = vst [vmem:[#allocation217_spill] sm:$0xff] %v8587_v28  ;;  %v1330_v43 = vsub.f32 %v7708_v32, %v11862_v9  ;;  %v6736_v36 = vpop.eup %6735  ;;  %v739_v41 = vadd.f32 1e-05, %v723_v18  ;;  %v11872_v18 = vand.u32 4294901760, %v7716_v62  ;;  %v12514_v58 = vand.u32 4294901760, %v8574_v25 }
 0x21d   : > { %12503 = vst [vmem:[#allocation215_spill] sm:$0xff] %v8582_v42  ;;  %12506 = vst [vmem:[#allocation218_spill] sm:$0xff] %v8591_v26  ;;  %v1318_v5 = vsub.f32 %v7705_v54, %v12507_v44  ;;  %v8612_v14 = vsub.f32 %v8539_v29, %v12508_v51  ;;  %v768_v57 = vmul.f32 %v6736_v36, %v7380_v38  ;;  %v697_v48 = vpop.xlane.xlu1 %696  ;;  %v12509_v51 = vand.u32 4294901760, %v8561_v60 }
 0x21e   : > { %v1331_v59 = vand.u32 4294901760, %v1330_v43  ;;  %6741 = vrsqrt.f32 %v739_v41  ;;  %v724_v33 = vmul.f32 0.0078125, %v697_v48  ;;  %v12510_v44 = vand.u32 4294901760, %v8576_v47  ;;  %v8634_v43 = vld [vmem:[#allocation7 + $0x1b0] sm:$0xff] }
 0x21f   : > { %v1319_v9 = vand.u32 4294901760, %v1318_v5  ;;  %v8626_v34 = vsub.f32 %v8561_v60, %v12509_v51  ;;  %v791_v36 = vmul.f32 %v8607_v23, %v768_v57  ;;  %12512 = vst [vmem:[#allocation220_spill] sm:$0xff] %v8634_v43  ;;  %v1324_v48 = vsub.f32 %v7716_v62, %v11872_v18 }
 0x220   : > { %v8631_v38 = vsub.f32 %v8576_v47, %v12510_v44  ;;  %v6738_v21 = vpop.eup %6737  ;;  %v740_v51 = vadd.f32 1e-05, %v724_v33  ;;  %v8645_v37 = vsub.f32 %v8574_v25, %v12514_v58  ;;  %v12515_v44 = vand.u32 4294901760, %v8582_v42 }
 0x221   : > { %v8636_v41 = vpack.c.bf16 %v1331_v59, %v1319_v9  ;;  %v12516_v59 = vand.u32 4294901760, %v8584_v6  ;;  %v769_v18 = vmul.f32 %v6738_v21, %v7387_v46  ;;  %v699_v5 = vpop.xlane.xlu1 %698  ;;  %v814_v33 = vadd.f32 %v8621_v52, %v791_v36 }
 0x222   : > { %12511 = vst [vmem:[#allocation219_spill] sm:$0xff] %v8631_v38  ;;  %v8650_v57 = vsub.f32 %v8582_v42, %v12515_v44  ;;  %v1325_v47 = vand.u32 4294901760, %v1324_v48  ;;  %6743 = vrsqrt.f32 %v740_v51  ;;  %v725_v3 = vmul.f32 0.0078125, %v699_v5 }
 0x223   : > { %12513 = vst [vmem:[#allocation221_spill] sm:$0xff] %v8636_v41  ;;  %v8655_v9 = vsub.f32 %v8584_v6, %v12516_v59  ;;  %v12518_v41 = vand.u32 4294901760, %v7719_v40  ;;  %v12519_v28 = vand.u32 4294901760, %v8591_v26  ;;  %v8668_v59 = vand.u32 4294901760, %v814_v33 }
 0x224   : > { %v792_v46 = vmul.f32 %v8607_v23, %v769_v18  ;;  %v741_v6 = vadd.f32 1e-05, %v725_v3  ;;  %v11876_v5 = vand.u32 4294901760, %v8631_v38 }
 0x225   : > { %12517 = vst [vmem:[#allocation222_spill] sm:$0xff] %v8655_v9  ;;  %v1336_v58 = vsub.f32 %v7719_v40, %v12518_v41  ;;  %v8666_v11 = vsub.f32 %v8591_v26, %v12519_v28  ;;  %12521 = vst [vmem:[#allocation224_spill] sm:$0xff] %v8668_v59  ;;  %v6740_v48 = vpop.eup %6739  ;;  %v11879_v51 = vand.u32 4294901760, %v8655_v9  ;;  %2353 = vmatmul.mubr.f32.vlgmr.msra.gmra.mrb[0].mxu0 %v8668_v59  ;;  %v701_v28 = vpop.xlane.xlu1 %700 }
 0x226   : > { %v770_v44 = vmul.f32 %v6740_v48, %v7392_v24  ;;  %v815_v26 = vadd.f32 %v8621_v52, %v792_v46  ;;  %v8679_v18 = vsub.f32 %v814_v33, %v8668_v59  ;;  %6745 = vrsqrt.f32 %v741_v6  ;;  %5947 = vmatpush1.bf16.msra.mxu0 %v7915_v50  ;;  %v8693_v6 = vld [vmem:[#allocation7 + $0x1c8] sm:$0xff] }
 0x227   : > { %12520 = vst [vmem:[#allocation223_spill] sm:$0xff] %v8666_v11  ;;  %v1337_v36 = vand.u32 4294901760, %v1336_v58  ;;  %v726_v3 = vmul.f32 0.0078125, %v701_v28  ;;  %v12524_v58 = vmov 0.0   ;;  %5949 = vmatprep.subr.bf16.mxu0 %v7923_v49  ;;  %12526 = vst [vmem:[#allocation228_spill] sm:$0xff] %v8693_v6  ;;  %v8700_v24 = vsub.f32 %v8631_v38, %v11876_v5  ;;  %v12585_v38 = vld [vmem:[#allocation74_spill] sm:$0xff] }
 0x228   : > { %12522 = vst [vmem:[#allocation225_spill] sm:$0xff] %v8679_v18  ;;  %2358 = vmatprep.mubr.f32.mxu0 %v12524_v58  ;;  %v8687_v48 = vand.u32 4294901760, %v815_v26  ;;  %v11881_v46 = vand.u32 4294901760, %v8679_v18  ;;  %v793_v33 = vmul.f32 %v8607_v23, %v770_v44  ;;  %v6742_v50 = vpop.eup %6741  ;;  %v8705_v49 = vsub.f32 %v8655_v9, %v11879_v51  ;;  %v8721_v51 = vld [vmem:[#allocation7 + $0x1c0] sm:$0xff] }
 0x229   : > { %v8681_v21 = vpack.c.bf16 %v1337_v36, %v1325_v47  ;;  %v8695_v36 = vld [vmem:[#allocation7 + $0x1d8] sm:$0xff]  ;;  %v742_v28 = vadd.f32 1e-05, %v726_v3  ;;  %v12528_v44 = vand.u32 4294901760, %v8634_v43  ;;  %v771_v47 = vmul.f32 %v6742_v50, %v7397_v15  ;;  %v703_v3 = vpop.xlane.xlu1 %702  ;;  %12531 = vst [vmem:[#allocation232_spill] sm:$0xff] %v8721_v51  ;;  %v12537_v50 = vld [vmem:[#allocation136_spill] sm:$0xff] }
 0x22a   : > { %12525 = vst [vmem:[#allocation227_spill] sm:$0xff] %v8687_v48  ;;  %12527 = vst [vmem:[#allocation229_spill] sm:$0xff] %v8695_v36  ;;  %2360 = vmatmul.mubr.f32.gmra.mrb[2].mxu0 %v8687_v48  ;;  %v974_v5 = vsub.f32 %v8679_v18, %v11881_v46  ;;  %v816_v59 = vadd.f32 %v8621_v52, %v793_v33  ;;  %v727_v8 = vmul.f32 0.0078125, %v703_v3  ;;  %v12533_v46 = vld [vmem:[#allocation128_spill] sm:$0xff]  ;;  %v12534_v3 = vand.u32 4294901760, %v8666_v11 }
 0x22b   : > { %12523 = vst [vmem:[#allocation226_spill] sm:$0xff] %v8681_v21  ;;  %v8710_v41 = vsub.f32 %v8634_v43, %v12528_v44  ;;  %v8719_v21 = vsub.f32 %v815_v26, %v8687_v48  ;;  %6747 = vrsqrt.f32 %v742_v28  ;;  %5951 = vmatpush1.bf16.msra.mxu0 %v7925_v10  ;;  %2365 = vmatprep.mubr.f32.mxu0 %v12524_v58 }
 0x22c   : > { %v975_v44 = vand.u32 4294901760, %v974_v5  ;;  %v8727_v43 = vand.u32 4294901760, %v816_v59  ;;  %5953 = vmatprep.subr.bf16.mxu0 %v12533_v46  ;;  %v794_v33 = vmul.f32 %v8607_v23, %v771_v47  ;;  %v6744_v18 = vpop.eup %6743  ;;  %v743_v28 = vadd.f32 1e-05, %v727_v8  ;;  %v12535_v5 = vld [vmem:[#allocation52_spill] sm:$0xff] }
 0x22d   : > { %12529 = vst [vmem:[#allocation230_spill] sm:$0xff] %v8710_v41  ;;  %12530 = vst [vmem:[#allocation231_spill] sm:$0xff] %v8719_v21  ;;  %v11886_v26 = vand.u32 4294901760, %v8719_v21  ;;  %v8735_v10 = vsub.f32 %v8666_v11, %v12534_v3  ;;  %v772_v48 = vmul.f32 %v6744_v18, %v12535_v5  ;;  %v705_v46 = vpop.xlane.xlu1 %704  ;;  %v8746_v3 = vld [vmem:[#allocation7 + $0x1d0] sm:$0xff] }
 0x22e   : > { %12532 = vst [vmem:[#allocation233_spill] sm:$0xff] %v8727_v43  ;;  %976 = vmatmul.mubr.f32.vlgmr.msra.gmra.mrb[0].mxu1 %v975_v44  ;;  %2367 = vmatmul.mubr.f32.gmra.mrb[4].mxu0 %v8727_v43  ;;  %v817_v8 = vadd.f32 %v8621_v52, %v794_v33  ;;  %12536 = vst [vmem:[#allocation128_spill] sm:$0xff] %v8746_v3  ;;  %6749 = vrsqrt.f32 %v743_v28  ;;  %v728_v15 = vmul.f32 0.0078125, %v705_v46  ;;  %v12539_v44 = vand.u32 4294901760, %v8693_v6 }
 0x22f   : > { %v985_v47 = vsub.f32 %v8719_v21, %v11886_v26  ;;  %5723 = vmatpush1.bf16.msra.mxu1 %v8052_v4  ;;  %5955 = vmatpush1.bf16.msra.mxu0 %v12537_v50  ;;  %v8751_v18 = vsub.f32 %v816_v59, %v8727_v43  ;;  %v795_v4 = vmul.f32 %v8607_v23, %v772_v48  ;;  %v12542_v28 = vand.u32 4294901760, %v8695_v36  ;;  %v8768_v59 = vld [vmem:[#allocation7 + $0x1e8] sm:$0xff]  ;;  %v8779_v21 = vld [vmem:[#allocation7 + $0x1f8] sm:$0xff] }
 0x230   : > { %v8756_v5 = vsub.f32 %v8693_v6, %v12539_v44  ;;  %981 = vmatprep.mubr.f32.mxu1 %v12524_v58  ;;  %2372 = vmatprep.mubr.f32.mxu0 %v12524_v58  ;;  %v8760_v26 = vand.u32 4294901760, %v817_v8  ;;  %12544 = vst [vmem:[#allocation236_spill] sm:$0xff] %v8768_v59  ;;  %v6746_v46 = vpop.eup %6745  ;;  %v744_v27 = vadd.f32 1e-05, %v728_v15  ;;  %v12545_v6 = vand.u32 4294901760, %v8721_v51  ;;  %12547 = vst [vmem:[#allocation238_spill] sm:$0xff] %v8779_v21 }
 0x231   : > { %12538 = vst [vmem:[#allocation52_spill] sm:$0xff] %v8751_v18  ;;  %v986_v33 = vand.u32 4294901760, %v985_v47  ;;  %v8766_v50 = vsub.f32 %v8695_v36, %v12542_v28  ;;  %5957 = vmatprep.subr.bf16.mxu0 %v8054_v56  ;;  %5725 = vmatprep.subr.bf16.mxu1 %v8061_v13  ;;  %v12548_v28 = vld [vmem:[#allocation55_spill] sm:$0xff]  ;;  %v707_v15 = vpop.xlane.xlu1 %706  ;;  %v818_v56 = vadd.f32 %v8621_v52, %v795_v4  ;;  %v8788_v44 = vld [vmem:[#allocation7 + $0x1e0] sm:$0xff]  ;;  %v12556_v4 = vld [vmem:[#allocation58_spill] sm:$0xff] }
 0x232   : > { %12540 = vst [vmem:[#allocation136_spill] sm:$0xff] %v8756_v5  ;;  %12541 = vst [vmem:[#allocation234_spill] sm:$0xff] %v8760_v26  ;;  %v8777_v48 = vsub.f32 %v8721_v51, %v12545_v6  ;;  %v773_v36 = vmul.f32 %v6746_v46, %v12548_v28  ;;  %2374 = vmatmul.mubr.f32.gmra.mrb[6].mxu0 %v8760_v26  ;;  %v8785_v13 = vsub.f32 %v817_v8, %v8760_v26 }
 0x233   : > { %12543 = vst [vmem:[#allocation235_spill] sm:$0xff] %v8766_v50  ;;  %987 = vmatmul.mubr.f32.gmra.mrb[2].mxu1 %v986_v33  ;;  %12550 = vst [vmem:[#allocation239_spill] sm:$0xff] %v8788_v44  ;;  %6751 = vrsqrt.f32 %v744_v27  ;;  %v729_v6 = vmul.f32 0.0078125, %v707_v15  ;;  %5959 = vmatpush1.bf16.msra.mxu0 %v8059_v2  ;;  %v12551_v33 = vand.u32 4294901760, %v8751_v18  ;;  %v8798_v8 = vand.u32 4294901760, %v818_v56  ;;  %v8803_v15 = vld [vmem:[#allocation7 + $0x1f0] sm:$0xff] }
 0x234   : > { %12546 = vst [vmem:[#allocation237_spill] sm:$0xff] %v8777_v48  ;;  %12549 = vst [vmem:[#allocation55_spill] sm:$0xff] %v8785_v13  ;;  %992 = vmatprep.mubr.f32.mxu1 %v12524_v58  ;;  %2379 = vmatprep.mubr.f32.mxu0 %v12524_v58  ;;  %v796_v27 = vmul.f32 %v8607_v23, %v773_v36 }
 0x235   : > { %v996_v46 = vsub.f32 %v8751_v18, %v12551_v33  ;;  %5727 = vmatpush1.bf16.msra.mxu1 %v8068_v63  ;;  %12552 = vst [vmem:[#allocation240_spill] sm:$0xff] %v8798_v8  ;;  %12553 = vst [vmem:[#allocation241_spill] sm:$0xff] %v8803_v15  ;;  %v6748_v47 = vpop.eup %6747  ;;  %v745_v51 = vadd.f32 1e-05, %v729_v6  ;;  %5961 = vmatprep.subr.bf16.mxu0 %v8143_v7  ;;  %v12554_v33 = vand.u32 4294901760, %v8746_v3  ;;  %v709_v2 = vpop.xlane.xlu1 %708  ;;  %v12557_v18 = vand.u32 4294901760, %v8785_v13 }
 0x236   : > { %5729 = vmatprep.subr.bf16.mxu1 %v8230_v61  ;;  %v774_v36 = vmul.f32 %v6748_v47, %v12556_v4  ;;  %2381 = vmatmul.mubr.f32.gmra.mrb[8].mxu0 %v8798_v8  ;;  %v819_v7 = vadd.f32 %v8621_v52, %v796_v27  ;;  %v8820_v61 = vsub.f32 %v818_v56, %v8798_v8  ;;  %v12566_v56 = vld [vmem:[#allocation82_spill] sm:$0xff] }
 0x237   : > { %v997_v26 = vand.u32 4294901760, %v996_v46  ;;  %v8810_v63 = vsub.f32 %v8746_v3, %v12554_v33  ;;  %v1007_v6 = vsub.f32 %v8785_v13, %v12557_v18  ;;  %6753 = vrsqrt.f32 %v745_v51  ;;  %5963 = vmatpush1.bf16.msra.mxu0 %v8154_v31  ;;  %2386 = vmatprep.mubr.f32.mxu0 %v12524_v58 }
 0x238   : > { %12558 = vst [vmem:[#allocation58_spill] sm:$0xff] %v8820_v61  ;;  %v730_v46 = vmul.f32 0.0078125, %v709_v2  ;;  %v8828_v4 = vand.u32 4294901760, %v819_v7  ;;  %v797_v51 = vmul.f32 %v8607_v23, %v774_v36  ;;  %v12560_v2 = vld [vmem:[#allocation158_spill] sm:$0xff]  ;;  %v12561_v31 = vand.u32 4294901760, %v8768_v59  ;;  %v12567_v36 = vld [vmem:[#allocation61_spill] sm:$0xff] }
 0x239   : > { %12555 = vst [vmem:[#allocation242_spill] sm:$0xff] %v8810_v63  ;;  %998 = vmatmul.mubr.f32.gmra.mrb[4].mxu1 %v997_v26  ;;  %v1008_v18 = vand.u32 4294901760, %v1007_v6  ;;  %v6750_v26 = vpop.eup %6749  ;;  %5965 = vmatprep.subr.bf16.mxu0 %v12560_v2  ;;  %v12563_v33 = vand.u32 4294901760, %v8779_v21  ;;  %v12571_v3 = vand.u32 4294901760, %v8788_v44 }
 0x23a   : > { %1003 = vmatprep.mubr.f32.mxu1 %v12524_v58  ;;  %12559 = vst [vmem:[#allocation243_spill] sm:$0xff] %v8828_v4  ;;  %v746_v27 = vadd.f32 1e-05, %v730_v46  ;;  %5731 = vmatpush1.bf16.msra.mxu1 %v8233_v55  ;;  %v8837_v47 = vsub.f32 %v8768_v59, %v12561_v31  ;;  %v775_v13 = vmul.f32 %v6750_v26, %v12567_v36  ;;  %v711_v46 = vpop.xlane.xlu1 %710  ;;  %v12568_v55 = vand.u32 4294901760, %v8820_v61 }
 0x23b   : > { %v8842_v6 = vsub.f32 %v8779_v21, %v12563_v33  ;;  %2388 = vmatmul.mubr.f32.gmra.mrb[10].mxu0 %v8828_v4  ;;  %v820_v31 = vadd.f32 %v8621_v52, %v797_v51  ;;  %v8853_v59 = vsub.f32 %v819_v7, %v8828_v4  ;;  %v731_v33 = vmul.f32 0.0078125, %v711_v46  ;;  %v12570_v21 = vld [vmem:[#allocation159_spill] sm:$0xff]  ;;  %5733 = vmatprep.subr.bf16.mxu1 %v8405_v16 }
 0x23c   : > { %12562 = vst [vmem:[#allocation158_spill] sm:$0xff] %v8837_v47  ;;  %v1018_v2 = vsub.f32 %v8820_v61, %v12568_v55  ;;  %6755 = vrsqrt.f32 %v746_v27  ;;  %5967 = vmatpush1.bf16.msra.mxu0 %v12570_v21  ;;  %v8859_v26 = vsub.f32 %v8788_v44, %v12571_v3  ;;  %v12573_v36 = vand.u32 4294901760, %v8803_v15  ;;  %2393 = vmatprep.mubr.f32.mxu0 %v12524_v58  ;;  %v12578_v3 = vld [vmem:[#allocation172_spill] sm:$0xff]  ;;  %v12588_v44 = vld [vmem:[#allocation190_spill] sm:$0xff]  ;;  %v12591_v61 = vld [vmem:[#allocation165_spill] sm:$0xff] }
 0x23d   : > { %12564 = vst [vmem:[#allocation244_spill] sm:$0xff] %v8842_v6  ;;  %12569 = vst [vmem:[#allocation82_spill] sm:$0xff] %v8853_v59  ;;  %1009 = vmatmul.mubr.f32.gmra.mrb[6].mxu1 %v1008_v18  ;;  %v8868_v51 = vand.u32 4294901760, %v820_v31  ;;  %v11902_v18 = vand.u32 4294901760, %v8853_v59  ;;  %v798_v21 = vmul.f32 %v8607_v23, %v775_v13  ;;  %v6752_v27 = vpop.eup %6751  ;;  %v747_v46 = vadd.f32 1e-05, %v731_v33  ;;  %5969 = vmatprep.subr.bf16.mxu0 %v8247_v0 }
 0x23e   : > { %12572 = vst [vmem:[#allocation61_spill] sm:$0xff] %v8859_v26  ;;  %v8864_v28 = vsub.f32 %v8803_v15, %v12573_v36  ;;  %1014 = vmatprep.mubr.f32.mxu1 %v12524_v58  ;;  %v1019_v7 = vand.u32 4294901760, %v1018_v2  ;;  %v12576_v36 = vld [vmem:[#allocation67_spill] sm:$0xff]  ;;  %v713_v13 = vpop.xlane.xlu1 %712  ;;  %5735 = vmatpush1.bf16.msra.mxu1 %v8407_v22 }
 0x23f   : > { %12575 = vst [vmem:[#allocation245_spill] sm:$0xff] %v8868_v51  ;;  %v776_v15 = vmul.f32 %v6752_v27, %v12576_v36  ;;  %2395 = vmatmul.mubr.f32.gmra.mrb[12].mxu0 %v8868_v51  ;;  %v1029_v0 = vsub.f32 %v8853_v59, %v11902_v18  ;;  %v821_v16 = vadd.f32 %v8621_v52, %v798_v21  ;;  %6757 = vrsqrt.f32 %v747_v46  ;;  %v12581_v27 = vld [vmem:[#allocation86_spill] sm:$0xff]  ;;  %v12582_v2 = vld [vmem:[#allocation87_spill] sm:$0xff]  ;;  %v12583_v59 = vld [vmem:[#allocation89_spill] sm:$0xff] }
 0x240   : > { %12574 = vst [vmem:[#allocation159_spill] sm:$0xff] %v8864_v28  ;;  %v8887_v33 = vsub.f32 %v820_v31, %v8868_v51  ;;  %v732_v55 = vmul.f32 0.0078125, %v713_v13  ;;  %5971 = vmatpush1.bf16.msra.mxu0 %v12578_v3  ;;  %2400 = vmatprep.mubr.f32.mxu0 %v12524_v58  ;;  %v12580_v3 = vld [vmem:[#allocation175_spill] sm:$0xff] }
 0x241   : > { %1020 = vmatmul.mubr.f32.gmra.mrb[8].mxu1 %v1019_v7  ;;  %v1030_v18 = vand.u32 4294901760, %v1029_v0  ;;  %v8896_v21 = vand.u32 4294901760, %v821_v16  ;;  %v799_v7 = vmul.f32 %v8607_v23, %v776_v15  ;;  %v6754_v46 = vpop.eup %6753  ;;  %5973 = vmatprep.subr.bf16.mxu0 %v12580_v3  ;;  %v12584_v0 = vld [vmem:[#allocation90_spill] sm:$0xff]  ;;  %v715_v31 = vpop.xlane.xlu0 %714 }
 0x242   : > { %12577 = vst [vmem:[#allocation67_spill] sm:$0xff] %v8887_v33  ;;  %1025 = vmatprep.mubr.f32.mxu1 %v12524_v58  ;;  %v748_v13 = vadd.f32 1e-05, %v732_v55  ;;  %v777_v9 = vmul.f32 %v6754_v46, %v12585_v38  ;;  %v12586_v15 = vand.u32 4294901760, %v8887_v33  ;;  %v733_v36 = vmul.f32 0.0078125, %v715_v31  ;;  %5737 = vmatprep.subr.bf16.mxu1 %v12591_v61 }
 0x243   : > { %12579 = vst [vmem:[#allocation172_spill] sm:$0xff] %v8896_v21  ;;  %2402 = vmatmul.mubr.f32.gmra.mrb[14].mxu0 %v8896_v21  ;;  %v822_v22 = vadd.f32 %v8621_v52, %v799_v7  ;;  %v8915_v3 = vsub.f32 %v821_v16, %v8896_v21  ;;  %v12594_v46 = vand.u32 4294901760, %v8710_v41 }
 0x244   : > { %v1040_v55 = vsub.f32 %v8887_v33, %v12586_v15  ;;  %6759 = vrsqrt.f32 %v748_v13  ;;  %5975 = vmatpush1.bf16.msra.mxu0 %v12588_v44  ;;  %2407 = vmatprep.mubr.f32.mxu0 %v12524_v58  ;;  %v800_v31 = vmul.f32 %v8607_v23, %v777_v9  ;;  %v749_v13 = vadd.f32 1e-05, %v733_v36  ;;  %v12590_v44 = vld [vmem:[#allocation191_spill] sm:$0xff]  ;;  %v12592_v33 = vld [vmem:[#allocation80_spill] sm:$0xff] }
 0x245   : > { %12587 = vst [vmem:[#allocation175_spill] sm:$0xff] %v8915_v3  ;;  %1031 = vmatmul.mubr.f32.gmra.mrb[10].mxu1 %v1030_v18  ;;  %v8924_v7 = vand.u32 4294901760, %v822_v22  ;;  %v11916_v16 = vand.u32 4294901760, %v8915_v3  ;;  %5977 = vmatprep.subr.bf16.mxu0 %v12590_v44  ;;  %v717_v9 = vpop.xlane.xlu1 %716 }
 0x246   : > { %1036 = vmatprep.mubr.f32.mxu1 %v12524_v58  ;;  %v1041_v15 = vand.u32 4294901760, %v1040_v55  ;;  %v6756_v18 = vpop.eup %6755  ;;  %v823_v61 = vadd.f32 %v8621_v52, %v800_v31  ;;  %6761 = vrsqrt.f32 %v749_v13  ;;  %v734_v38 = vmul.f32 0.0078125, %v717_v9  ;;  %v12596_v9 = vld [vmem:[#allocation168_spill] sm:$0xff] }
 0x247   : > { %12589 = vst [vmem:[#allocation74_spill] sm:$0xff] %v8924_v7  ;;  %v778_v11 = vmul.f32 %v6756_v18, %v12592_v33  ;;  %2409 = vmatmul.mubr.f32.gmra.mrb[16].mxu0 %v8924_v7  ;;  %v1051_v36 = vsub.f32 %v8915_v3, %v11916_v16  ;;  %v8943_v44 = vsub.f32 %v822_v22, %v8924_v7  ;;  %v12598_v18 = vand.u32 4294901760, %v8550_v19 }
 0x248   : > { %5979 = vmatpush1.bf16.msra.mxu0 %v8534_v20  ;;  %v3415_v33 = vsub.f32 %v8710_v41, %v12594_v46  ;;  %2414 = vmatprep.mubr.f32.mxu0 %v12524_v58  ;;  %v8953_v16 = vand.u32 4294901760, %v823_v61  ;;  %v750_v20 = vadd.f32 1e-05, %v734_v38  ;;  %v12597_v46 = vand.u32 4294901760, %v8545_v35 }
 0x249   : > { %12593 = vst [vmem:[#allocation190_spill] sm:$0xff] %v8943_v44  ;;  %1042 = vmatmul.mubr.f32.gmra.mrb[12].mxu1 %v1041_v15  ;;  %v1052_v31 = vand.u32 4294901760, %v1051_v36  ;;  %v801_v15 = vmul.f32 %v8607_v23, %v778_v11  ;;  %v6758_v13 = vpop.eup %6757  ;;  %5981 = vmatprep.subr.bf16.mxu0 %v8556_v53  ;;  %v12599_v3 = vand.u32 4294901760, %v8612_v14  ;;  %v12600_v36 = vand.u32 4294901760, %v8626_v34  ;;  %v12603_v53 = vld [vmem:[#allocation83_spill] sm:$0xff] }
 0x24a   : > { %1047 = vmatprep.mubr.f32.mxu1 %v12524_v58  ;;  %12595 = vst [vmem:[#allocation191_spill] sm:$0xff] %v8953_v16  ;;  %5739 = vmatpush1.bf16.msra.mxu1 %v12596_v9  ;;  %v5990_v55 = vpack.c.bf16 %v12598_v18, %v12597_v46  ;;  %v12601_v22 = vand.u32 4294901760, %v8645_v37  ;;  %v12602_v11 = vand.u32 4294901760, %v8650_v57  ;;  %v779_v25 = vmul.f32 %v6758_v13, %v12603_v53  ;;  %v719_v9 = vpop.xlane.xlu0 %718  ;;  %v12606_v57 = vld [vmem:[#allocation210_spill] sm:$0xff] }
 0x24b   : > { %v8967_v41 = vpack.c.bf16 %v12600_v36, %v12599_v3  ;;  %2416 = vmatmul.mubr.f32.gmra.mrb[18].mxu0 %v8953_v16  ;;  %v12604_v35 = vand.u32 4294901760, %v8943_v44  ;;  %v824_v14 = vadd.f32 %v8621_v52, %v801_v15  ;;  %v8982_v34 = vsub.f32 %v823_v61, %v8953_v16 }
 0x24c   : > { %v8973_v38 = vpack.c.bf16 %v12602_v11, %v12601_v22  ;;  %6763 = vrsqrt.f32 %v750_v20  ;;  %v735_v37 = vmul.f32 0.0078125, %v719_v9  ;;  %5983 = vmatpush1.bf16.msra.mxu0 %v12606_v57  ;;  %v3404_v3 = vand.u32 4294901760, %v8735_v10  ;;  %2421 = vmatprep.mubr.f32.mxu0 %v12524_v58  ;;  %v12610_v11 = vld [vmem:[#allocation211_spill] sm:$0xff]  ;;  %v12613_v57 = vld [vmem:[#allocation20_spill] sm:$0xff] }
 0x24d   : > { %v1062_v19 = vsub.f32 %v8943_v44, %v12604_v35  ;;  %12605 = vst [vmem:[#allocation165_spill] sm:$0xff] %v8982_v34  ;;  %1053 = vmatmul.mubr.f32.gmra.mrb[14].mxu1 %v1052_v31  ;;  %v3416_v18 = vand.u32 4294901760, %v3415_v33  ;;  %v8988_v13 = vand.u32 4294901760, %v824_v14  ;;  %v11923_v15 = vand.u32 4294901760, %v8982_v34  ;;  %5985 = vmatprep.subr.bf16.mxu0 %v12610_v11  ;;  %v12611_v33 = vld [vmem:[#allocation188_spill] sm:$0xff] }
 0x24e   : > { %1058 = vmatprep.mubr.f32.mxu1 %v12524_v58  ;;  %v12608_v61 = vand.u32 4294901760, %v8700_v24  ;;  %v12609_v20 = vand.u32 4294901760, %v8705_v49  ;;  %v6760_v31 = vpop.eup %6759  ;;  %v751_v36 = vadd.f32 1e-05, %v735_v37  ;;  %v802_v10 = vmul.f32 %v8607_v23, %v779_v25  ;;  %5741 = vmatprep.subr.bf16.mxu1 %v12611_v33  ;;  %v12612_v35 = vld [vmem:[#allocation88_spill] sm:$0xff]  ;;  %v12616_v25 = vld [vmem:[#allocation189_spill] sm:$0xff] }
 0x24f   : > { %v1063_v22 = vand.u32 4294901760, %v1062_v19  ;;  %12607 = vst [vmem:[#allocation80_spill] sm:$0xff] %v8988_v13  ;;  %v11925_v53 = vand.u32 4294901760, %v8756_v5  ;;  %v11924_v9 = vand.u32 4294901760, %v8766_v50  ;;  %v780_v19 = vmul.f32 %v6760_v31, %v12612_v35  ;;  %2423 = vmatmul.mubr.f32.gmra.mrb[20].mxu0 %v8988_v13  ;;  %5743 = vmatpush1.bf16.msra.mxu1 %v12616_v25  ;;  %v12618_v25 = vld [vmem:[#allocation217_spill] sm:$0xff]  ;;  %v12622_v31 = vld [vmem:[#allocation207_spill] sm:$0xff] }
 0x250   : > { %v8995_v46 = vpack.c.bf16 %v12609_v20, %v12608_v61  ;;  %v9004_v24 = vsub.s32 1, %v12613_v57  ;;  %v1073_v49 = vsub.f32 %v8982_v34, %v11923_v15  ;;  %v9011_v37 = vsub.f32 %v824_v14, %v8988_v13  ;;  %v12617_v61 = vld [vmem:[#allocation212_spill] sm:$0xff]  ;;  %2428 = vmatprep.mubr.f32.mxu0 %v12524_v58  ;;  %v12620_v15 = vld [vmem:[#allocation93_spill] sm:$0xff] }
 0x251   : > { %6765 = vrsqrt.f32 %v751_v36  ;;  %1064 = vmatmul.mubr.f32.gmra.mrb[16].mxu1 %v1063_v22  ;;  %5987 = vmatpush1.bf16.msra.mxu0 %v12617_v61  ;;  %v9015_v20 = vpack.c.bf16 %v3416_v18, %v3404_v3  ;;  %v825_v14 = vadd.f32 %v8621_v52, %v802_v10  ;;  %v803_v36 = vmul.f32 %v8607_v23, %v780_v19  ;;  %v6762_v22 = vpop.eup %6761  ;;  %v12619_v3 = vld [vmem:[#allocation204_spill] sm:$0xff] }
 0x252   : > { %12614 = vst [vmem:[#allocation168_spill] sm:$0xff] %v9004_v24  ;;  %12615 = vst [vmem:[#allocation83_spill] sm:$0xff] %v9011_v37  ;;  %1069 = vmatprep.mubr.f32.mxu1 %v12524_v58  ;;  %v1074_v33 = vand.u32 4294901760, %v1073_v49  ;;  %v11926_v35 = vand.u32 4294901760, %v9011_v37  ;;  %5989 = vmatprep.subr.bf16.mxu0 %v12618_v25  ;;  %v3421_v18 = vsub.f32 %v8756_v5, %v11925_v53  ;;  %v12624_v10 = vand.u32 4294901760, %v8810_v63  ;;  %v12629_v34 = vld [vmem:[#allocation96_spill] sm:$0xff] }
 0x253   : > { %5745 = vmatprep.subr.bf16.mxu1 %v12619_v3  ;;  %v3433_v61 = vsub.f32 %v8766_v50, %v11924_v9  ;;  %v781_v11 = vmul.f32 %v6762_v22, %v12620_v15  ;;  %v9035_v19 = vand.u32 4294901760, %v825_v14  ;;  %v826_v3 = vadd.f32 %v8621_v52, %v803_v36 }
 0x254   : > { %v1084_v25 = vsub.f32 %v9011_v37, %v11926_v35  ;;  %5747 = vmatpush1.bf16.msra.mxu1 %v12622_v31  ;;  %v12623_v9 = vand.u32 4294901760, %v8777_v48  ;;  %v3439_v15 = vsub.f32 %v8810_v63, %v12624_v10  ;;  %v3422_v10 = vand.u32 4294901760, %v3421_v18 }
 0x255   : > { %12621 = vst [vmem:[#allocation210_spill] sm:$0xff] %v9035_v19  ;;  %1075 = vmatmul.mubr.f32.gmra.mrb[18].mxu1 %v1074_v33  ;;  %5991 = vmatpush1.bf16.msra.mxu0 %v5990_v55  ;;  %v9052_v31 = vand.u32 4294901760, %v826_v3  ;;  %v9055_v55 = vsub.f32 %v825_v14, %v9035_v19  ;;  %v3434_v35 = vand.u32 4294901760, %v3433_v61  ;;  %v12627_v49 = vand.u32 4294901760, %v8837_v47 }
 0x256   : > { %v3427_v53 = vsub.f32 %v8777_v48, %v12623_v9  ;;  %2430 = vmatmul.mubr.f32.gmra.mrb[22].mxu0 %v9035_v19  ;;  %1080 = vmatprep.mubr.f32.mxu1 %v12524_v58  ;;  %v1085_v36 = vand.u32 4294901760, %v1084_v25  ;;  %v804_v9 = vmul.f32 %v8607_v23, %v781_v11  ;;  %v6764_v33 = vpop.eup %6763  ;;  %v12628_v25 = vand.u32 4294901760, %v8842_v6 }
 0x257   : > { %12625 = vst [vmem:[#allocation211_spill] sm:$0xff] %v9052_v31  ;;  %12626 = vst [vmem:[#allocation188_spill] sm:$0xff] %v9055_v55  ;;  %2435 = vmatprep.mubr.f32.mxu0 %v12524_v58  ;;  %5993 = vmatprep.subr.bf16.mxu0 %v8967_v41  ;;  %v3445_v22 = vsub.f32 %v8837_v47, %v12627_v49  ;;  %v782_v14 = vmul.f32 %v6764_v33, %v12629_v34  ;;  %v11941_v44 = vand.u32 4294901760, %v9055_v55  ;;  %v12630_v41 = vld [vmem:[#allocation221_spill] sm:$0xff] }
 0x258   : > { %v3457_v37 = vsub.f32 %v8842_v6, %v12628_v25  ;;  %v827_v11 = vadd.f32 %v8621_v52, %v804_v9  ;;  %v9070_v48 = vsub.f32 %v826_v3, %v9052_v31  ;;  %5749 = vmatprep.subr.bf16.mxu1 %v12630_v41  ;;  %v3428_v18 = vand.u32 4294901760, %v3427_v53  ;;  %v9089_v9 = vpop.permute.xlu1 %2482 }
 0x259   : > { %1086 = vmatmul.mubr.f32.gmra.mrb[20].mxu1 %v1085_v36  ;;  %5995 = vmatpush1.bf16.msra.mxu0 %v8973_v38  ;;  %v3440_v61 = vand.u32 4294901760, %v3439_v15  ;;  %v12631_v49 = vand.u32 4294901760, %v8859_v26  ;;  %v12632_v34 = vand.u32 4294901760, %v8864_v28  ;;  %v1095_v3 = vsub.f32 %v9055_v55, %v11941_v44  ;;  %12634 = vst [vmem:[#allocation20_spill] sm:$0xff] %v9089_v9  ;;  %v12637_v44 = vld [vmem:[#allocation103_spill] sm:$0xff] }
 0x25a   : > { %2437 = vmatmul.mubr.f32.gmra.mrb[24].mxu0 %v9052_v31  ;;  %1091 = vmatprep.mubr.f32.mxu1 %v12524_v58  ;;  %v9085_v36 = vand.u32 4294901760, %v827_v11  ;;  %v805_v53 = vmul.f32 %v8607_v23, %v782_v14  ;;  %v6000_v41 = vpack.c.bf16 %v3434_v35, %v3422_v10  ;;  %v2480_v38 = vld [vmem:[%s11558_s3] sm:$0x3]  ;;  %v12638_v6 = vand.u32 4294901760, %v9070_v48 }
 0x25b   : > { %v3451_v25 = vsub.f32 %v8859_v26, %v12631_v49  ;;  %v3463_v33 = vsub.f32 %v8864_v28, %v12632_v34  ;;  %v6766_v15 = vpop.eup %6765  ;;  %2442 = vmatprep.mubr.f32.mxu0 %v12524_v58  ;;  %5997 = vmatprep.subr.bf16.mxu0 %v8995_v46  ;;  %v3446_v49 = vand.u32 4294901760, %v3445_v22  ;;  %v3458_v34 = vand.u32 4294901760, %v3457_v37  ;;  %v12635_v26 = vld [vmem:[#allocation38_spill] sm:$0xff]  ;;  %v12636_v28 = vld [vmem:[#allocation39_spill] sm:$0xff] }
 0x25c   : > { %12633 = vst [vmem:[#allocation88_spill] sm:$0xff] %v9085_v36  ;;  %v5752_v47 = vpack.c.bf16 %v12636_v28, %v12635_v26  ;;  %v783_v55 = vmul.f32 %v6766_v15, %v12637_v44  ;;  %v1096_v14 = vand.u32 4294901760, %v1095_v3  ;;  %v1106_v63 = vsub.f32 %v9070_v48, %v12638_v6  ;;  %v12639_v46 = vld [vmem:[#allocation226_spill] sm:$0xff] }
 0x25d   : > { %v828_v31 = vadd.f32 %v8621_v52, %v805_v53  ;;  %5751 = vmatpush1.bf16.msra.mxu1 %v12639_v46  ;;  %5999 = vmatpush1.bf16.msra.mxu0 %v9015_v20  ;;  %v6002_v37 = vpack.c.bf16 %v3440_v61, %v3428_v18  ;;  %v9106_v35 = vsub.f32 %v827_v11, %v9085_v36  ;;  %v3452_v44 = vand.u32 4294901760, %v3451_v25 }
 0x25e   : > { %v3464_v22 = vand.u32 4294901760, %v3463_v33  ;;  %1097 = vmatmul.mubr.f32.gmra.mrb[22].mxu1 %v1096_v14  ;;  %2444 = vmatmul.mubr.f32.gmra.mrb[26].mxu0 %v9085_v36  ;;  %v1107_v10 = vand.u32 4294901760, %v1106_v63  ;;  %v806_v6 = vmul.f32 %v8607_v23, %v783_v55  ;;  %v9113_v53 = vsub.s32 0, %v12613_v57  ;;  %v9125_v23 = vpop.permute.xlu1 %2488  ;;  %v12646_v33 = vld [vmem:[#allocation66_spill] sm:$0xff] }
 0x25f   : > { %v9109_v3 = vand.u32 4294901760, %v828_v31  ;;  %v9116_v15 = vrot.slane %v2480_v38, %v9004_v24  ;;  %1102 = vmatprep.mubr.f32.mxu1 %v12524_v58  ;;  %2449 = vmatprep.mubr.f32.mxu0 %v12524_v58  ;;  %v11952_v20 = vand.u32 4294901760, %v9106_v35  ;;  %v6004_v63 = vpack.c.bf16 %v3458_v34, %v3446_v49  ;;  %12644 = vst [vmem:[#allocation93_spill] sm:$0xff] %v9125_v23 }
 0x260   : > { %12641 = vst [vmem:[#allocation212_spill] sm:$0xff] %v9113_v53  ;;  %6001 = vmatprep.subr.bf16.mxu0 %v6000_v41  ;;  %v829_v11 = vadd.f32 %v8621_v52, %v806_v6  ;;  %5753 = vmatprep.subr.bf16.mxu1 %v5752_v47  ;;  %v6006_v55 = vpack.c.bf16 %v3464_v22, %v3452_v44  ;;  %v12647_v41 = vld [vmem:[#allocation73_spill] sm:$0xff]  ;;  %v12650_v44 = vld [vmem:[#allocation106_spill] sm:$0xff]  ;;  %v9162_v6 = vpop.permute.xlu0 %2485 }
 0x261   : > { %12640 = vst [vmem:[#allocation189_spill] sm:$0xff] %v9109_v3  ;;  %12642 = vst [vmem:[#allocation217_spill] sm:$0xff] %v9116_v15  ;;  %v9123_v18 = vsub.f32 %v828_v31, %v9109_v3  ;;  %6003 = vmatpush1.bf16.msra.mxu0 %v6002_v37  ;;  %v1117_v57 = vsub.f32 %v9106_v35, %v11952_v20  ;;  %v9135_v25 = vrot.slane %v2480_v38, %v9113_v53  ;;  %v11961_v37 = vmov 1.0   ;;  %v12651_v22 = vld [vmem:[#allocation109_spill] sm:$0xff]  ;;  %v12663_v53 = vld [vmem:[#allocation118_spill] sm:$0xff] }
 0x262   : > { %1108 = vmatmul.mubr.f32.gmra.mrb[24].mxu1 %v1107_v10  ;;  %2451 = vmatmul.mubr.f32.gmra.mrb[28].mxu0 %v9109_v3  ;;  %v9131_v61 = vand.u32 4294901760, %v829_v11  ;;  %vm2538_vm0 = vcmp.eq.s32.totalorder %v9089_v9, %v9116_v15  ;;  %v6008_v49 = vpack.c.bf16 %v12647_v41, %v12646_v33  ;;  %v9153_v46 = vpop.permute.xlu1 %2491  ;;  %v6010_v10 = vpack.c.bf16 %v12651_v22, %v12650_v44  ;;  %v12687_v22 = vld [vmem:[#allocation71_spill] sm:$0xff]  ;;  %v12688_v44 = vld [vmem:[#allocation72_spill] sm:$0xff] }
 0x263   : > { %12643 = vst [vmem:[#allocation204_spill] sm:$0xff] %v9123_v18  ;;  %v11951_v52 = vand.u32 4294901760, %v9123_v18  ;;  %1113 = vmatprep.mubr.f32.mxu1 %v12524_v58  ;;  %2456 = vmatprep.mubr.f32.mxu0 %v12524_v58  ;;  %v1118_v47 = vand.u32 4294901760, %v1117_v57  ;;  %vm2537_vm1 = vcmp.eq.s32.totalorder %v9089_v9, %v9135_v25  ;;  %12649 = vst [vmem:[#allocation221_spill] sm:$0xff] %v9153_v46  ;;  %v12654_v57 = vld [vmem:[#allocation111_spill] sm:$0xff] }
 0x264   : > { %12645 = vst [vmem:[#allocation207_spill] sm:$0xff] %v9131_v61  ;;  %6005 = vmatprep.subr.bf16.mxu0 %v6004_v63  ;;  %v9147_v34 = vsub.f32 %v829_v11, %v9131_v61  ;;  %12652 = vst [vmem:[#allocation38_spill] sm:$0xff] %v9162_v6  ;;  %v12653_v63 = vld [vmem:[#allocation110_spill] sm:$0xff]  ;;  %vm2540_vm2 = vcmp.eq.s32.totalorder %v9162_v6, %v9116_v15  ;;  %vm2539_vm3 = vcmp.eq.s32.totalorder %v9162_v6, %v9135_v25 }
 0x265   : > { %v1128_v31 = vsub.f32 %v9123_v18, %v11951_v52  ;;  %6007 = vmatpush1.bf16.msra.mxu0 %v6006_v55  ;;  %v6012_v55 = vpack.c.bf16 %v12654_v57, %v12653_v63  ;;  %v12658_v52 = vld [vmem:[#allocation115_spill] sm:$0xff]  ;;  %vm2542_vm4 = vcmp.eq.s32.totalorder %v9125_v23, %v9116_v15  ;;  %vm2541_vm5 = vcmp.eq.s32.totalorder %v9125_v23, %v9135_v25  ;;  %v12667_v18 = vld [vmem:[#allocation45_spill] sm:$0xff]  ;;  %v12668_v57 = vld [vmem:[#allocation224_spill] sm:$0xff] }
 0x266   : > { %12648 = vst [vmem:[#allocation96_spill] sm:$0xff] %v9147_v34  ;;  %1119 = vmatmul.mubr.f32.gmra.mrb[26].mxu1 %v1118_v47  ;;  %2458 = vmatmul.mubr.f32.gmra.mrb[30].mxu0 %v9131_v61  ;;  %v11950_v14 = vand.u32 4294901760, %v9147_v34  ;;  %vm2544_vm6 = vcmp.eq.s32.totalorder %v9153_v46, %v9116_v15  ;;  %vm2543_vm7 = vcmp.eq.s32.totalorder %v9153_v46, %v9135_v25  ;;  %v12677_v63 = vld [vmem:[#allocation51_spill] sm:$0xff] }
 0x267   : > { %v1129_v38 = vand.u32 4294901760, %v1128_v31  ;;  %1124 = vmatprep.mubr.f32.mxu1 %v12524_v58  ;;  %5584 = vmatprep.mubr.msk.f32.mxu0 %vm2538_vm0, %v11961_v37  ;;  %v12655_v31 = vld [vmem:[#allocation112_spill] sm:$0xff]  ;;  %v12806_v46 = vld [vmem:[#allocation127_spill] sm:$0xff] }
 0x268   : > { %6009 = vmatprep.subr.bf16.mxu0 %v6008_v49  ;;  %v1139_v11 = vsub.f32 %v9147_v34, %v11950_v14  ;;  %v12656_v49 = vld [vmem:[#allocation113_spill] sm:$0xff] }
 0x269   : > { %v6014_v14 = vpack.c.bf16 %v12656_v49, %v12655_v31  ;;  %v12666_v31 = vld [vmem:[#allocation44_spill] sm:$0xff] }
 0x26a   : > { %1130 = vmatmul.mubr.f32.gmra.mrb[28].mxu1 %v1129_v38  ;;  %5585 = vmatmul.mubr.msk.f32.vlgmr.msra.gmra.mrb[32].mxu0 %vm2537_vm1, %v11961_v37  ;;  %v1140_v47 = vand.u32 4294901760, %v1139_v11  ;;  %v12657_v38 = vld [vmem:[#allocation114_spill] sm:$0xff]  ;;  %v9188_v11 = vpop.permute.xlu1 %2494 }
 0x26b   : > { %6011 = vmatpush1.bf16.msra.mxu0 %v6010_v10  ;;  %1135 = vmatprep.mubr.f32.mxu1 %v12524_v58  ;;  %v6016_v20 = vpack.c.bf16 %v12658_v52, %v12657_v38  ;;  %12659 = vst [vmem:[#allocation39_spill] sm:$0xff] %v9188_v11  ;;  %v12660_v10 = vld [vmem:[#allocation40_spill] sm:$0xff]  ;;  %v12664_v52 = vld [vmem:[#allocation122_spill] sm:$0xff]  ;;  %v12665_v38 = vld [vmem:[#allocation123_spill] sm:$0xff]  ;;  %vm2546_vm8 = vcmp.eq.s32.totalorder %v9188_v11, %v9116_v15 }
 0x26c   : > { %5586 = vmatprep.mubr.msk.f32.mxu0 %vm2540_vm2, %v11961_v37  ;;  %6013 = vmatprep.subr.bf16.mxu0 %v6012_v55  ;;  %v12661_v55 = vld [vmem:[#allocation42_spill] sm:$0xff]  ;;  %v6020_v49 = vpack.c.bf16 %v12665_v38, %v12664_v52  ;;  %v12673_v52 = vld [vmem:[#allocation48_spill] sm:$0xff]  ;;  %vm2545_vm9 = vcmp.eq.s32.totalorder %v9188_v11, %v9135_v25 }
 0x26d   : > { %v5754_v24 = vpack.c.bf16 %v12661_v55, %v12660_v10  ;;  %v12676_v10 = vld [vmem:[#allocation49_spill] sm:$0xff] }
 0x26e   : > { %1141 = vmatmul.mubr.f32.gmra.mrb[30].mxu1 %v1140_v47  ;;  %5587 = vmatmul.mubr.msk.f32.gmra.mrb[34].mxu0 %vm2539_vm3, %v11961_v37  ;;  %v12662_v47 = vld [vmem:[#allocation117_spill] sm:$0xff] }
 0x26f   : > { %6015 = vmatpush1.bf16.msra.mxu0 %v6014_v14  ;;  %1371 = vmatprep.mubr.f32.mxu1 %v12524_v58  ;;  %v6018_v34 = vpack.c.bf16 %v12663_v53, %v12662_v47  ;;  %v5756_v14 = vpack.c.bf16 %v12667_v18, %v12666_v31  ;;  %v12670_v18 = vld [vmem:[#allocation125_spill] sm:$0xff]  ;;  %v12671_v31 = vld [vmem:[#allocation126_spill] sm:$0xff] }
 0x270   : > { %5588 = vmatprep.mubr.msk.f32.mxu0 %vm2542_vm4, %v11961_v37  ;;  %6017 = vmatprep.subr.bf16.mxu0 %v6016_v20  ;;  %v9216_v20 = vpop.permute.xlu1 %2497  ;;  %v6022_v38 = vpack.c.bf16 %v12671_v31, %v12670_v18  ;;  %v12675_v47 = vld [vmem:[#allocation137_spill] sm:$0xff]  ;;  %v12679_v31 = vmov 1.0  }
 0x271   : > { %12669 = vst [vmem:[#allocation103_spill] sm:$0xff] %v9216_v20  ;;  %vm2548_vm10 = vcmp.eq.s32.totalorder %v9216_v20, %v9116_v15  ;;  %vm12037_vm11 = vcmp.eq.s32.totalorder %v9216_v20, %v9135_v25  ;;  %v12832_v20 = vld [vmem:[#allocation144_spill] sm:$0xff] }
 0x272   : > { %1373 = vmatmul.mubr.f32.vlgmr.msra.gmra.mrb[0].mxu1 %v12668_v57  ;;  %5589 = vmatmul.mubr.msk.f32.gmra.mrb[36].mxu0 %vm2541_vm5, %v11961_v37  ;;  %v12672_v57 = vld [vmem:[#allocation47_spill] sm:$0xff] }
 0x273   : > { %5755 = vmatpush1.bf16.msra.mxu1 %v5754_v24  ;;  %5590 = vmatprep.mubr.msk.f32.mxu0 %vm2544_vm6, %v11961_v37  ;;  %v5758_v53 = vpack.c.bf16 %v12673_v52, %v12672_v57  ;;  %v12674_v24 = vld [vmem:[#allocation134_spill] sm:$0xff]  ;;  %v5760_v37 = vpack.c.bf16 %v12677_v63, %v12676_v10  ;;  %v12682_v10 = vld [vmem:[#allocation69_spill] sm:$0xff]  ;;  %v12685_v52 = vld [vmem:[#allocation140_spill] sm:$0xff] }
 0x274   : > { %6019 = vmatpush1.bf16.msra.mxu0 %v6018_v34  ;;  %1378 = vmatprep.mubr.f32.mxu1 %v12524_v58  ;;  %v6024_v55 = vpack.c.bf16 %v12675_v47, %v12674_v24  ;;  %v12678_v34 = vld [vmem:[#allocation227_spill] sm:$0xff]  ;;  %v12683_v47 = vld [vmem:[#allocation70_spill] sm:$0xff]  ;;  %v9251_v24 = vpop.permute.xlu1 %2500  ;;  %v12686_v57 = vld [vmem:[#allocation141_spill] sm:$0xff] }
 0x275   : > { %6021 = vmatprep.subr.bf16.mxu0 %v6020_v49  ;;  %5757 = vmatprep.subr.bf16.mxu1 %v5756_v14  ;;  %v12680_v49 = vld [vmem:[#allocation138_spill] sm:$0xff]  ;;  %v12681_v14 = vld [vmem:[#allocation139_spill] sm:$0xff]  ;;  %12684 = vst [vmem:[#allocation226_spill] sm:$0xff] %v9251_v24  ;;  %v6028_v18 = vpack.c.bf16 %v12686_v57, %v12685_v52  ;;  %vm12036_vm12 = vcmp.eq.s32.totalorder %v9251_v24, %v9116_v15 }
 0x276   : > { %1380 = vmatmul.mubr.f32.gmra.mrb[2].mxu1 %v12678_v34  ;;  %5591 = vmatmul.mubr.msk.f32.gmra.mrb[38].mxu0 %vm2543_vm7, %v12679_v31  ;;  %v6026_v63 = vpack.c.bf16 %v12681_v14, %v12680_v49  ;;  %v5762_v34 = vpack.c.bf16 %v12683_v47, %v12682_v10  ;;  %v12693_v47 = vld [vmem:[#allocation148_spill] sm:$0xff]  ;;  %v12694_v10 = vld [vmem:[#allocation149_spill] sm:$0xff]  ;;  %v12695_v52 = vld [vmem:[#allocation234_spill] sm:$0xff]  ;;  %vm11976_vm13 = vcmp.eq.s32.totalorder %v9251_v24, %v9135_v25 }
 0x277   : > { %5592 = vmatprep.mubr.msk.f32.mxu0 %vm2546_vm8, %v12679_v31  ;;  %1385 = vmatprep.mubr.f32.mxu1 %v12524_v58  ;;  %v6032_v57 = vpack.c.bf16 %v12694_v10, %v12693_v47  ;;  %v12701_v10 = vpack.c.bf16 %v7624_v39, %v7619_v45  ;;  %v12709_v39 = vpack.c.bf16 %v7658_v30, %v7653_v17 }
 0x278   : > { %6023 = vmatpush1.bf16.msra.mxu0 %v6022_v38  ;;  %5759 = vmatpush1.bf16.msra.mxu1 %v5758_v53  ;;  %v5764_v38 = vpack.c.bf16 %v12688_v44, %v12687_v22  ;;  %v12689_v53 = vld [vmem:[#allocation142_spill] sm:$0xff]  ;;  %v12691_v44 = vld [vmem:[#allocation76_spill] sm:$0xff]  ;;  %v12692_v22 = vld [vmem:[#allocation77_spill] sm:$0xff] }
 0x279   : > { %6025 = vmatprep.subr.bf16.mxu0 %v6024_v55  ;;  %5761 = vmatprep.subr.bf16.mxu1 %v5760_v37  ;;  %v12690_v37 = vld [vmem:[#allocation145_spill] sm:$0xff] }
 0x27a   : > { %1387 = vmatmul.mubr.f32.gmra.mrb[4].mxu1 %v8727_v43  ;;  %5593 = vmatmul.mubr.msk.f32.gmra.mrb[40].mxu0 %vm2545_vm9, %v12679_v31  ;;  %v6030_v55 = vpack.c.bf16 %v12690_v37, %v12689_v53  ;;  %v5766_v43 = vpack.c.bf16 %v12692_v22, %v12691_v44  ;;  %v12700_v22 = vld [vmem:[#allocation157_spill] sm:$0xff] }
 0x27b   : > { %5594 = vmatprep.mubr.msk.f32.mxu0 %vm2548_vm10, %v12679_v31  ;;  %1392 = vmatprep.mubr.f32.mxu1 %v12524_v58 }
 0x27c   : > { %6027 = vmatpush1.bf16.msra.mxu0 %v6026_v63  ;;  %5763 = vmatpush1.bf16.msra.mxu1 %v5762_v34  ;;  %v9284_v63 = vpop.permute.xlu1 %2503  ;;  %v12698_v34 = vld [vmem:[#allocation154_spill] sm:$0xff] }
 0x27d   : > { %6029 = vmatprep.subr.bf16.mxu0 %v6028_v18  ;;  %5765 = vmatprep.subr.bf16.mxu1 %v5764_v38  ;;  %12696 = vst [vmem:[#allocation66_spill] sm:$0xff] %v9284_v63  ;;  %v12697_v18 = vld [vmem:[#allocation153_spill] sm:$0xff]  ;;  %vm11966_vm14 = vcmp.eq.s32.totalorder %v9284_v63, %v9116_v15  ;;  %vm11968_vm15 = vcmp.eq.s32.totalorder %v9284_v63, %v9135_v25 }
 0x27e   : > { %1394 = vmatmul.mubr.f32.gmra.mrb[6].mxu1 %v12695_v52  ;;  %5595 = vmatmul.mubr.msk.f32.gmra.mrb[42].mxu0 %vm12037_vm11, %v12679_v31  ;;  %v6034_v38 = vpack.c.bf16 %v12698_v34, %v12697_v18  ;;  %v12699_v52 = vld [vmem:[#allocation156_spill] sm:$0xff]  ;;  %v12708_v34 = vld [vmem:[#allocation170_spill] sm:$0xff] }
 0x27f   : > { %5596 = vmatprep.mubr.msk.f32.mxu0 %vm12036_vm12, %v12679_v31  ;;  %1399 = vmatprep.mubr.f32.mxu1 %v12524_v58  ;;  %v6036_v44 = vpack.c.bf16 %v12700_v22, %v12699_v52  ;;  %v12707_v52 = vld [vmem:[#allocation169_spill] sm:$0xff] }
 0x280   : > { %6031 = vmatpush1.bf16.msra.mxu0 %v6030_v55  ;;  %5767 = vmatpush1.bf16.msra.mxu1 %v5766_v43  ;;  %v12702_v43 = vld [vmem:[#allocation160_spill] sm:$0xff]  ;;  %v12704_v55 = vld [vmem:[#allocation81_spill] sm:$0xff]  ;;  %v6040_v18 = vpack.c.bf16 %v12708_v34, %v12707_v52  ;;  %v12714_v34 = vld [vmem:[#allocation178_spill] sm:$0xff] }
 0x281   : > { %6033 = vmatprep.subr.bf16.mxu0 %v6032_v57  ;;  %5769 = vmatprep.subr.bf16.mxu1 %v12701_v10  ;;  %v12703_v57 = vld [vmem:[#allocation161_spill] sm:$0xff]  ;;  %v12705_v22 = vpack.c.bf16 %v12566_v56, %v12704_v55  ;;  %v12715_v52 = vld [vmem:[#allocation179_spill] sm:$0xff] }
 0x282   : > { %1401 = vmatmul.mubr.f32.gmra.mrb[8].mxu1 %v8798_v8  ;;  %5597 = vmatmul.mubr.msk.f32.gmra.mrb[44].mxu0 %vm11976_vm13, %v12679_v31  ;;  %v6038_v10 = vpack.c.bf16 %v12703_v57, %v12702_v43  ;;  %v9319_v8 = vpop.permute.xlu1 %2506  ;;  %v6044_v57 = vpack.c.bf16 %v12715_v52, %v12714_v34  ;;  %v12716_v43 = vpack.c.bf16 %v12582_v2, %v12581_v27  ;;  %v12721_v52 = vld [vmem:[#allocation192_spill] sm:$0xff]  ;;  %v12722_v34 = vld [vmem:[#allocation193_spill] sm:$0xff]  ;;  %v12850_v27 = vld [vmem:[#allocation58_spill] sm:$0xff] }
 0x283   : > { %5598 = vmatprep.mubr.msk.f32.mxu0 %vm11966_vm14, %v12679_v31  ;;  %1406 = vmatprep.mubr.f32.mxu1 %v12524_v58  ;;  %12706 = vst [vmem:[#allocation73_spill] sm:$0xff] %v9319_v8  ;;  %vm11969_vm14 = vcmp.eq.s32.totalorder %v9319_v8, %v9116_v15  ;;  %v12849_v2 = vld [vmem:[#allocation56_spill] sm:$0xff] }
 0x284   : > { %6035 = vmatpush1.bf16.msra.mxu0 %v6034_v38  ;;  %5771 = vmatpush1.bf16.msra.mxu1 %v12705_v22  ;;  %v12712_v38 = vpack.c.bf16 %v7677_v12, %v7672_v1  ;;  %v12864_v12 = vld [vmem:[#allocation59_spill] sm:$0xff]  ;;  %v12865_v1 = vld [vmem:[#allocation82_spill] sm:$0xff] }
 0x285   : > { %6037 = vmatprep.subr.bf16.mxu0 %v6036_v44  ;;  %5773 = vmatprep.subr.bf16.mxu1 %v12709_v39  ;;  %v12710_v44 = vld [vmem:[#allocation174_spill] sm:$0xff]  ;;  %v12711_v39 = vld [vmem:[#allocation177_spill] sm:$0xff] }
 0x286   : > { %1408 = vmatmul.mubr.f32.gmra.mrb[10].mxu1 %v8828_v4  ;;  %5599 = vmatmul.mubr.msk.f32.gmra.mrb[46].mxu0 %vm11968_vm15, %v12679_v31  ;;  %v6042_v22 = vpack.c.bf16 %v12711_v39, %v12710_v44  ;;  %v9343_v4 = vpop.permute.xlu0 %2509  ;;  %vm11971_vm15 = vcmp.eq.s32.totalorder %v9319_v8, %v9135_v25  ;;  %v6048_v39 = vpack.c.bf16 %v12722_v34, %v12721_v52  ;;  %v12728_v34 = vld [vmem:[#allocation198_spill] sm:$0xff]  ;;  %v12729_v52 = vld [vmem:[#allocation199_spill] sm:$0xff] }
 0x287   : > { %5600 = vmatprep.mubr.msk.f32.mxu0 %vm11969_vm14, %v12679_v31  ;;  %1413 = vmatprep.mubr.f32.mxu1 %v12524_v58  ;;  %12713 = vst [vmem:[#allocation138_spill] sm:$0xff] %v9343_v4  ;;  %vm11972_vm14 = vcmp.eq.s32.totalorder %v9343_v4, %v9116_v15  ;;  %v12723_v44 = vpack.c.bf16 %v7708_v32, %v7705_v54  ;;  %v12822_v54 = vld [vmem:[#allocation52_spill] sm:$0xff] }
 0x288   : > { %6039 = vmatpush1.bf16.msra.mxu0 %v6038_v10  ;;  %5775 = vmatpush1.bf16.msra.mxu1 %v12712_v38  ;;  %v9359_v10 = vpop.permute.xlu1 %2512 }
 0x289   : > { %6041 = vmatprep.subr.bf16.mxu0 %v6040_v18  ;;  %5777 = vmatprep.subr.bf16.mxu1 %v12716_v43  ;;  %12717 = vst [vmem:[#allocation139_spill] sm:$0xff] %v9359_v10  ;;  %v12718_v18 = vld [vmem:[#allocation180_spill] sm:$0xff]  ;;  %v12719_v43 = vld [vmem:[#allocation183_spill] sm:$0xff] }
 0x28a   : > { %1415 = vmatmul.mubr.f32.gmra.mrb[12].mxu1 %v8868_v51  ;;  %5601 = vmatmul.mubr.msk.f32.gmra.mrb[48].mxu0 %vm11971_vm15, %v12679_v31  ;;  %v6046_v38 = vpack.c.bf16 %v12719_v43, %v12718_v18  ;;  %v12720_v51 = vpack.c.bf16 %v12584_v0, %v12583_v59  ;;  %vm11974_vm15 = vcmp.eq.s32.totalorder %v9343_v4, %v9135_v25  ;;  %v12730_v18 = vld [vmem:[#allocation37_spill] sm:$0xff]  ;;  %v12835_v59 = vld [vmem:[#allocation55_spill] sm:$0xff] }
 0x28b   : > { %5602 = vmatprep.mubr.msk.f32.mxu0 %vm11972_vm14, %v12679_v31  ;;  %1420 = vmatprep.mubr.f32.mxu1 %v12524_v58  ;;  %vm11975_vm14 = vcmp.eq.s32.totalorder %v9359_v10, %v9116_v15  ;;  %v6052_v43 = vpack.c.bf16 %v12729_v52, %v12728_v34 }
 0x28c   : > { %6043 = vmatpush1.bf16.msra.mxu0 %v6042_v22  ;;  %5779 = vmatpush1.bf16.msra.mxu1 %v12720_v51  ;;  %v12724_v51 = vld [vmem:[#allocation196_spill] sm:$0xff]  ;;  %v12726_v22 = vpack.c.bf16 %v7719_v40, %v7716_v62  ;;  %v12809_v40 = vld [vmem:[#allocation231_spill] sm:$0xff] }
 0x28d   : > { %6045 = vmatprep.subr.bf16.mxu0 %v6044_v57  ;;  %5781 = vmatprep.subr.bf16.mxu1 %v12723_v44  ;;  %v12725_v57 = vld [vmem:[#allocation197_spill] sm:$0xff] }
 0x28e   : > { %1422 = vmatmul.mubr.f32.gmra.mrb[14].mxu1 %v8896_v21  ;;  %5603 = vmatmul.mubr.msk.f32.gmra.mrb[50].mxu0 %vm11974_vm15, %v12679_v31  ;;  %v6050_v44 = vpack.c.bf16 %v12725_v57, %v12724_v51  ;;  %v9395_v21 = vpop.permute.xlu0 %2515  ;;  %vm11977_vm15 = vcmp.eq.s32.totalorder %v9359_v10, %v9135_v25 }
 0x28f   : > { %5604 = vmatprep.mubr.msk.f32.mxu0 %vm11975_vm14, %v12679_v31  ;;  %1427 = vmatprep.mubr.f32.mxu1 %v12524_v58  ;;  %12727 = vst [vmem:[#allocation142_spill] sm:$0xff] %v9395_v21  ;;  %vm11978_vm14 = vcmp.eq.s32.totalorder %v9395_v21, %v9116_v15  ;;  %vm11979_vm13 = vcmp.eq.s32.totalorder %v9395_v21, %v9135_v25 }
 0x290   : > { %6047 = vmatpush1.bf16.msra.mxu0 %v6046_v38  ;;  %5783 = vmatpush1.bf16.msra.mxu1 %v12726_v22  ;;  %v9409_v38 = vpop.permute.xlu1 %2518 }
 0x291   : > { %6049 = vmatprep.subr.bf16.mxu0 %v6048_v39  ;;  %5785 = vmatprep.subr.bf16.mxu1 %v12730_v18  ;;  %12731 = vst [vmem:[#allocation145_spill] sm:$0xff] %v9409_v38  ;;  %v12732_v39 = vld [vmem:[#allocation200_spill] sm:$0xff]  ;;  %v12733_v18 = vld [vmem:[#allocation201_spill] sm:$0xff] }
 0x292   : > { %1429 = vmatmul.mubr.f32.gmra.mrb[16].mxu1 %v8924_v7  ;;  %5605 = vmatmul.mubr.msk.f32.gmra.mrb[52].mxu0 %vm11977_vm15, %v12679_v31  ;;  %v6054_v22 = vpack.c.bf16 %v12733_v18, %v12732_v39  ;;  %vm11981_vm15 = vcmp.eq.s32.totalorder %v9409_v38, %v9116_v15  ;;  %v12740_v7 = vld [vmem:[#allocation219_spill] sm:$0xff]  ;;  %v12757_v39 = vld [vmem:[#allocation64_spill] sm:$0xff] }
 0x293   : > { %5606 = vmatprep.mubr.msk.f32.mxu0 %vm11978_vm14, %v12679_v31  ;;  %1434 = vmatprep.mubr.f32.mxu1 %v12524_v58  ;;  %vm11985_vm14 = vcmp.eq.s32.totalorder %v9409_v38, %v9135_v25  ;;  %v12758_v52 = vand.u32 4294901760, %v12757_v39  ;;  %v12760_v39 = vld [vmem:[#allocation159_spill] sm:$0xff] }
 0x294   : > { %6051 = vmatpush1.bf16.msra.mxu0 %v6050_v44  ;;  %v9432_v44 = vpop.permute.xlu0 %2521 }
 0x295   : > { %6053 = vmatprep.subr.bf16.mxu0 %v6052_v43  ;;  %12734 = vst [vmem:[#allocation148_spill] sm:$0xff] %v9432_v44  ;;  %v12735_v43 = vpack.c.bf16 %v8561_v60, %v8539_v29 }
 0x296   : > { %1436 = vmatmul.mubr.f32.gmra.mrb[18].mxu1 %v8953_v16  ;;  %5607 = vmatmul.mubr.msk.f32.gmra.mrb[54].mxu0 %vm11979_vm13, %v12679_v31  ;;  %vm11987_vm13 = vcmp.eq.s32.totalorder %v9432_v44, %v9116_v15 }
 0x297   : > { %5608 = vmatprep.mubr.msk.f32.mxu0 %vm11981_vm15, %v12679_v31  ;;  %1441 = vmatprep.mubr.f32.mxu1 %v12524_v58  ;;  %vm11989_vm15 = vcmp.eq.s32.totalorder %v9432_v44, %v9135_v25 }
 0x298   : > { %6055 = vmatpush1.bf16.msra.mxu0 %v6054_v22  ;;  %v9446_v22 = vpop.permute.xlu1 %2524  ;;  %v9468_v29 = vpop.permute.xlu0 %2527 }
 0x299   : > { %6057 = vmatprep.subr.bf16.mxu0 %v12735_v43  ;;  %12736 = vst [vmem:[#allocation81_spill] sm:$0xff] %v9446_v22  ;;  %v12737_v43 = vld [vmem:[#allocation213_spill] sm:$0xff]  ;;  %12742 = vst [vmem:[#allocation37_spill] sm:$0xff] %v9468_v29 }
 0x29a   : > { %1443 = vmatmul.mubr.f32.gmra.mrb[20].mxu1 %v8988_v13  ;;  %5609 = vmatmul.mubr.msk.f32.gmra.mrb[56].mxu0 %vm11985_vm14, %v12679_v31  ;;  %v12738_v16 = vpack.c.bf16 %v8582_v42, %v12737_v43  ;;  %v12739_v13 = vld [vmem:[#allocation222_spill] sm:$0xff]  ;;  %vm11991_vm14 = vcmp.eq.s32.totalorder %v9446_v22, %v9116_v15  ;;  %v12755_v43 = vld [vmem:[#allocation63_spill] sm:$0xff] }
 0x29b   : > { %5610 = vmatprep.mubr.msk.f32.mxu0 %vm11987_vm13, %v12679_v31  ;;  %1448 = vmatprep.mubr.f32.mxu1 %v12524_v58  ;;  %v12741_v60 = vpack.c.bf16 %v12739_v13, %v12740_v7  ;;  %vm2565_vm13 = vcmp.eq.s32.totalorder %v9446_v22, %v9135_v25  ;;  %v12747_v7 = vld [vmem:[#allocation211_spill] sm:$0xff]  ;;  %v12756_v18 = vand.u32 4294901760, %v12755_v43 }
 0x29c   : > { %6059 = vmatpush1.bf16.msra.mxu0 %v12738_v16  ;;  %v12744_v16 = vld [vmem:[#allocation223_spill] sm:$0xff] }
 0x29d   : > { %6061 = vmatprep.subr.bf16.mxu0 %v12741_v60  ;;  %v12743_v60 = vld [vmem:[#allocation230_spill] sm:$0xff]  ;;  %v9513_v34 = vpack.c.bf16 %v12758_v52, %v12756_v18  ;;  %v5555_v52 = vsel %vm2540_vm2, 1.0, %v12524_v58  ;;  %v12761_v18 = vld [vmem:[#allocation61_spill] sm:$0xff] }
 0x29e   : > { %1450 = vmatmul.mubr.f32.gmra.mrb[22].mxu1 %v9035_v19  ;;  %5611 = vmatmul.mubr.msk.f32.gmra.mrb[58].mxu0 %vm11989_vm15, %v12679_v31  ;;  %v12745_v13 = vpack.c.bf16 %v12743_v60, %v12744_v16  ;;  %v12746_v19 = vpack.c.bf16 %v8766_v50, %v8756_v5  ;;  %vm2568_vm15 = vcmp.eq.s32.totalorder %v9468_v29, %v9116_v15  ;;  %v12749_v50 = vld [vmem:[#allocation237_spill] sm:$0xff]  ;;  %v12751_v5 = vld [vmem:[#allocation244_spill] sm:$0xff]  ;;  %v12752_v60 = vld [vmem:[#allocation158_spill] sm:$0xff] }
 0x29f   : > { %5612 = vmatprep.mubr.msk.f32.mxu0 %vm11991_vm14, %v12679_v31  ;;  %1455 = vmatprep.mubr.f32.mxu1 %v12524_v58  ;;  %vm2567_vm14 = vcmp.eq.s32.totalorder %v9468_v29, %v9135_v25  ;;  %v12753_v16 = vpack.c.bf16 %v12751_v5, %v12752_v60  ;;  %12759 = vst [vmem:[#allocation63_spill] sm:$0xff] %v9513_v34  ;;  %v12769_v60 = vld [vmem:[#allocation99_spill] sm:$0xff] }
 0x2a0   : > { %6063 = vmatpush1.bf16.msra.mxu0 %v12745_v13  ;;  %v5553_v13 = vsel %vm2538_vm0, 1.0, %v12524_v58  ;;  %v12762_v43 = vpack.c.bf16 %v12760_v39, %v12761_v18  ;;  %v9549_v39 = vsub.f32 %v5555_v52, %v5555_v52 }
 0x2a1   : > { %6065 = vmatprep.subr.bf16.mxu0 %v12746_v19  ;;  %v12748_v19 = vld [vmem:[#allocation242_spill] sm:$0xff]  ;;  %v9507_v42 = vsub.f32 %v5553_v13, %v5553_v13 }
 0x2a2   : > { %1457 = vmatmul.mubr.f32.gmra.mrb[24].mxu1 %v12747_v7  ;;  %5613 = vmatmul.mubr.msk.f32.gmra.mrb[60].mxu0 %vm2565_vm13, %v12679_v31  ;;  %v12750_v7 = vpack.c.bf16 %v12748_v19, %v12749_v50  ;;  %v12770_v19 = vand.u32 4294901760, %v12769_v60  ;;  %v12771_v50 = vld [vmem:[#allocation100_spill] sm:$0xff]  ;;  %12774 = vst [vmem:[#allocation99_spill] sm:$0xff] %v9549_v39  ;;  %v12777_v60 = vld [vmem:[#allocation102_spill] sm:$0xff] }
 0x2a3   : > { %5614 = vmatprep.mubr.msk.f32.mxu0 %vm2568_vm15, %v12679_v31  ;;  %1462 = vmatprep.mubr.f32.mxu1 %v12524_v58  ;;  %12754 = vst [vmem:[#allocation246_spill] sm:$0xff] %v9507_v42  ;;  %v12772_v57 = vand.u32 4294901760, %v12771_v50  ;;  %v5557_v50 = vsel %vm2542_vm4, 1.0, %v12524_v58  ;;  %v12118_v29 = vand.u32 4294901760, %v9507_v42 }
 0x2a4   : > { %6067 = vmatpush1.bf16.msra.mxu0 %v12750_v7  ;;  %v5552_v7 = vsel %vm2537_vm1, 1.0, %v12524_v58  ;;  %v9579_v18 = vsub.f32 %v5557_v50, %v5557_v50 }
 0x2a5   : > { %6069 = vmatprep.subr.bf16.mxu0 %v12753_v16  ;;  %v12763_v16 = vld [vmem:[#allocation97_spill] sm:$0xff]  ;;  %v9546_v51 = vpack.c.bf16 %v12772_v57, %v12770_v19  ;;  %v12778_v19 = vand.u32 4294901760, %v12777_v60 }
 0x2a6   : > { %1464 = vmatmul.mubr.f32.gmra.mrb[26].mxu1 %v9085_v36  ;;  %5615 = vmatmul.mubr.msk.f32.gmra.mrb[62].mxu0 %vm2567_vm14, %v12679_v31  ;;  %v12764_v13 = vand.u32 4294901760, %v12763_v16  ;;  %v12765_v36 = vld [vmem:[#allocation98_spill] sm:$0xff]  ;;  %v9539_v31 = vsub.f32 %v5552_v7, %v5552_v7 }
 0x2a7   : > { %3789 = vmatprep.mubr.f32.mxu0 %v9507_v42  ;;  %1469 = vmatprep.mubr.f32.mxu1 %v12524_v58  ;;  %v12766_v9 = vand.u32 4294901760, %v12765_v36  ;;  %12773 = vst [vmem:[#allocation98_spill] sm:$0xff] %v9546_v51  ;;  %v5554_v36 = vsel %vm2539_vm3, 1.0, %v12524_v58  ;;  %v12132_v42 = vand.u32 4294901760, %v9579_v18 }
 0x2a8   : > { %6071 = vmatpush1.bf16.msra.mxu0 %v12762_v43  ;;  %12768 = vst [vmem:[#allocation97_spill] sm:$0xff] %v9539_v31  ;;  %v9569_v52 = vsub.f32 %v5554_v36, %v5554_v36  ;;  %v12781_v43 = vld [vmem:[#allocation104_spill] sm:$0xff]  ;;  %v5559_v36 = vsel %vm2544_vm6, 1.0, %v12524_v58 }
 0x2a9   : > { %v9537_v5 = vpack.c.bf16 %v12766_v9, %v12764_v13  ;;  %6073 = vmatprep.subr.bf16.mxu0 %v9513_v34  ;;  %v12775_v9 = vld [vmem:[#allocation101_spill] sm:$0xff]  ;;  %v12782_v16 = vand.u32 4294901760, %v12781_v43  ;;  %12786 = vst [vmem:[#allocation104_spill] sm:$0xff] %v9579_v18  ;;  %v9609_v34 = vsub.f32 %v5559_v36, %v5559_v36 }
 0x2aa   : > { %1471 = vmatmul.mubr.f32.gmra.mrb[28].mxu1 %v9109_v3  ;;  %v12776_v57 = vand.u32 4294901760, %v12775_v9  ;;  %12780 = vst [vmem:[#allocation101_spill] sm:$0xff] %v9569_v52  ;;  %v12783_v13 = vld [vmem:[#allocation105_spill] sm:$0xff]  ;;  %v5556_v9 = vsel %vm2541_vm5, 1.0, %v12524_v58 }
 0x2ab   : > { %12767 = vst [vmem:[#allocation64_spill] sm:$0xff] %v9537_v5  ;;  %3792 = vmatmul.mubr.f32.vlgmr.msra.gmra.mrb[32].mxu0 %v9539_v31  ;;  %1476 = vmatprep.mubr.f32.mxu1 %v12524_v58  ;;  %v12784_v3 = vand.u32 4294901760, %v12783_v13  ;;  %v9599_v43 = vsub.f32 %v5556_v9, %v5556_v9  ;;  %v12801_v36 = vld [vmem:[#allocation121_spill] sm:$0xff] }
 0x2ac   : > { %3799 = vmatprep.mubr.f32.mxu0 %v9549_v39  ;;  %6075 = vmatpush1.bf16.msra.mxu0 %v9537_v5  ;;  %v9567_v7 = vpack.c.bf16 %v12778_v19, %v12776_v57  ;;  %v12789_v57 = vld [vmem:[#allocation108_spill] sm:$0xff]  ;;  %v12797_v5 = vld [vmem:[#allocation225_spill] sm:$0xff] }
 0x2ad   : > { %6077 = vmatprep.subr.bf16.mxu0 %v9546_v51  ;;  %v9576_v6 = vpack.c.bf16 %v12784_v3, %v12782_v16  ;;  %v12787_v3 = vld [vmem:[#allocation107_spill] sm:$0xff]  ;;  %v12790_v60 = vand.u32 4294901760, %v12789_v57  ;;  %v12792_v16 = vld [vmem:[#allocation116_spill] sm:$0xff]  ;;  %v12802_v57 = vand.u32 4294901760, %v12801_v36 }
 0x2ae   : > { %12779 = vst [vmem:[#allocation100_spill] sm:$0xff] %v9567_v7  ;;  %1478 = vmatmul.mubr.f32.gmra.mrb[30].mxu1 %v9131_v61  ;;  %v12788_v50 = vand.u32 4294901760, %v12787_v3  ;;  %v12793_v13 = vand.u32 4294901760, %v12792_v16  ;;  %v12794_v61 = vld [vmem:[#allocation119_spill] sm:$0xff]  ;;  %v5558_v3 = vsel %vm2543_vm7, 1.0, %v12524_v58 }
 0x2af   : > { %12785 = vst [vmem:[#allocation102_spill] sm:$0xff] %v9576_v6  ;;  %3802 = vmatmul.mubr.f32.gmra.mrb[34].mxu0 %v9569_v52  ;;  %1612 = vmatprep.mubr.f32.mxu1 %v12524_v58  ;;  %v12795_v23 = vand.u32 4294901760, %v12794_v61  ;;  %v5561_v61 = vsel %vm2546_vm8, 1.0, %v12524_v58  ;;  %v9630_v16 = vsub.f32 %v5558_v3, %v5558_v3  ;;  %v5560_v3 = vsel %vm2545_vm9, 1.0, %v12524_v58 }
 0x2b0   : > { %3809 = vmatprep.mubr.f32.mxu0 %v9579_v18  ;;  %6079 = vmatpush1.bf16.msra.mxu0 %v9567_v7  ;;  %v9597_v19 = vpack.c.bf16 %v12790_v60, %v12788_v50  ;;  %v12798_v50 = vld [vmem:[#allocation41_spill] sm:$0xff] }
 0x2b1   : > { %6081 = vmatprep.subr.bf16.mxu0 %v9576_v6  ;;  %v9606_v51 = vpack.c.bf16 %v12795_v23, %v12793_v13  ;;  %v12799_v23 = vld [vmem:[#allocation120_spill] sm:$0xff]  ;;  %v12807_v6 = vand.u32 4294901760, %v12806_v46  ;;  %v5563_v46 = vsel %vm2548_vm10, 1.0, %v12524_v58 }
 0x2b2   : > { %12791 = vst [vmem:[#allocation105_spill] sm:$0xff] %v9597_v19  ;;  %1615 = vmatmul.mubr.f32.vlgmr.msra.gmra.mrb[0].mxu1 %v12797_v5  ;;  %v12800_v9 = vand.u32 4294901760, %v12799_v23  ;;  %v12804_v13 = vld [vmem:[#allocation124_spill] sm:$0xff]  ;;  %v12810_v23 = vld [vmem:[#allocation43_spill] sm:$0xff] }
 0x2b3   : > { %12796 = vst [vmem:[#allocation107_spill] sm:$0xff] %v9606_v51  ;;  %5787 = vmatpush1.bf16.msra.mxu1 %v12798_v50  ;;  %3812 = vmatmul.mubr.f32.gmra.mrb[36].mxu0 %v9599_v43  ;;  %v12805_v50 = vand.u32 4294901760, %v12804_v13  ;;  %v12816_v13 = vld [vmem:[#allocation46_spill] sm:$0xff] }
 0x2b4   : > { %3819 = vmatprep.mubr.f32.mxu0 %v9609_v34  ;;  %6083 = vmatpush1.bf16.msra.mxu0 %v9597_v19  ;;  %v9627_v60 = vpack.c.bf16 %v12802_v57, %v12800_v9  ;;  %v9640_v19 = vsub.f32 %v5561_v61, %v5561_v61  ;;  %v12813_v9 = vld [vmem:[#allocation130_spill] sm:$0xff] }
 0x2b5   : > { %1620 = vmatprep.mubr.f32.mxu1 %v12524_v58  ;;  %6085 = vmatprep.subr.bf16.mxu0 %v9606_v51  ;;  %v9637_v7 = vpack.c.bf16 %v12807_v6, %v12805_v50  ;;  %v12811_v6 = vld [vmem:[#allocation129_spill] sm:$0xff]  ;;  %v12814_v36 = vand.u32 4294901760, %v12813_v9  ;;  %v9662_v50 = vsub.f32 %v5560_v3, %v5560_v3  ;;  %v12819_v51 = vld [vmem:[#allocation132_spill] sm:$0xff]  ;;  %v12826_v3 = vld [vmem:[#allocation135_spill] sm:$0xff] }
 0x2b6   : > { %12803 = vst [vmem:[#allocation108_spill] sm:$0xff] %v9627_v60  ;;  %1623 = vmatmul.mubr.f32.gmra.mrb[2].mxu1 %v12809_v40  ;;  %5789 = vmatprep.subr.bf16.mxu1 %v12810_v23  ;;  %v12812_v61 = vand.u32 4294901760, %v12811_v6  ;;  %v12817_v23 = vld [vmem:[#allocation131_spill] sm:$0xff]  ;;  %v12820_v62 = vand.u32 4294901760, %v12819_v51  ;;  %v5562_v6 = vsel %vm12037_vm11, 1.0, %v12524_v58  ;;  %vm12838_vm11 = vcmp.eq.s32.totalorder %v9284_v63, %v9116_v15 }
 0x2b7   : > { %12808 = vst [vmem:[#allocation116_spill] sm:$0xff] %v9637_v7  ;;  %3822 = vmatmul.mubr.f32.gmra.mrb[38].mxu0 %v9630_v16  ;;  %1628 = vmatprep.mubr.f32.mxu1 %v12524_v58  ;;  %v12818_v11 = vand.u32 4294901760, %v12817_v23  ;;  %v12830_v23 = vld [vmem:[#allocation143_spill] sm:$0xff] }
 0x2b8   : > { %3829 = vmatprep.mubr.f32.mxu0 %v9640_v19  ;;  %6087 = vmatpush1.bf16.msra.mxu0 %v9627_v60  ;;  %v9659_v57 = vpack.c.bf16 %v12814_v36, %v12812_v61  ;;  %v9672_v60 = vsub.f32 %v5563_v46, %v5563_v46  ;;  %v12823_v61 = vld [vmem:[#allocation50_spill] sm:$0xff]  ;;  %v12827_v46 = vand.u32 4294901760, %v12826_v3  ;;  %v9693_v36 = vsub.f32 %v5562_v6, %v5562_v6 }
 0x2b9   : > { %5791 = vmatpush1.bf16.msra.mxu1 %v12816_v13  ;;  %6089 = vmatprep.subr.bf16.mxu0 %v9637_v7  ;;  %v9669_v32 = vpack.c.bf16 %v12820_v62, %v12818_v11  ;;  %v5565_v62 = vsel %vm12036_vm12, 1.0, %v12524_v58  ;;  %v12824_v11 = vld [vmem:[#allocation133_spill] sm:$0xff]  ;;  %v12833_v7 = vand.u32 4294901760, %v12832_v20  ;;  %vm12836_vm12 = vcmp.eq.s32.totalorder %v9251_v24, %v9135_v25 }
 0x2ba   : > { %12815 = vst [vmem:[#allocation119_spill] sm:$0xff] %v9659_v57  ;;  %1631 = vmatmul.mubr.f32.gmra.mrb[4].mxu1 %v12822_v54  ;;  %5793 = vmatprep.subr.bf16.mxu1 %v12823_v61  ;;  %v12825_v51 = vand.u32 4294901760, %v12824_v11  ;;  %v12829_v13 = vld [vmem:[#allocation53_spill] sm:$0xff]  ;;  %v12831_v61 = vand.u32 4294901760, %v12830_v23  ;;  %v5564_v6 = vsel %vm12836_vm12, 1.0, %v12524_v58  ;;  %v12837_v11 = vld [vmem:[#allocation54_spill] sm:$0xff]  ;;  %vm12853_vm12 = vcmp.eq.s32.totalorder %v9319_v8, %v9116_v15 }
 0x2bb   : > { %12821 = vst [vmem:[#allocation225_spill] sm:$0xff] %v9669_v32  ;;  %3832 = vmatmul.mubr.f32.gmra.mrb[40].mxu0 %v9662_v50  ;;  %1636 = vmatprep.mubr.f32.mxu1 %v12524_v58  ;;  %v5567_v20 = vsel %vm12838_vm11, 1.0, %v12524_v58  ;;  %v12844_v23 = vld [vmem:[#allocation150_spill] sm:$0xff]  ;;  %vm12851_vm11 = vcmp.eq.s32.totalorder %v9284_v63, %v9135_v25 }
 0x2bc   : > { %3839 = vmatprep.mubr.f32.mxu0 %v9672_v60  ;;  %6091 = vmatpush1.bf16.msra.mxu0 %v9659_v57  ;;  %v9691_v9 = vpack.c.bf16 %v12827_v46, %v12825_v51  ;;  %v9701_v0 = vpack.c.bf16 %v12833_v7, %v12831_v61  ;;  %v9704_v57 = vsub.f32 %v5565_v62, %v5565_v62  ;;  %v12839_v7 = vld [vmem:[#allocation146_spill] sm:$0xff]  ;;  %v12841_v51 = vld [vmem:[#allocation147_spill] sm:$0xff]  ;;  %v12845_v61 = vand.u32 4294901760, %v12844_v23 }
 0x2bd   : > { %6093 = vmatprep.subr.bf16.mxu0 %v9669_v32  ;;  %5795 = vmatpush1.bf16.msra.mxu1 %v12829_v13  ;;  %v12840_v62 = vand.u32 4294901760, %v12839_v7  ;;  %v12842_v3 = vand.u32 4294901760, %v12841_v51  ;;  %v9725_v13 = vsub.f32 %v5564_v6, %v5564_v6  ;;  %v5566_v6 = vsel %vm12851_vm11, 1.0, %v12524_v58  ;;  %v12852_v7 = vld [vmem:[#allocation57_spill] sm:$0xff] }
 0x2be   : > { %12828 = vst [vmem:[#allocation41_spill] sm:$0xff] %v9691_v9  ;;  %12834 = vst [vmem:[#allocation120_spill] sm:$0xff] %v9701_v0  ;;  %1639 = vmatmul.mubr.f32.gmra.mrb[6].mxu1 %v12835_v59  ;;  %5797 = vmatprep.subr.bf16.mxu1 %v12837_v11  ;;  %v12846_v11 = vld [vmem:[#allocation151_spill] sm:$0xff]  ;;  %v9757_v23 = vsub.f32 %v5566_v6, %v5566_v6  ;;  %vm12867_vm11 = vcmp.eq.s32.totalorder %v9319_v8, %v9135_v25 }
 0x2bf   : > { %3842 = vmatmul.mubr.f32.gmra.mrb[42].mxu0 %v9693_v36  ;;  %1644 = vmatprep.mubr.f32.mxu1 %v12524_v58  ;;  %v9723_v46 = vpack.c.bf16 %v12842_v3, %v12840_v62  ;;  %v12847_v24 = vand.u32 4294901760, %v12846_v11  ;;  %v12856_v62 = vld [vmem:[#allocation155_spill] sm:$0xff]  ;;  %v5568_v6 = vsel %vm12867_vm11, 1.0, %v12524_v58  ;;  %vm12883_vm11 = vcmp.eq.s32.totalorder %v9343_v4, %v9135_v25 }
 0x2c0   : > { %3849 = vmatprep.mubr.f32.mxu0 %v9704_v57  ;;  %6095 = vmatpush1.bf16.msra.mxu0 %v9691_v9  ;;  %v9736_v9 = vsub.f32 %v5567_v20, %v5567_v20  ;;  %v12857_v51 = vand.u32 4294901760, %v12856_v62 }
 0x2c1   : > { %12843 = vst [vmem:[#allocation121_spill] sm:$0xff] %v9723_v46  ;;  %6097 = vmatprep.subr.bf16.mxu0 %v9701_v0  ;;  %v9732_v32 = vpack.c.bf16 %v12847_v24, %v12845_v61  ;;  %5799 = vmatpush1.bf16.msra.mxu1 %v12849_v2  ;;  %v5569_v2 = vsel %vm12853_vm12, 1.0, %v12524_v58  ;;  %v12854_v24 = vld [vmem:[#allocation152_spill] sm:$0xff]  ;;  %v12859_v61 = vld [vmem:[#allocation162_spill] sm:$0xff]  ;;  %vm12869_vm12 = vcmp.eq.s32.totalorder %v9343_v4, %v9116_v15 }
 0x2c2   : > { %1647 = vmatmul.mubr.f32.gmra.mrb[8].mxu1 %v12850_v27  ;;  %5801 = vmatprep.subr.bf16.mxu1 %v12852_v7  ;;  %v12855_v20 = vand.u32 4294901760, %v12854_v24  ;;  %v12860_v11 = vand.u32 4294901760, %v12859_v61  ;;  %v12861_v7 = vld [vmem:[#allocation163_spill] sm:$0xff]  ;;  %v12868_v24 = vld [vmem:[#allocation60_spill] sm:$0xff]  ;;  %v9789_v61 = vsub.f32 %v5568_v6, %v5568_v6  ;;  %v5570_v6 = vsel %vm12883_vm11, 1.0, %v12524_v58 }
 0x2c3   : > { %12848 = vst [vmem:[#allocation124_spill] sm:$0xff] %v9732_v32  ;;  %3852 = vmatmul.mubr.f32.gmra.mrb[44].mxu0 %v9725_v13  ;;  %1652 = vmatprep.mubr.f32.mxu1 %v12524_v58  ;;  %v12862_v63 = vand.u32 4294901760, %v12861_v7  ;;  %vm12899_vm11 = vcmp.eq.s32.totalorder %v9359_v10, %v9135_v25 }
 0x2c4   : > { %3859 = vmatprep.mubr.f32.mxu0 %v9736_v9  ;;  %6099 = vmatpush1.bf16.msra.mxu0 %v9723_v46  ;;  %v9755_v3 = vpack.c.bf16 %v12857_v51, %v12855_v20  ;;  %v9768_v46 = vsub.f32 %v5569_v2, %v5569_v2  ;;  %v12872_v20 = vld [vmem:[#allocation166_spill] sm:$0xff] }
 0x2c5   : > { %6101 = vmatprep.subr.bf16.mxu0 %v9732_v32  ;;  %v9764_v0 = vpack.c.bf16 %v12862_v63, %v12860_v11  ;;  %5803 = vmatpush1.bf16.msra.mxu1 %v12864_v12  ;;  %v5571_v12 = vsel %vm12869_vm12, 1.0, %v12524_v58  ;;  %v12870_v63 = vld [vmem:[#allocation164_spill] sm:$0xff]  ;;  %v12873_v62 = vand.u32 4294901760, %v12872_v20  ;;  %v12875_v11 = vld [vmem:[#allocation167_spill] sm:$0xff]  ;;  %vm12885_vm12 = vcmp.eq.s32.totalorder %v9359_v10, %v9116_v15 }
 0x2c6   : > { %12858 = vst [vmem:[#allocation127_spill] sm:$0xff] %v9755_v3  ;;  %1655 = vmatmul.mubr.f32.gmra.mrb[10].mxu1 %v12865_v1  ;;  %12866 = vst [vmem:[#allocation43_spill] sm:$0xff] %v9768_v46  ;;  %5805 = vmatprep.subr.bf16.mxu1 %v12868_v24  ;;  %v12871_v2 = vand.u32 4294901760, %v12870_v63  ;;  %v12876_v7 = vand.u32 4294901760, %v12875_v11  ;;  %v12877_v24 = vld [vmem:[#allocation171_spill] sm:$0xff]  ;;  %v12880_v1 = vld [vmem:[#allocation62_spill] sm:$0xff]  ;;  %v9821_v11 = vsub.f32 %v5570_v6, %v5570_v6 }
 0x2c7   : > { %12863 = vst [vmem:[#allocation231_spill] sm:$0xff] %v9764_v0  ;;  %3862 = vmatmul.mubr.f32.gmra.mrb[46].mxu0 %v9757_v23  ;;  %1660 = vmatprep.mubr.f32.mxu1 %v12524_v58  ;;  %v12878_v8 = vand.u32 4294901760, %v12877_v24  ;;  %v12884_v63 = vld [vmem:[#allocation65_spill] sm:$0xff]  ;;  %v5572_v6 = vsel %vm12899_vm11, 1.0, %v12524_v58  ;;  %vm12917_vm11 = vcmp.eq.s32.totalorder %v9395_v21, %v9135_v25 }
 0x2c8   : > { %3869 = vmatprep.mubr.f32.mxu0 %v9768_v46  ;;  %6103 = vmatpush1.bf16.msra.mxu0 %v9755_v3  ;;  %v9787_v51 = vpack.c.bf16 %v12873_v62, %v12871_v2  ;;  %v12881_v46 = vld [vmem:[#allocation67_spill] sm:$0xff]  ;;  %v9800_v3 = vsub.f32 %v5571_v12, %v5571_v12  ;;  %v12888_v2 = vld [vmem:[#allocation176_spill] sm:$0xff] }
 0x2c9   : > { %6105 = vmatprep.subr.bf16.mxu0 %v9764_v0  ;;  %v9796_v32 = vpack.c.bf16 %v12878_v8, %v12876_v7  ;;  %5807 = vmatpush1.bf16.msra.mxu1 %v12880_v1  ;;  %v5573_v1 = vsel %vm12885_vm12, 1.0, %v12524_v58  ;;  %v12886_v8 = vld [vmem:[#allocation173_spill] sm:$0xff]  ;;  %v12889_v20 = vand.u32 4294901760, %v12888_v2  ;;  %v12902_v2 = vand.u32 4294901760, %v12636_v28 }
 0x2ca   : > { %12874 = vst [vmem:[#allocation129_spill] sm:$0xff] %v9787_v51  ;;  %1663 = vmatmul.mubr.f32.gmra.mrb[12].mxu1 %v12881_v46  ;;  %12882 = vst [vmem:[#allocation46_spill] sm:$0xff] %v9800_v3  ;;  %5809 = vmatprep.subr.bf16.mxu1 %v12884_v63  ;;  %v12887_v12 = vand.u32 4294901760, %v12886_v8  ;;  %v12891_v7 = vld [vmem:[#allocation181_spill] sm:$0xff]  ;;  %v12893_v63 = vld [vmem:[#allocation182_spill] sm:$0xff]  ;;  %vm12903_vm12 = vcmp.eq.s32.totalorder %v9395_v21, %v9116_v15  ;;  %v9857_v28 = vsub.f32 %v5572_v6, %v5572_v6 }
 0x2cb   : > { %12879 = vst [vmem:[#allocation130_spill] sm:$0xff] %v9796_v32  ;;  %3872 = vmatmul.mubr.f32.gmra.mrb[48].mxu0 %v9789_v61  ;;  %1668 = vmatprep.mubr.f32.mxu1 %v12524_v58  ;;  %v12892_v24 = vand.u32 4294901760, %v12891_v7  ;;  %v12894_v4 = vand.u32 4294901760, %v12893_v63  ;;  %v12896_v46 = vld [vmem:[#allocation68_spill] sm:$0xff]  ;;  %v12900_v8 = vld [vmem:[#allocation75_spill] sm:$0xff]  ;;  %v12906_v7 = vld [vmem:[#allocation185_spill] sm:$0xff] }
 0x2cc   : > { %3879 = vmatprep.mubr.f32.mxu0 %v9800_v3  ;;  %6107 = vmatpush1.bf16.msra.mxu0 %v9787_v51  ;;  %v9819_v62 = vpack.c.bf16 %v12889_v20, %v12887_v12  ;;  %v12897_v3 = vld [vmem:[#allocation175_spill] sm:$0xff]  ;;  %v9832_v51 = vsub.f32 %v5573_v1, %v5573_v1  ;;  %v12901_v12 = vand.u32 4294901760, %v12635_v26  ;;  %v12907_v26 = vand.u32 4294901760, %v12906_v7  ;;  %v12909_v63 = vld [vmem:[#allocation186_spill] sm:$0xff] }
 0x2cd   : > { %6109 = vmatprep.subr.bf16.mxu0 %v9796_v32  ;;  %v9828_v0 = vpack.c.bf16 %v12894_v4, %v12892_v24  ;;  %5811 = vmatpush1.bf16.msra.mxu1 %v12896_v46  ;;  %v5575_v4 = vsel %vm12903_vm12, 1.0, %v12524_v58  ;;  %v12904_v46 = vld [vmem:[#allocation184_spill] sm:$0xff]  ;;  %v12914_v32 = vld [vmem:[#allocation79_spill] sm:$0xff]  ;;  %v5574_v6 = vsel %vm12917_vm11, 1.0, %v12524_v58  ;;  %vm12918_vm12 = vcmp.eq.s32.totalorder %v9409_v38, %v9116_v15 }
 0x2ce   : > { %12890 = vst [vmem:[#allocation131_spill] sm:$0xff] %v9819_v62  ;;  %1671 = vmatmul.mubr.f32.gmra.mrb[14].mxu1 %v12897_v3  ;;  %12898 = vst [vmem:[#allocation52_spill] sm:$0xff] %v9832_v51  ;;  %5813 = vmatprep.subr.bf16.mxu1 %v12900_v8  ;;  %v5816_v20 = vpack.c.bf16 %v12902_v2, %v12901_v12  ;;  %v12905_v1 = vand.u32 4294901760, %v12904_v46  ;;  %v12910_v8 = vand.u32 4294901760, %v12909_v63  ;;  %v12911_v12 = vld [vmem:[#allocation187_spill] sm:$0xff]  ;;  %v5577_v46 = vsel %vm12918_vm12, 1.0, %v12524_v58 }
 0x2cf   : > { %12895 = vst [vmem:[#allocation132_spill] sm:$0xff] %v9828_v0  ;;  %3882 = vmatmul.mubr.f32.gmra.mrb[50].mxu0 %v9821_v11  ;;  %1676 = vmatprep.mubr.f32.mxu1 %v12524_v58  ;;  %v12912_v2 = vand.u32 4294901760, %v12911_v12  ;;  %v12924_v63 = vld [vmem:[#allocation202_spill] sm:$0xff]  ;;  %v12926_v12 = vld [vmem:[#allocation203_spill] sm:$0xff]  ;;  %vm12931_vm11 = vcmp.eq.s32.totalorder %v9409_v38, %v9135_v25  ;;  %vm12932_vm12 = vcmp.eq.s32.totalorder %v9432_v44, %v9116_v15  ;;  %v12940_v38 = vld [vmem:[#allocation216_spill] sm:$0xff] }
 0x2d0   : > { %3889 = vmatprep.mubr.f32.mxu0 %v9832_v51  ;;  %6111 = vmatpush1.bf16.msra.mxu0 %v9819_v62  ;;  %v9855_v24 = vpack.c.bf16 %v12907_v26, %v12905_v1  ;;  %v12915_v51 = vld [vmem:[#allocation190_spill] sm:$0xff]  ;;  %v9868_v62 = vsub.f32 %v5575_v4, %v5575_v4  ;;  %v12921_v1 = vld [vmem:[#allocation195_spill] sm:$0xff] }
 0x2d1   : > { %6113 = vmatprep.subr.bf16.mxu0 %v9828_v0  ;;  %v9864_v10 = vpack.c.bf16 %v12912_v2, %v12910_v8  ;;  %5815 = vmatpush1.bf16.msra.mxu1 %v12914_v32  ;;  %v12919_v32 = vld [vmem:[#allocation194_spill] sm:$0xff]  ;;  %v12922_v7 = vand.u32 4294901760, %v12921_v1  ;;  %v12925_v8 = vand.u32 4294901760, %v12924_v63  ;;  %v12927_v2 = vand.u32 4294901760, %v12926_v12  ;;  %v12929_v0 = vld [vmem:[#allocation165_spill] sm:$0xff] }
 0x2d2   : > { %12908 = vst [vmem:[#allocation50_spill] sm:$0xff] %v9855_v24  ;;  %1679 = vmatmul.mubr.f32.gmra.mrb[16].mxu1 %v12915_v51  ;;  %12916 = vst [vmem:[#allocation135_spill] sm:$0xff] %v9868_v62  ;;  %5817 = vmatprep.subr.bf16.mxu1 %v5816_v20  ;;  %v12920_v4 = vand.u32 4294901760, %v12919_v32  ;;  %v9888_v20 = vsub.f32 %v5574_v6, %v5574_v6  ;;  %v5576_v32 = vsel %vm12931_vm11, 1.0, %v12524_v58  ;;  %v5579_v6 = vsel %vm12932_vm12, 1.0, %v12524_v58  ;;  %v12935_v1 = vld [vmem:[#allocation206_spill] sm:$0xff] }
 0x2d3   : > { %12913 = vst [vmem:[#allocation133_spill] sm:$0xff] %v9864_v10  ;;  %3892 = vmatmul.mubr.f32.gmra.mrb[52].mxu0 %v9857_v28  ;;  %1684 = vmatprep.mubr.f32.mxu1 %v12524_v58  ;;  %v9895_v21 = vpack.c.bf16 %v12927_v2, %v12925_v8  ;;  %v9918_v8 = vsub.f32 %v5576_v32, %v5576_v32  ;;  %v12938_v12 = vld [vmem:[#allocation214_spill] sm:$0xff] }
 0x2d4   : > { %3899 = vmatprep.mubr.f32.mxu0 %v9868_v62  ;;  %6115 = vmatpush1.bf16.msra.mxu0 %v9855_v24  ;;  %v9886_v26 = vpack.c.bf16 %v12922_v7, %v12920_v4  ;;  %v9898_v62 = vsub.f32 %v5577_v46, %v5577_v46  ;;  %v12933_v46 = vld [vmem:[#allocation205_spill] sm:$0xff]  ;;  %v12936_v7 = vand.u32 4294901760, %v12935_v1  ;;  %v12939_v2 = vand.u32 4294901760, %v12938_v12  ;;  %v12952_v12 = vld [vmem:[#allocation228_spill] sm:$0xff] }
 0x2d5   : > { %6117 = vmatprep.subr.bf16.mxu0 %v9864_v10  ;;  %12928 = vst [vmem:[#allocation143_spill] sm:$0xff] %v9895_v21  ;;  %v12934_v4 = vand.u32 4294901760, %v12933_v46  ;;  %v12941_v10 = vand.u32 4294901760, %v12940_v38  ;;  %vm12945_vm11 = vcmp.eq.s32.totalorder %v9432_v44, %v9135_v25  ;;  %vm12946_vm12 = vcmp.eq.s32.totalorder %v9446_v22, %v9116_v15  ;;  %v12954_v44 = vld [vmem:[#allocation229_spill] sm:$0xff]  ;;  %v12965_v22 = vld [vmem:[#allocation238_spill] sm:$0xff] }
 0x2d6   : > { %12923 = vst [vmem:[#allocation53_spill] sm:$0xff] %v9886_v26  ;;  %1687 = vmatmul.mubr.f32.gmra.mrb[18].mxu1 %v12929_v0  ;;  %12930 = vst [vmem:[#allocation144_spill] sm:$0xff] %v9898_v62  ;;  %v12943_v0 = vld [vmem:[#allocation83_spill] sm:$0xff]  ;;  %v5578_v46 = vsel %vm12945_vm11, 1.0, %v12524_v58  ;;  %v5581_v38 = vsel %vm12946_vm12, 1.0, %v12524_v58 }
 0x2d7   : > { %3902 = vmatmul.mubr.f32.gmra.mrb[54].mxu0 %v9888_v20  ;;  %1692 = vmatprep.mubr.f32.mxu1 %v12524_v58  ;;  %v9916_v63 = vpack.c.bf16 %v12936_v7, %v12934_v4  ;;  %v9925_v24 = vpack.c.bf16 %v12941_v10, %v12939_v2  ;;  %v12947_v10 = vld [vmem:[#allocation218_spill] sm:$0xff]  ;;  %v9948_v7 = vsub.f32 %v5578_v46, %v5578_v46  ;;  %v12953_v2 = vand.u32 4294901760, %v12952_v12  ;;  %v12963_v12 = vld [vmem:[#allocation236_spill] sm:$0xff] }
 0x2d8   : > { %3909 = vmatprep.mubr.f32.mxu0 %v9898_v62  ;;  %6119 = vmatpush1.bf16.msra.mxu0 %v9886_v26  ;;  %v9928_v62 = vsub.f32 %v5579_v6, %v5579_v6  ;;  %v12948_v32 = vand.u32 4294901760, %v12947_v10  ;;  %v12949_v6 = vld [vmem:[#allocation220_spill] sm:$0xff]  ;;  %v5580_v10 = vsel %vm2565_vm13, 1.0, %v12524_v58 }
 0x2d9   : > { %12937 = vst [vmem:[#allocation55_spill] sm:$0xff] %v9916_v63  ;;  %6121 = vmatprep.subr.bf16.mxu0 %v9895_v21  ;;  %12942 = vst [vmem:[#allocation54_spill] sm:$0xff] %v9925_v24  ;;  %v12950_v4 = vand.u32 4294901760, %v12949_v6  ;;  %v12955_v21 = vand.u32 4294901760, %v12954_v44  ;;  %v5583_v44 = vsel %vm2568_vm15, 1.0, %v12524_v58 }
 0x2da   : > { %1695 = vmatmul.mubr.f32.gmra.mrb[20].mxu1 %v12943_v0  ;;  %12944 = vst [vmem:[#allocation146_spill] sm:$0xff] %v9928_v62  ;;  %v12957_v0 = vld [vmem:[#allocation188_spill] sm:$0xff]  ;;  %v9988_v15 = vsub.f32 %v5583_v44, %v5583_v44 }
 0x2db   : > { %3912 = vmatmul.mubr.f32.gmra.mrb[56].mxu0 %v9918_v8  ;;  %1700 = vmatprep.mubr.f32.mxu1 %v12524_v58  ;;  %v9946_v1 = vpack.c.bf16 %v12950_v4, %v12948_v32  ;;  %v9955_v26 = vpack.c.bf16 %v12955_v21, %v12953_v2  ;;  %v12958_v21 = vld [vmem:[#allocation232_spill] sm:$0xff]  ;;  %v9978_v4 = vsub.f32 %v5580_v10, %v5580_v10  ;;  %v12964_v2 = vand.u32 4294901760, %v12963_v12  ;;  %v12970_v10 = vld [vmem:[#allocation241_spill] sm:$0xff] }
 0x2dc   : > { %3919 = vmatprep.mubr.f32.mxu0 %v9928_v62  ;;  %6123 = vmatpush1.bf16.msra.mxu0 %v9916_v63  ;;  %v9958_v62 = vsub.f32 %v5581_v38, %v5581_v38  ;;  %v12959_v46 = vand.u32 4294901760, %v12958_v21  ;;  %v12960_v38 = vld [vmem:[#allocation128_spill] sm:$0xff]  ;;  %v5582_v21 = vsel %vm2567_vm14, 1.0, %v12524_v58  ;;  %v12974_v12 = vand.u32 4294901760, %v12647_v41 }
 0x2dd   : > { %12951 = vst [vmem:[#allocation147_spill] sm:$0xff] %v9946_v1  ;;  %6125 = vmatprep.subr.bf16.mxu0 %v9925_v24  ;;  %12956 = vst [vmem:[#allocation150_spill] sm:$0xff] %v9955_v26  ;;  %v12961_v32 = vand.u32 4294901760, %v12960_v38  ;;  %v12966_v24 = vand.u32 4294901760, %v12965_v22  ;;  %v12968_v22 = vld [vmem:[#allocation239_spill] sm:$0xff]  ;;  %v10004_v44 = vsub.f32 %v5582_v21, %v5582_v21  ;;  %v12975_v21 = vld [vmem:[#allocation106_spill] sm:$0xff] }
 0x2de   : > { %1703 = vmatmul.mubr.f32.gmra.mrb[22].mxu1 %v12957_v0  ;;  %v12121_v41 = vand.u32 4294901760, %v9539_v31 }
 0x2df   : > { %3922 = vmatmul.mubr.f32.gmra.mrb[58].mxu0 %v9948_v7  ;;  %1708 = vmatprep.mubr.f32.mxu1 %v12524_v58  ;;  %v9976_v6 = vpack.c.bf16 %v12961_v32, %v12959_v46  ;;  %v9985_v63 = vpack.c.bf16 %v12966_v24, %v12964_v2  ;;  %v12969_v24 = vand.u32 4294901760, %v12968_v22  ;;  %v12971_v46 = vand.u32 4294901760, %v12970_v10 }
 0x2e0   : > { %3929 = vmatprep.mubr.f32.mxu0 %v9958_v62  ;;  %6127 = vmatpush1.bf16.msra.mxu0 %v9946_v1  ;;  %v12973_v32 = vand.u32 4294901760, %v12646_v33  ;;  %v12976_v22 = vand.u32 4294901760, %v12975_v21  ;;  %v12984_v21 = vld [vmem:[#allocation112_spill] sm:$0xff] }
 0x2e1   : > { %12962 = vst [vmem:[#allocation151_spill] sm:$0xff] %v9976_v6  ;;  %6129 = vmatprep.subr.bf16.mxu0 %v9955_v26  ;;  %12967 = vst [vmem:[#allocation56_spill] sm:$0xff] %v9985_v63  ;;  %v10002_v38 = vpack.c.bf16 %v12971_v46, %v12969_v24  ;;  %v12977_v24 = vld [vmem:[#allocation109_spill] sm:$0xff]  ;;  %v12979_v46 = vld [vmem:[#allocation110_spill] sm:$0xff] }
 0x2e2   : > { %1711 = vmatmul.mubr.f32.gmra.mrb[24].mxu1 %v9070_v48  ;;  %v6136_v2 = vpack.c.bf16 %v12974_v12, %v12973_v32  ;;  %v12978_v33 = vand.u32 4294901760, %v12977_v24  ;;  %v12980_v32 = vand.u32 4294901760, %v12979_v46  ;;  %v12981_v12 = vld [vmem:[#allocation111_spill] sm:$0xff]  ;;  %v12983_v26 = vld [vmem:[#allocation204_spill] sm:$0xff]  ;;  %v12988_v46 = vld [vmem:[#allocation114_spill] sm:$0xff] }
 0x2e3   : > { %3932 = vmatmul.mubr.f32.gmra.mrb[60].mxu0 %v9978_v4  ;;  %1716 = vmatprep.mubr.f32.mxu1 %v12524_v58  ;;  %12972 = vst [vmem:[#allocation58_spill] sm:$0xff] %v10002_v38 }
 0x2e4   : > { %3939 = vmatprep.mubr.f32.mxu0 %v9988_v15  ;;  %6131 = vmatpush1.bf16.msra.mxu0 %v9976_v6  ;;  %v6138_v10 = vpack.c.bf16 %v12978_v33, %v12976_v22  ;;  %v12986_v22 = vld [vmem:[#allocation113_spill] sm:$0xff] }
 0x2e5   : > { %6133 = vmatprep.subr.bf16.mxu0 %v9985_v63  ;;  %v12982_v63 = vand.u32 4294901760, %v12981_v12  ;;  %v12987_v24 = vand.u32 4294901760, %v12986_v22  ;;  %v12990_v12 = vld [vmem:[#allocation115_spill] sm:$0xff] }
 0x2e6   : > { %1719 = vmatmul.mubr.f32.gmra.mrb[26].mxu1 %v9106_v35 }
 0x2e7   : > { %3942 = vmatmul.mubr.f32.gmra.mrb[62].mxu0 %v10004_v44  ;;  %1724 = vmatprep.mubr.f32.mxu1 %v12524_v58  ;;  %v6140_v6 = vpack.c.bf16 %v12982_v63, %v12980_v32  ;;  %v12125_v63 = vand.u32 4294901760, %v9569_v52  ;;  %v12989_v32 = vand.u32 4294901760, %v12988_v46  ;;  %v12999_v46 = vld [vmem:[#allocation118_spill] sm:$0xff] }
 0x2e8   : > { %6135 = vmatpush1.bf16.msra.mxu0 %v10002_v38  ;;  %4079 = vmatprep.mubr.f32.mxu0 %v12118_v29  ;;  %v12124_v38 = vand.u32 4294901760, %v9549_v39  ;;  %v12991_v29 = vand.u32 4294901760, %v12990_v12  ;;  %v13003_v39 = vld [vmem:[#allocation123_spill] sm:$0xff] }
 0x2e9   : > { %6137 = vmatprep.subr.bf16.mxu0 %v6136_v2  ;;  %v12985_v2 = vand.u32 4294901760, %v12984_v21  ;;  %v13004_v1 = vand.u32 4294901760, %v13003_v39 }
 0x2ea   : > { %1727 = vmatmul.mubr.f32.gmra.mrb[28].mxu1 %v12983_v26  ;;  %v6144_v31 = vpack.c.bf16 %v12991_v29, %v12989_v32  ;;  %v13000_v32 = vand.u32 4294901760, %v12999_v46 }
 0x2eb   : > { %4083 = vmatmul.mubr.f32.vlgmr.msra.gmra.mrb[32].mxu0 %v12121_v41  ;;  %1732 = vmatprep.mubr.f32.mxu1 %v12524_v58  ;;  %v6142_v33 = vpack.c.bf16 %v12987_v24, %v12985_v2  ;;  %v12992_v41 = vld [vmem:[#allocation96_spill] sm:$0xff]  ;;  %v12995_v2 = vld [vmem:[#allocation42_spill] sm:$0xff] }
 0x2ec   : > { %4091 = vmatprep.mubr.f32.mxu0 %v12124_v38  ;;  %6139 = vmatpush1.bf16.msra.mxu0 %v6138_v10  ;;  %v12993_v10 = vld [vmem:[#allocation40_spill] sm:$0xff]  ;;  %v12996_v22 = vand.u32 4294901760, %v12995_v2  ;;  %v12136_v38 = vand.u32 4294901760, %v9599_v43  ;;  %v13005_v2 = vand.u32 4294901760, %v12797_v5 }
 0x2ed   : > { %6141 = vmatprep.subr.bf16.mxu0 %v6140_v6  ;;  %v12994_v21 = vand.u32 4294901760, %v12993_v10  ;;  %v12997_v6 = vld [vmem:[#allocation117_spill] sm:$0xff] }
 0x2ee   : > { %1735 = vmatmul.mubr.f32.gmra.mrb[30].mxu1 %v12992_v41  ;;  %v12998_v29 = vand.u32 4294901760, %v12997_v6 }
 0x2ef   : > { %4095 = vmatmul.mubr.f32.gmra.mrb[34].mxu0 %v12125_v63  ;;  %1837 = vmatprep.mubr.f32.mxu1 %v12524_v58  ;;  %v5818_v24 = vpack.c.bf16 %v12996_v22, %v12994_v21  ;;  %v13001_v63 = vld [vmem:[#allocation122_spill] sm:$0xff]  ;;  %v12135_v21 = vand.u32 4294901760, %v9609_v34  ;;  %v13006_v22 = vld [vmem:[#allocation44_spill] sm:$0xff] }
 0x2f0   : > { %4103 = vmatprep.mubr.f32.mxu0 %v12132_v42  ;;  %6143 = vmatpush1.bf16.msra.mxu0 %v6142_v33  ;;  %v6146_v12 = vpack.c.bf16 %v13000_v32, %v12998_v29  ;;  %v13002_v52 = vand.u32 4294901760, %v13001_v63  ;;  %v13007_v33 = vand.u32 4294901760, %v13006_v22  ;;  %v13008_v42 = vld [vmem:[#allocation45_spill] sm:$0xff]  ;;  %v12153_v63 = vand.u32 4294901760, %v9630_v16 }
 0x2f1   : > { %6145 = vmatprep.subr.bf16.mxu0 %v6144_v31  ;;  %v13009_v6 = vand.u32 4294901760, %v13008_v42  ;;  %v13010_v31 = vld [vmem:[#allocation125_spill] sm:$0xff]  ;;  %v13014_v42 = vld [vmem:[#allocation47_spill] sm:$0xff] }
 0x2f2   : > { %v6148_v10 = vpack.c.bf16 %v13004_v1, %v13002_v52  ;;  %1841 = vmatmul.mubr.f32.vlgmr.msra.gmra.mrb[0].mxu1 %v13005_v2  ;;  %v13011_v39 = vand.u32 4294901760, %v13010_v31  ;;  %v13012_v52 = vld [vmem:[#allocation126_spill] sm:$0xff]  ;;  %v13015_v29 = vand.u32 4294901760, %v13014_v42  ;;  %v13022_v31 = vand.u32 4294901760, %v12809_v40 }
 0x2f3   : > { %v5820_v18 = vpack.c.bf16 %v13009_v6, %v13007_v33  ;;  %5819 = vmatpush1.bf16.msra.mxu1 %v5818_v24  ;;  %4107 = vmatmul.mubr.f32.gmra.mrb[36].mxu0 %v12136_v38  ;;  %v13013_v5 = vand.u32 4294901760, %v13012_v52  ;;  %v13016_v24 = vld [vmem:[#allocation48_spill] sm:$0xff]  ;;  %v13018_v2 = vld [vmem:[#allocation134_spill] sm:$0xff]  ;;  %v13020_v33 = vld [vmem:[#allocation137_spill] sm:$0xff]  ;;  %v13027_v40 = vand.u32 4294901760, %v12680_v49  ;;  %v13028_v42 = vand.u32 4294901760, %v12681_v14 }
 0x2f4   : > { %4115 = vmatprep.mubr.f32.mxu0 %v12135_v21  ;;  %6147 = vmatpush1.bf16.msra.mxu0 %v6146_v12  ;;  %v13017_v46 = vand.u32 4294901760, %v13016_v24  ;;  %v13019_v22 = vand.u32 4294901760, %v13018_v2  ;;  %v13021_v6 = vand.u32 4294901760, %v13020_v33  ;;  %v13023_v52 = vld [vmem:[#allocation49_spill] sm:$0xff]  ;;  %v13025_v21 = vld [vmem:[#allocation51_spill] sm:$0xff]  ;;  %v12143_v49 = vand.u32 4294901760, %v9672_v60 }
 0x2f5   : > { %v6150_v1 = vpack.c.bf16 %v13013_v5, %v13011_v39  ;;  %1846 = vmatprep.mubr.f32.mxu1 %v12524_v58  ;;  %6149 = vmatprep.subr.bf16.mxu0 %v6148_v10  ;;  %v12150_v39 = vand.u32 4294901760, %v9640_v19  ;;  %v13024_v5 = vand.u32 4294901760, %v13023_v52  ;;  %v13026_v10 = vand.u32 4294901760, %v13025_v21  ;;  %v13029_v21 = vld [vmem:[#allocation140_spill] sm:$0xff]  ;;  %v13033_v33 = vld [vmem:[#allocation69_spill] sm:$0xff]  ;;  %v13038_v14 = vld [vmem:[#allocation71_spill] sm:$0xff] }
 0x2f6   : > { %v5822_v32 = vpack.c.bf16 %v13017_v46, %v13015_v29  ;;  %v6152_v12 = vpack.c.bf16 %v13021_v6, %v13019_v22  ;;  %1850 = vmatmul.mubr.f32.gmra.mrb[2].mxu1 %v13022_v31  ;;  %5821 = vmatprep.subr.bf16.mxu1 %v5820_v18  ;;  %v6154_v29 = vpack.c.bf16 %v13028_v42, %v13027_v40  ;;  %v12146_v18 = vand.u32 4294901760, %v9662_v50  ;;  %v13031_v46 = vld [vmem:[#allocation141_spill] sm:$0xff]  ;;  %v13035_v31 = vld [vmem:[#allocation70_spill] sm:$0xff] }
 0x2f7   : > { %v5824_v38 = vpack.c.bf16 %v13026_v10, %v13024_v5  ;;  %4119 = vmatmul.mubr.f32.gmra.mrb[38].mxu0 %v12153_v63  ;;  %1855 = vmatprep.mubr.f32.mxu1 %v12524_v58  ;;  %v13030_v24 = vand.u32 4294901760, %v13029_v21  ;;  %v13032_v2 = vand.u32 4294901760, %v13031_v46  ;;  %v13034_v6 = vand.u32 4294901760, %v13033_v33  ;;  %v13040_v10 = vld [vmem:[#allocation72_spill] sm:$0xff]  ;;  %v13045_v33 = vld [vmem:[#allocation149_spill] sm:$0xff] }
 0x2f8   : > { %4127 = vmatprep.mubr.f32.mxu0 %v12150_v39  ;;  %6151 = vmatpush1.bf16.msra.mxu0 %v6150_v1  ;;  %v13036_v52 = vand.u32 4294901760, %v13035_v31  ;;  %v13037_v1 = vand.u32 4294901760, %v12822_v54  ;;  %v10123_v42 = vpop.f32.mrb[0].mxu0  ;;  %v13043_v21 = vand.u32 4294901760, %v12690_v37  ;;  %v12142_v46 = vand.u32 4294901760, %v9693_v36 }
 0x2f9   : > { %5823 = vmatpush1.bf16.msra.mxu1 %v5822_v32  ;;  %6153 = vmatprep.subr.bf16.mxu0 %v6152_v12  ;;  %v6156_v22 = vpack.c.bf16 %v13032_v2, %v13030_v24  ;;  %v13039_v32 = vand.u32 4294901760, %v13038_v14  ;;  %v13041_v12 = vand.u32 4294901760, %v13040_v10  ;;  %v10127_v54 = vpop.f32.mrb[1].mxu0  ;;  %v13044_v2 = vand.u32 4294901760, %v12693_v47  ;;  %v13049_v14 = vld [vmem:[#allocation77_spill] sm:$0xff] }
 0x2fa   : > { %v5826_v5 = vpack.c.bf16 %v13036_v52, %v13034_v6  ;;  %1859 = vmatmul.mubr.f32.gmra.mrb[4].mxu1 %v13037_v1  ;;  %5825 = vmatprep.subr.bf16.mxu1 %v5824_v38  ;;  %v13042_v38 = vand.u32 4294901760, %v12689_v53  ;;  %v13046_v6 = vand.u32 4294901760, %v13045_v33  ;;  %v13047_v52 = vld [vmem:[#allocation76_spill] sm:$0xff]  ;;  %v13051_v10 = vand.u32 4294901760, %v12835_v59 }
 0x2fb   : > { %v5828_v40 = vpack.c.bf16 %v13041_v12, %v13039_v32  ;;  %4131 = vmatmul.mubr.f32.gmra.mrb[40].mxu0 %v12146_v18  ;;  %1864 = vmatprep.mubr.f32.mxu1 %v12524_v58  ;;  %v13048_v1 = vand.u32 4294901760, %v13047_v52  ;;  %v12141_v53 = vand.u32 4294901760, %v9704_v57  ;;  %v13052_v37 = vand.u32 4294901760, %v7619_v45 }
 0x2fc   : > { %4139 = vmatprep.mubr.f32.mxu0 %v12143_v49  ;;  %6155 = vmatpush1.bf16.msra.mxu0 %v6154_v29  ;;  %v6158_v24 = vpack.c.bf16 %v13043_v21, %v13042_v38  ;;  %v6160_v31 = vpack.c.bf16 %v13046_v6, %v13044_v2  ;;  %v13050_v29 = vand.u32 4294901760, %v13049_v14  ;;  %v13055_v38 = vld [vmem:[#allocation153_spill] sm:$0xff]  ;;  %v13057_v21 = vld [vmem:[#allocation154_spill] sm:$0xff]  ;;  %v12138_v33 = vand.u32 4294901760, %v9725_v13  ;;  %v13059_v6 = vld [vmem:[#allocation156_spill] sm:$0xff] }
 0x2fd   : > { %6157 = vmatprep.subr.bf16.mxu0 %v6156_v22  ;;  %5827 = vmatpush1.bf16.msra.mxu1 %v5826_v5  ;;  %v13053_v22 = vld [vmem:[#allocation78_spill] sm:$0xff]  ;;  %v10152_v47 = vpop.f32.mrb[2].mxu0  ;;  %v13058_v45 = vand.u32 4294901760, %v13057_v21  ;;  %v13060_v52 = vand.u32 4294901760, %v13059_v6  ;;  %v13122_v18 = vand.u32 4294901760, %v12897_v3  ;;  %v13128_v3 = vld [vmem:[#allocation197_spill] sm:$0xff] }
 0x2fe   : > { %v5830_v32 = vpack.c.bf16 %v13050_v29, %v13048_v1  ;;  %1868 = vmatmul.mubr.f32.gmra.mrb[6].mxu1 %v13051_v10  ;;  %5829 = vmatprep.subr.bf16.mxu1 %v5828_v40  ;;  %v13054_v5 = vand.u32 4294901760, %v13053_v22  ;;  %v10156_v59 = vpop.f32.mrb[3].mxu0  ;;  %v13056_v40 = vand.u32 4294901760, %v13055_v38  ;;  %v13061_v1 = vld [vmem:[#allocation157_spill] sm:$0xff]  ;;  %v13063_v10 = vand.u32 4294901760, %v12704_v55 }
 0x2ff   : > { %4143 = vmatmul.mubr.f32.gmra.mrb[42].mxu0 %v12142_v46  ;;  %1873 = vmatprep.mubr.f32.mxu1 %v12524_v58  ;;  %v13062_v14 = vand.u32 4294901760, %v13061_v1  ;;  %v13065_v22 = vand.u32 4294901760, %v12850_v27  ;;  %v13066_v38 = vand.u32 4294901760, %v7653_v17  ;;  %v13068_v27 = vld [vmem:[#allocation160_spill] sm:$0xff] }
 0x300   : > { %v5832_v12 = vpack.c.bf16 %v13054_v5, %v13052_v37  ;;  %4151 = vmatprep.mubr.f32.mxu0 %v12141_v53  ;;  %6159 = vmatpush1.bf16.msra.mxu0 %v6158_v24  ;;  %v6162_v2 = vpack.c.bf16 %v13058_v45, %v13056_v40  ;;  %v13064_v24 = vand.u32 4294901760, %v12566_v56  ;;  %v12137_v5 = vand.u32 4294901760, %v9736_v9  ;;  %v13072_v45 = vld [vmem:[#allocation169_spill] sm:$0xff]  ;;  %v13101_v53 = vld [vmem:[#allocation67_spill] sm:$0xff] }
 0x301   : > { %6161 = vmatprep.subr.bf16.mxu0 %v6160_v31  ;;  %v6164_v29 = vpack.c.bf16 %v13062_v14, %v13060_v52  ;;  %5831 = vmatpush1.bf16.msra.mxu1 %v5830_v32  ;;  %v13067_v31 = vand.u32 4294901760, %v7658_v30  ;;  %v10181_v55 = vpop.f32.mrb[4].mxu0  ;;  %v13069_v32 = vand.u32 4294901760, %v13068_v27  ;;  %v12140_v30 = vand.u32 4294901760, %v9757_v23  ;;  %v13074_v52 = vld [vmem:[#allocation170_spill] sm:$0xff]  ;;  %v13082_v27 = vld [vmem:[#allocation43_spill] sm:$0xff] }
 0x302   : > { %v5834_v37 = vpack.c.bf16 %v13064_v24, %v13063_v10  ;;  %1877 = vmatmul.mubr.f32.gmra.mrb[8].mxu1 %v13065_v22  ;;  %5833 = vmatprep.subr.bf16.mxu1 %v5832_v12  ;;  %v10185_v56 = vpop.f32.mrb[5].mxu0  ;;  %v13070_v12 = vld [vmem:[#allocation161_spill] sm:$0xff]  ;;  %v13073_v6 = vand.u32 4294901760, %v13072_v45  ;;  %v13075_v1 = vand.u32 4294901760, %v13074_v52  ;;  %v13076_v10 = vld [vmem:[#allocation84_spill] sm:$0xff]  ;;  %v13102_v46 = vand.u32 4294901760, %v13101_v53 }
 0x303   : > { %v5836_v40 = vpack.c.bf16 %v13067_v31, %v13066_v38  ;;  %4155 = vmatmul.mubr.f32.gmra.mrb[44].mxu0 %v12138_v33  ;;  %1882 = vmatprep.mubr.f32.mxu1 %v12524_v58  ;;  %v13071_v17 = vand.u32 4294901760, %v13070_v12  ;;  %v13077_v24 = vand.u32 4294901760, %v13076_v10  ;;  %v13078_v22 = vld [vmem:[#allocation85_spill] sm:$0xff]  ;;  %v13080_v31 = vld [vmem:[#allocation82_spill] sm:$0xff]  ;;  %v12139_v12 = vand.u32 4294901760, %v13082_v27  ;;  %v13110_v53 = vld [vmem:[#allocation180_spill] sm:$0xff] }
 0x304   : > { %4163 = vmatprep.mubr.f32.mxu0 %v12137_v5  ;;  %6163 = vmatpush1.bf16.msra.mxu0 %v6162_v2  ;;  %v6168_v14 = vpack.c.bf16 %v13075_v1, %v13073_v6  ;;  %v13079_v2 = vand.u32 4294901760, %v13078_v22  ;;  %v13081_v5 = vand.u32 4294901760, %v13080_v31  ;;  %v13089_v6 = vld [vmem:[#allocation174_spill] sm:$0xff]  ;;  %v13091_v52 = vld [vmem:[#allocation177_spill] sm:$0xff] }
 0x305   : > { %v6166_v21 = vpack.c.bf16 %v13071_v17, %v13069_v32  ;;  %6165 = vmatprep.subr.bf16.mxu0 %v6164_v29  ;;  %5835 = vmatpush1.bf16.msra.mxu1 %v5834_v37  ;;  %v13083_v32 = vld [vmem:[#allocation86_spill] sm:$0xff]  ;;  %v13085_v29 = vld [vmem:[#allocation87_spill] sm:$0xff]  ;;  %v10210_v37 = vpop.f32.mrb[6].mxu0  ;;  %v13092_v1 = vand.u32 4294901760, %v13091_v52 }
 0x306   : > { %v5838_v38 = vpack.c.bf16 %v13079_v2, %v13077_v24  ;;  %1886 = vmatmul.mubr.f32.gmra.mrb[10].mxu1 %v13081_v5  ;;  %5837 = vmatprep.subr.bf16.mxu1 %v5836_v40  ;;  %v13084_v17 = vand.u32 4294901760, %v13083_v32  ;;  %v13086_v33 = vand.u32 4294901760, %v13085_v29  ;;  %13087 = vst [vmem:[#allocation57_spill] sm:$0xff] %v10210_v37  ;;  %v10214_v5 = vpop.f32.mrb[7].mxu0  ;;  %v13090_v40 = vand.u32 4294901760, %v13089_v6  ;;  %v13093_v24 = vld [vmem:[#allocation178_spill] sm:$0xff] }
 0x307   : > { %4167 = vmatmul.mubr.f32.gmra.mrb[46].mxu0 %v12140_v30  ;;  %1891 = vmatprep.mubr.f32.mxu1 %v12524_v58  ;;  %13088 = vst [vmem:[#allocation152_spill] sm:$0xff] %v10214_v5  ;;  %v13094_v22 = vand.u32 4294901760, %v13093_v24  ;;  %v13095_v2 = vld [vmem:[#allocation179_spill] sm:$0xff]  ;;  %v13103_v6 = vld [vmem:[#allocation46_spill] sm:$0xff] }
 0x308   : > { %v5840_v45 = vpack.c.bf16 %v13086_v33, %v13084_v17  ;;  %4175 = vmatprep.mubr.f32.mxu0 %v12139_v12  ;;  %6167 = vmatpush1.bf16.msra.mxu0 %v6166_v21  ;;  %v6170_v10 = vpack.c.bf16 %v13092_v1, %v13090_v40  ;;  %v12145_v33 = vand.u32 4294901760, %v9789_v61  ;;  %v13096_v31 = vand.u32 4294901760, %v13095_v2  ;;  %v13097_v17 = vld [vmem:[#allocation89_spill] sm:$0xff]  ;;  %v13099_v12 = vld [vmem:[#allocation90_spill] sm:$0xff]  ;;  %v13104_v40 = vld [vmem:[#allocation91_spill] sm:$0xff] }
 0x309   : > { %6169 = vmatprep.subr.bf16.mxu0 %v6168_v14  ;;  %5839 = vmatpush1.bf16.msra.mxu1 %v5838_v38  ;;  %v13098_v29 = vand.u32 4294901760, %v13097_v17  ;;  %v13100_v21 = vand.u32 4294901760, %v13099_v12  ;;  %v12144_v52 = vand.u32 4294901760, %v13103_v6  ;;  %v13105_v1 = vand.u32 4294901760, %v13104_v40  ;;  %v13106_v14 = vld [vmem:[#allocation92_spill] sm:$0xff]  ;;  %v10239_v38 = vpop.f32.mrb[8].mxu0 }
 0x30a   : > { %v6172_v32 = vpack.c.bf16 %v13096_v31, %v13094_v22  ;;  %1895 = vmatmul.mubr.f32.gmra.mrb[12].mxu1 %v13102_v46  ;;  %5841 = vmatprep.subr.bf16.mxu1 %v5840_v45  ;;  %v13107_v49 = vand.u32 4294901760, %v13106_v14  ;;  %13108 = vst [vmem:[#allocation155_spill] sm:$0xff] %v10239_v38  ;;  %v10243_v46 = vpop.f32.mrb[9].mxu0  ;;  %v13111_v12 = vand.u32 4294901760, %v13110_v53  ;;  %v13112_v45 = vld [vmem:[#allocation183_spill] sm:$0xff]  ;;  %v13114_v31 = vld [vmem:[#allocation192_spill] sm:$0xff] }
 0x30b   : > { %v5842_v30 = vpack.c.bf16 %v13100_v21, %v13098_v29  ;;  %4179 = vmatmul.mubr.f32.gmra.mrb[48].mxu0 %v12145_v33  ;;  %1900 = vmatprep.mubr.f32.mxu1 %v12524_v58  ;;  %13109 = vst [vmem:[#allocation162_spill] sm:$0xff] %v10243_v46  ;;  %v13113_v22 = vand.u32 4294901760, %v13112_v45  ;;  %v13115_v17 = vand.u32 4294901760, %v13114_v31  ;;  %v13116_v29 = vld [vmem:[#allocation193_spill] sm:$0xff]  ;;  %v13123_v53 = vld [vmem:[#allocation52_spill] sm:$0xff]  ;;  %v13130_v31 = vld [vmem:[#allocation198_spill] sm:$0xff] }
 0x30c   : > { %v5844_v24 = vpack.c.bf16 %v13107_v49, %v13105_v1  ;;  %4187 = vmatprep.mubr.f32.mxu0 %v12144_v52  ;;  %6171 = vmatpush1.bf16.msra.mxu0 %v6170_v10  ;;  %v12149_v49 = vand.u32 4294901760, %v9821_v11  ;;  %v13117_v21 = vand.u32 4294901760, %v13116_v29  ;;  %v13118_v1 = vld [vmem:[#allocation94_spill] sm:$0xff]  ;;  %v13120_v52 = vld [vmem:[#allocation95_spill] sm:$0xff]  ;;  %v12147_v45 = vand.u32 4294901760, %v13123_v53  ;;  %v13288_v38 = vld [vmem:[#allocation97_spill] sm:$0xff] }
 0x30d   : > { %v6174_v2 = vpack.c.bf16 %v13113_v22, %v13111_v12  ;;  %6173 = vmatprep.subr.bf16.mxu0 %v6172_v32  ;;  %5843 = vmatpush1.bf16.msra.mxu1 %v5842_v30  ;;  %v13119_v14 = vand.u32 4294901760, %v13118_v1  ;;  %v13121_v10 = vand.u32 4294901760, %v13120_v52  ;;  %v13126_v52 = vld [vmem:[#allocation196_spill] sm:$0xff]  ;;  %v13132_v29 = vld [vmem:[#allocation199_spill] sm:$0xff]  ;;  %v13289_v5 = vand.u32 4294901760, %v13288_v38 }
 0x30e   : > { %v6176_v40 = vpack.c.bf16 %v13117_v21, %v13115_v17  ;;  %1904 = vmatmul.mubr.f32.gmra.mrb[14].mxu1 %v13122_v18  ;;  %5845 = vmatprep.subr.bf16.mxu1 %v5844_v24  ;;  %v10264_v32 = vpop.f32.mrb[10].mxu0  ;;  %v13127_v12 = vand.u32 4294901760, %v13126_v52  ;;  %v13129_v18 = vand.u32 4294901760, %v13128_v3  ;;  %v12148_v24 = vand.u32 4294901760, %v9857_v28 }
 0x30f   : > { %v5846_v33 = vpack.c.bf16 %v13121_v10, %v13119_v14  ;;  %4191 = vmatmul.mubr.f32.gmra.mrb[50].mxu0 %v12149_v49  ;;  %1909 = vmatprep.mubr.f32.mxu1 %v12524_v58  ;;  %13124 = vst [vmem:[#allocation163_spill] sm:$0xff] %v10264_v32  ;;  %v10268_v30 = vpop.f32.mrb[11].mxu0  ;;  %v13131_v17 = vand.u32 4294901760, %v13130_v31  ;;  %v13133_v21 = vand.u32 4294901760, %v13132_v29  ;;  %v13134_v14 = vand.u32 4294901760, %v12915_v51  ;;  %v13147_v49 = vld [vmem:[#allocation165_spill] sm:$0xff] }
 0x310   : > { %4199 = vmatprep.mubr.f32.mxu0 %v12147_v45  ;;  %6175 = vmatpush1.bf16.msra.mxu0 %v6174_v2  ;;  %13125 = vst [vmem:[#allocation59_spill] sm:$0xff] %v10268_v30  ;;  %v6178_v22 = vpack.c.bf16 %v13129_v18, %v13127_v12  ;;  %v13135_v2 = vld [vmem:[#allocation135_spill] sm:$0xff]  ;;  %v13141_v12 = vld [vmem:[#allocation201_spill] sm:$0xff]  ;;  %v12152_v31 = vand.u32 4294901760, %v9888_v20  ;;  %v13148_v39 = vand.u32 4294901760, %v13147_v49  ;;  %v2834_v37 = vsub.f32 %v13288_v38, %v13289_v5 }
 0x311   : > { %6177 = vmatprep.subr.bf16.mxu0 %v6176_v40  ;;  %v6180_v1 = vpack.c.bf16 %v13133_v21, %v13131_v17  ;;  %5847 = vmatpush1.bf16.msra.mxu1 %v5846_v33  ;;  %v12151_v10 = vand.u32 4294901760, %v13135_v2  ;;  %v13136_v45 = vld [vmem:[#allocation63_spill] sm:$0xff]  ;;  %v13139_v33 = vld [vmem:[#allocation200_spill] sm:$0xff]  ;;  %v13142_v3 = vand.u32 4294901760, %v13141_v12  ;;  %v13145_v21 = vld [vmem:[#allocation209_spill] sm:$0xff] }
 0x312   : > { %1913 = vmatmul.mubr.f32.gmra.mrb[16].mxu1 %v13134_v14  ;;  %5881 = vmatprep.subr.bf16.mxu1 %v13136_v45  ;;  %v10286_v52 = vpop.f32.mrb[12].mxu0  ;;  %v13140_v51 = vand.u32 4294901760, %v13139_v33  ;;  %v13143_v17 = vld [vmem:[#allocation208_spill] sm:$0xff]  ;;  %v13146_v14 = vand.u32 4294901760, %v13145_v21  ;;  %v13277_v30 = vld [vmem:[#allocation147_spill] sm:$0xff]  ;;  %v2835_v5 = vand.u32 4294901760, %v2834_v37 }
 0x313   : > { %4203 = vmatmul.mubr.f32.gmra.mrb[52].mxu0 %v12148_v24  ;;  %1918 = vmatprep.mubr.f32.mxu1 %v12524_v58  ;;  %13137 = vst [vmem:[#allocation60_spill] sm:$0xff] %v10286_v52  ;;  %v10290_v40 = vpop.f32.mrb[13].mxu0  ;;  %v13144_v29 = vand.u32 4294901760, %v13143_v17  ;;  %v12155_v17 = vand.u32 4294901760, %v9918_v8  ;;  %v13271_v52 = vld [vmem:[#allocation55_spill] sm:$0xff] }
 0x314   : > { %4211 = vmatprep.mubr.f32.mxu0 %v12151_v10  ;;  %6179 = vmatpush1.bf16.msra.mxu0 %v6178_v22  ;;  %13138 = vst [vmem:[#allocation164_spill] sm:$0xff] %v10290_v40  ;;  %v6182_v18 = vpack.c.bf16 %v13142_v3, %v13140_v51  ;;  %v13149_v10 = vld [vmem:[#allocation144_spill] sm:$0xff]  ;;  %v13152_v51 = vld [vmem:[#allocation213_spill] sm:$0xff]  ;;  %v13154_v3 = vld [vmem:[#allocation215_spill] sm:$0xff] }
 0x315   : > { %6181 = vmatprep.subr.bf16.mxu0 %v6180_v1  ;;  %v6184_v24 = vpack.c.bf16 %v13146_v14, %v13144_v29  ;;  %v12154_v22 = vand.u32 4294901760, %v13149_v10  ;;  %v13153_v12 = vand.u32 4294901760, %v13152_v51  ;;  %v13155_v49 = vand.u32 4294901760, %v13154_v3  ;;  %v13156_v29 = vld [vmem:[#allocation219_spill] sm:$0xff]  ;;  %v13158_v14 = vld [vmem:[#allocation222_spill] sm:$0xff] }
 0x316   : > { %1922 = vmatmul.mubr.f32.gmra.mrb[18].mxu1 %v13148_v39  ;;  %v10307_v33 = vpop.f32.mrb[14].mxu0  ;;  %v13157_v21 = vand.u32 4294901760, %v13156_v29  ;;  %v13167_v3 = vld [vmem:[#allocation230_spill] sm:$0xff]  ;;  %v13169_v29 = vld [vmem:[#allocation136_spill] sm:$0xff]  ;;  %v13281_v32 = vld [vmem:[#allocation151_spill] sm:$0xff] }
 0x317   : > { %4215 = vmatmul.mubr.f32.gmra.mrb[54].mxu0 %v12152_v31  ;;  %1927 = vmatprep.mubr.f32.mxu1 %v12524_v58  ;;  %13150 = vst [vmem:[#allocation166_spill] sm:$0xff] %v10307_v33  ;;  %v10311_v1 = vpop.f32.mrb[15].mxu0  ;;  %v6186_v39 = vpack.c.bf16 %v13155_v49, %v13153_v12  ;;  %v13159_v31 = vand.u32 4294901760, %v13158_v14  ;;  %v13160_v33 = vld [vmem:[#allocation83_spill] sm:$0xff]  ;;  %v12156_v49 = vand.u32 4294901760, %v9948_v7 }
 0x318   : > { %4223 = vmatprep.mubr.f32.mxu0 %v12154_v22  ;;  %6183 = vmatpush1.bf16.msra.mxu0 %v6182_v18  ;;  %13151 = vst [vmem:[#allocation167_spill] sm:$0xff] %v10311_v1  ;;  %v13161_v40 = vand.u32 4294901760, %v13160_v33  ;;  %v13162_v22 = vld [vmem:[#allocation146_spill] sm:$0xff]  ;;  %v13165_v12 = vld [vmem:[#allocation223_spill] sm:$0xff]  ;;  %v13168_v33 = vand.u32 4294901760, %v13167_v3 }
 0x319   : > { %6185 = vmatprep.subr.bf16.mxu0 %v6184_v24  ;;  %v6188_v63 = vpack.c.bf16 %v13159_v31, %v13157_v21  ;;  %v12157_v18 = vand.u32 4294901760, %v13162_v22  ;;  %v13166_v31 = vand.u32 4294901760, %v13165_v12  ;;  %v13170_v21 = vand.u32 4294901760, %v13169_v29  ;;  %v13171_v14 = vld [vmem:[#allocation235_spill] sm:$0xff]  ;;  %v13178_v3 = vld [vmem:[#allocation242_spill] sm:$0xff] }
 0x31a   : > { %1931 = vmatmul.mubr.f32.gmra.mrb[20].mxu1 %v13161_v40  ;;  %v10328_v51 = vpop.f32.mrb[16].mxu0  ;;  %v13180_v29 = vld [vmem:[#allocation158_spill] sm:$0xff] }
 0x31b   : > { %4227 = vmatmul.mubr.f32.gmra.mrb[56].mxu0 %v12155_v17  ;;  %1936 = vmatprep.mubr.f32.mxu1 %v12524_v58  ;;  %13163 = vst [vmem:[#allocation171_spill] sm:$0xff] %v10328_v51  ;;  %v10332_v24 = vpop.f32.mrb[17].mxu0  ;;  %v6190_v40 = vpack.c.bf16 %v13168_v33, %v13166_v31  ;;  %v13172_v17 = vand.u32 4294901760, %v13171_v14  ;;  %v13173_v51 = vand.u32 4294901760, %v12957_v0  ;;  %v13176_v31 = vld [vmem:[#allocation237_spill] sm:$0xff]  ;;  %v13179_v0 = vand.u32 4294901760, %v13178_v3 }
 0x31c   : > { %4235 = vmatprep.mubr.f32.mxu0 %v12157_v18  ;;  %6187 = vmatpush1.bf16.msra.mxu0 %v6186_v39  ;;  %13164 = vst [vmem:[#allocation62_spill] sm:$0xff] %v10332_v24  ;;  %v12161_v39 = vand.u32 4294901760, %v9958_v62  ;;  %v12160_v33 = vand.u32 4294901760, %v9978_v4  ;;  %v13182_v14 = vld [vmem:[#allocation244_spill] sm:$0xff]  ;;  %v13189_v3 = vld [vmem:[#allocation159_spill] sm:$0xff]  ;;  %v13265_v24 = vld [vmem:[#allocation53_spill] sm:$0xff] }
 0x31d   : > { %6189 = vmatprep.subr.bf16.mxu0 %v6188_v63  ;;  %v6192_v1 = vpack.c.bf16 %v13172_v17, %v13170_v21  ;;  %v13177_v17 = vand.u32 4294901760, %v13176_v31  ;;  %v13181_v21 = vand.u32 4294901760, %v13180_v29  ;;  %v13191_v29 = vand.u32 4294901760, %v9106_v35 }
 0x31e   : > { %1940 = vmatmul.mubr.f32.gmra.mrb[22].mxu1 %v13173_v51  ;;  %v10349_v12 = vpop.f32.mrb[18].mxu0 }
 0x31f   : > { %4239 = vmatmul.mubr.f32.gmra.mrb[58].mxu0 %v12156_v49  ;;  %1945 = vmatprep.mubr.f32.mxu1 %v12524_v58  ;;  %13174 = vst [vmem:[#allocation65_spill] sm:$0xff] %v10349_v12  ;;  %v10353_v63 = vpop.f32.mrb[19].mxu0  ;;  %v6194_v51 = vpack.c.bf16 %v13179_v0, %v13177_v17  ;;  %v13183_v49 = vand.u32 4294901760, %v13182_v14  ;;  %v13184_v12 = vand.u32 4294901760, %v9070_v48  ;;  %v13187_v17 = vld [vmem:[#allocation61_spill] sm:$0xff]  ;;  %v13190_v48 = vand.u32 4294901760, %v13189_v3 }
 0x320   : > { %4247 = vmatprep.mubr.f32.mxu0 %v12161_v39  ;;  %6191 = vmatpush1.bf16.msra.mxu0 %v6190_v40  ;;  %13175 = vst [vmem:[#allocation173_spill] sm:$0xff] %v10353_v63  ;;  %v12159_v40 = vand.u32 4294901760, %v9988_v15  ;;  %v12158_v0 = vand.u32 4294901760, %v10004_v44  ;;  %v13194_v14 = vld [vmem:[#allocation217_spill] sm:$0xff]  ;;  %v13199_v3 = vld [vmem:[#allocation64_spill] sm:$0xff]  ;;  %v13259_v63 = vld [vmem:[#allocation50_spill] sm:$0xff] }
 0x321   : > { %6193 = vmatprep.subr.bf16.mxu0 %v6192_v1  ;;  %v6196_v18 = vpack.c.bf16 %v13183_v49, %v13181_v21  ;;  %v13188_v49 = vand.u32 4294901760, %v13187_v17  ;;  %v13211_v39 = vld [vmem:[#allocation105_spill] sm:$0xff] }
 0x322   : > { %1949 = vmatmul.mubr.f32.gmra.mrb[24].mxu1 %v13184_v12  ;;  %v10370_v31 = vpop.f32.mrb[20].mxu0 }
 0x323   : > { %4251 = vmatmul.mubr.f32.gmra.mrb[60].mxu0 %v12160_v33  ;;  %1954 = vmatprep.mubr.f32.mxu1 %v12524_v58  ;;  %13185 = vst [vmem:[#allocation176_spill] sm:$0xff] %v10370_v31  ;;  %v10374_v1 = vpop.f32.mrb[21].mxu0  ;;  %v6198_v12 = vpack.c.bf16 %v13190_v48, %v13188_v49  ;;  %v13202_v48 = vand.u32 4294901760, %v12992_v41  ;;  %v13207_v41 = vld [vmem:[#allocation102_spill] sm:$0xff]  ;;  %v13253_v31 = vld [vmem:[#allocation131_spill] sm:$0xff]  ;;  %v13297_v49 = vand.u32 4294901760, %v9599_v43 }
 0x324   : > { %4259 = vmatprep.mubr.f32.mxu0 %v12159_v40  ;;  %6195 = vmatpush1.bf16.msra.mxu0 %v6194_v51  ;;  %13186 = vst [vmem:[#allocation181_spill] sm:$0xff] %v10374_v1  ;;  %v13192_v51 = vmov 1.0   ;;  %v13247_v1 = vld [vmem:[#allocation129_spill] sm:$0xff] }
 0x325   : > { %6197 = vmatprep.subr.bf16.mxu0 %v6196_v18  ;;  %v13196_v18 = vand.u32 4294901760, %v12983_v26  ;;  %v13201_v26 = vld [vmem:[#allocation98_spill] sm:$0xff] }
 0x326   : > { %1958 = vmatmul.mubr.f32.gmra.mrb[26].mxu1 %v13191_v29 }
 0x327   : > { %4263 = vmatmul.mubr.f32.gmra.mrb[62].mxu0 %v12158_v0  ;;  %1963 = vmatprep.mubr.f32.mxu1 %v12524_v58 }
 0x328   : > { %6199 = vmatpush1.bf16.msra.mxu0 %v6198_v12  ;;  %5616 = vmatprep.mubr.msk.f32.mxu0 %vm2538_vm0, %v13192_v51 }
 0x329   : > { %v10390_v17 = vpop.f32.mrb[22].mxu0  ;;  %6201 = vmatprep.subr.bf16.mxu0 %v13136_v45 }
 0x32a   : > { %13195 = vst [vmem:[#allocation182_spill] sm:$0xff] %v10390_v17  ;;  %1967 = vmatmul.mubr.f32.gmra.mrb[28].mxu1 %v13196_v18  ;;  %v10395_v35 = vpop.f32.mrb[23].mxu0  ;;  %v13205_v18 = vld [vmem:[#allocation100_spill] sm:$0xff]  ;;  %v13241_v17 = vld [vmem:[#allocation127_spill] sm:$0xff] }
 0x32b   : > { %13197 = vst [vmem:[#allocation68_spill] sm:$0xff] %v10395_v35  ;;  %5617 = vmatmul.mubr.msk.f32.vlgmr.msra.gmra.mrb[32].mxu0 %vm2537_vm1, %v13192_v51  ;;  %1972 = vmatprep.mubr.f32.mxu1 %v12524_v58  ;;  %v13235_v35 = vld [vmem:[#allocation121_spill] sm:$0xff] }
 0x32c   : > { %5618 = vmatprep.mubr.msk.f32.mxu0 %vm2540_vm2, %v13192_v51  ;;  %6203 = vmatpush1.bf16.msra.mxu0 %v13199_v3 }
 0x32d   : > { %v10407_v45 = vpop.f32.mrb[24].mxu0  ;;  %6205 = vmatprep.subr.bf16.mxu0 %v13201_v26 }
 0x32e   : > { %13200 = vst [vmem:[#allocation175_spill] sm:$0xff] %v10407_v45  ;;  %1976 = vmatmul.mubr.f32.gmra.mrb[30].mxu1 %v13202_v48  ;;  %v10412_v12 = vpop.f32.mrb[25].mxu0  ;;  %v13208_v48 = vld [vmem:[#allocation224_spill] sm:$0xff]  ;;  %v13222_v45 = vld [vmem:[#allocation103_spill] sm:$0xff] }
 0x32f   : > { %13203 = vst [vmem:[#allocation75_spill] sm:$0xff] %v10412_v12  ;;  %5619 = vmatmul.mubr.msk.f32.gmra.mrb[34].mxu0 %vm2539_vm3, %v13192_v51  ;;  %2142 = vmatprep.mubr.f32.mxu1 %v12524_v58  ;;  %vm13226_vm11 = vcmp.eq.s32.totalorder %v13222_v45, %v9135_v25 }
 0x330   : > { %5620 = vmatprep.mubr.msk.f32.mxu0 %vm2542_vm4, %v13192_v51  ;;  %6207 = vmatpush1.bf16.msra.mxu0 %v13205_v18 }
 0x331   : > { %v10424_v0 = vpop.f32.mrb[26].mxu0  ;;  %6209 = vmatprep.subr.bf16.mxu0 %v13207_v41 }
 0x332   : > { %13206 = vst [vmem:[#allocation184_spill] sm:$0xff] %v10424_v0  ;;  %2144 = vmatmul.mubr.f32.vlgmr.msra.gmra.mrb[0].mxu1 %v13208_v48  ;;  %v10428_v40 = vpop.f32.mrb[27].mxu0  ;;  %v13213_v48 = vld [vmem:[#allocation227_spill] sm:$0xff] }
 0x333   : > { %13209 = vst [vmem:[#allocation185_spill] sm:$0xff] %v10428_v40  ;;  %5883 = vmatpush1.bf16.msra.mxu1 %v13199_v3  ;;  %5621 = vmatmul.mubr.msk.f32.gmra.mrb[36].mxu0 %vm2541_vm5, %v13192_v51  ;;  %v13215_v40 = vld [vmem:[#allocation107_spill] sm:$0xff] }
 0x334   : > { %5622 = vmatprep.mubr.msk.f32.mxu0 %vm2544_vm6, %v13192_v51  ;;  %6211 = vmatpush1.bf16.msra.mxu0 %v13211_v39 }
 0x335   : > { %2149 = vmatprep.mubr.f32.mxu1 %v12524_v58  ;;  %v10441_v0 = vpop.f32.mrb[28].mxu0  ;;  %5885 = vmatprep.subr.bf16.mxu1 %v13201_v26 }
 0x336   : > { %13212 = vst [vmem:[#allocation186_spill] sm:$0xff] %v10441_v0  ;;  %2151 = vmatmul.mubr.f32.gmra.mrb[2].mxu1 %v13213_v48  ;;  %v10445_v3 = vpop.f32.mrb[29].mxu0  ;;  %6213 = vmatprep.subr.bf16.mxu0 %v13215_v40  ;;  %v13217_v0 = vld [vmem:[#allocation108_spill] sm:$0xff]  ;;  %v13219_v48 = vld [vmem:[#allocation233_spill] sm:$0xff] }
 0x337   : > { %13214 = vst [vmem:[#allocation187_spill] sm:$0xff] %v10445_v3  ;;  %5887 = vmatpush1.bf16.msra.mxu1 %v13205_v18  ;;  %5623 = vmatmul.mubr.msk.f32.gmra.mrb[38].mxu0 %vm2543_vm7, %v13192_v51  ;;  %v13221_v3 = vld [vmem:[#allocation116_spill] sm:$0xff] }
 0x338   : > { %5624 = vmatprep.mubr.msk.f32.mxu0 %vm2546_vm8, %v13192_v51  ;;  %6215 = vmatpush1.bf16.msra.mxu0 %v13217_v0 }
 0x339   : > { %2156 = vmatprep.mubr.f32.mxu1 %v12524_v58  ;;  %v10459_v26 = vpop.f32.mrb[30].mxu0  ;;  %5889 = vmatprep.subr.bf16.mxu1 %v13207_v41  ;;  %v13224_v41 = vld [vmem:[#allocation234_spill] sm:$0xff] }
 0x33a   : > { %13218 = vst [vmem:[#allocation79_spill] sm:$0xff] %v10459_v26  ;;  %2158 = vmatmul.mubr.f32.gmra.mrb[4].mxu1 %v13219_v48  ;;  %v10463_v18 = vpop.f32.mrb[31].mxu0  ;;  %6217 = vmatprep.subr.bf16.mxu0 %v13221_v3  ;;  %v13223_v26 = vld [vmem:[#allocation119_spill] sm:$0xff]  ;;  %v13225_v48 = vld [vmem:[#allocation225_spill] sm:$0xff] }
 0x33b   : > { %13220 = vst [vmem:[#allocation190_spill] sm:$0xff] %v10463_v18  ;;  %5891 = vmatpush1.bf16.msra.mxu1 %v13211_v39  ;;  %5625 = vmatmul.mubr.msk.f32.gmra.mrb[40].mxu0 %vm2545_vm9, %v13192_v51  ;;  %v13227_v39 = vld [vmem:[#allocation226_spill] sm:$0xff]  ;;  %v13229_v18 = vld [vmem:[#allocation41_spill] sm:$0xff] }
 0x33c   : > { %5626 = vmatprep.mubr.msk.f32.mxu0 %vm2548_vm10, %v13192_v51  ;;  %6219 = vmatpush1.bf16.msra.mxu0 %v13223_v26  ;;  %vm13228_vm12 = vcmp.eq.s32.totalorder %v13227_v39, %v13194_v14 }
 0x33d   : > { %2163 = vmatprep.mubr.f32.mxu1 %v12524_v58  ;;  %5893 = vmatprep.subr.bf16.mxu1 %v13215_v40  ;;  %v13230_v40 = vld [vmem:[#allocation240_spill] sm:$0xff] }
 0x33e   : > { %2165 = vmatmul.mubr.f32.gmra.mrb[6].mxu1 %v13224_v41  ;;  %6221 = vmatprep.subr.bf16.mxu0 %v13225_v48  ;;  %v13231_v41 = vld [vmem:[#allocation120_spill] sm:$0xff] }
 0x33f   : > { %5895 = vmatpush1.bf16.msra.mxu1 %v13217_v0  ;;  %5627 = vmatmul.mubr.msk.f32.gmra.mrb[42].mxu0 %vm13226_vm11, %v13192_v51  ;;  %vm13232_vm11 = vcmp.eq.s32.totalorder %v13227_v39, %v9135_v25  ;;  %v13233_v0 = vld [vmem:[#allocation66_spill] sm:$0xff] }
 0x340   : > { %5628 = vmatprep.mubr.msk.f32.mxu0 %vm13228_vm12, %v13192_v51  ;;  %6223 = vmatpush1.bf16.msra.mxu0 %v13229_v18  ;;  %vm13234_vm12 = vcmp.eq.s32.totalorder %v13233_v0, %v13194_v14 }
 0x341   : > { %2170 = vmatprep.mubr.f32.mxu1 %v12524_v58  ;;  %5897 = vmatprep.subr.bf16.mxu1 %v13221_v3  ;;  %v13236_v3 = vld [vmem:[#allocation243_spill] sm:$0xff] }
 0x342   : > { %2172 = vmatmul.mubr.f32.gmra.mrb[8].mxu1 %v13230_v40  ;;  %6225 = vmatprep.subr.bf16.mxu0 %v13231_v41  ;;  %v13237_v40 = vld [vmem:[#allocation124_spill] sm:$0xff] }
 0x343   : > { %5899 = vmatpush1.bf16.msra.mxu1 %v13223_v26  ;;  %5629 = vmatmul.mubr.msk.f32.gmra.mrb[44].mxu0 %vm13232_vm11, %v13192_v51  ;;  %vm13238_vm11 = vcmp.eq.s32.totalorder %v13233_v0, %v9135_v25  ;;  %v13239_v26 = vld [vmem:[#allocation73_spill] sm:$0xff] }
 0x344   : > { %5630 = vmatprep.mubr.msk.f32.mxu0 %vm13234_vm12, %v13192_v51  ;;  %6227 = vmatpush1.bf16.msra.mxu0 %v13235_v35  ;;  %vm13240_vm12 = vcmp.eq.s32.totalorder %v13239_v26, %v13194_v14 }
 0x345   : > { %2177 = vmatprep.mubr.f32.mxu1 %v12524_v58  ;;  %5901 = vmatprep.subr.bf16.mxu1 %v13225_v48  ;;  %v13242_v48 = vld [vmem:[#allocation245_spill] sm:$0xff] }
 0x346   : > { %2179 = vmatmul.mubr.f32.gmra.mrb[10].mxu1 %v13236_v3  ;;  %6229 = vmatprep.subr.bf16.mxu0 %v13237_v40  ;;  %v13243_v3 = vld [vmem:[#allocation231_spill] sm:$0xff] }
 0x347   : > { %5903 = vmatpush1.bf16.msra.mxu1 %v13229_v18  ;;  %5631 = vmatmul.mubr.msk.f32.gmra.mrb[46].mxu0 %vm13238_vm11, %v13192_v51  ;;  %vm13244_vm11 = vcmp.eq.s32.totalorder %v13239_v26, %v9135_v25  ;;  %v13245_v18 = vld [vmem:[#allocation138_spill] sm:$0xff] }
 0x348   : > { %5632 = vmatprep.mubr.msk.f32.mxu0 %vm13240_vm12, %v13192_v51  ;;  %6231 = vmatpush1.bf16.msra.mxu0 %v13241_v17  ;;  %vm13246_vm12 = vcmp.eq.s32.totalorder %v13245_v18, %v13194_v14 }
 0x349   : > { %2184 = vmatprep.mubr.f32.mxu1 %v12524_v58  ;;  %5905 = vmatprep.subr.bf16.mxu1 %v13231_v41  ;;  %v13248_v41 = vld [vmem:[#allocation172_spill] sm:$0xff] }
 0x34a   : > { %2186 = vmatmul.mubr.f32.gmra.mrb[12].mxu1 %v13242_v48  ;;  %6233 = vmatprep.subr.bf16.mxu0 %v13243_v3  ;;  %v13249_v48 = vld [vmem:[#allocation130_spill] sm:$0xff] }
 0x34b   : > { %5907 = vmatpush1.bf16.msra.mxu1 %v13235_v35  ;;  %5633 = vmatmul.mubr.msk.f32.gmra.mrb[48].mxu0 %vm13244_vm11, %v13192_v51  ;;  %vm13250_vm11 = vcmp.eq.s32.totalorder %v13245_v18, %v9135_v25  ;;  %v13251_v35 = vld [vmem:[#allocation139_spill] sm:$0xff] }
 0x34c   : > { %5634 = vmatprep.mubr.msk.f32.mxu0 %vm13246_vm12, %v13192_v51  ;;  %6235 = vmatpush1.bf16.msra.mxu0 %v13247_v1  ;;  %vm13252_vm12 = vcmp.eq.s32.totalorder %v13251_v35, %v13194_v14 }
 0x34d   : > { %2191 = vmatprep.mubr.f32.mxu1 %v12524_v58  ;;  %5909 = vmatprep.subr.bf16.mxu1 %v13237_v40  ;;  %v13254_v40 = vld [vmem:[#allocation74_spill] sm:$0xff] }
 0x34e   : > { %2193 = vmatmul.mubr.f32.gmra.mrb[14].mxu1 %v13248_v41  ;;  %6237 = vmatprep.subr.bf16.mxu0 %v13249_v48  ;;  %v13255_v41 = vld [vmem:[#allocation132_spill] sm:$0xff] }
 0x34f   : > { %5911 = vmatpush1.bf16.msra.mxu1 %v13241_v17  ;;  %5635 = vmatmul.mubr.msk.f32.gmra.mrb[50].mxu0 %vm13250_vm11, %v13192_v51  ;;  %vm13256_vm11 = vcmp.eq.s32.totalorder %v13251_v35, %v9135_v25  ;;  %v13257_v17 = vld [vmem:[#allocation142_spill] sm:$0xff] }
 0x350   : > { %5636 = vmatprep.mubr.msk.f32.mxu0 %vm13252_vm12, %v13192_v51  ;;  %6239 = vmatpush1.bf16.msra.mxu0 %v13253_v31  ;;  %vm13258_vm12 = vcmp.eq.s32.totalorder %v13257_v17, %v13194_v14 }
 0x351   : > { %2198 = vmatprep.mubr.f32.mxu1 %v12524_v58  ;;  %5913 = vmatprep.subr.bf16.mxu1 %v13243_v3  ;;  %v13260_v3 = vld [vmem:[#allocation191_spill] sm:$0xff] }
 0x352   : > { %2200 = vmatmul.mubr.f32.gmra.mrb[16].mxu1 %v13254_v40  ;;  %6241 = vmatprep.subr.bf16.mxu0 %v13255_v41  ;;  %v13261_v40 = vld [vmem:[#allocation133_spill] sm:$0xff] }
 0x353   : > { %5915 = vmatpush1.bf16.msra.mxu1 %v13247_v1  ;;  %5637 = vmatmul.mubr.msk.f32.gmra.mrb[52].mxu0 %vm13256_vm11, %v13192_v51  ;;  %vm13262_vm11 = vcmp.eq.s32.totalorder %v13257_v17, %v9135_v25  ;;  %v13263_v1 = vld [vmem:[#allocation145_spill] sm:$0xff] }
 0x354   : > { %5638 = vmatprep.mubr.msk.f32.mxu0 %vm13258_vm12, %v13192_v51  ;;  %6243 = vmatpush1.bf16.msra.mxu0 %v13259_v63  ;;  %vm13264_vm12 = vcmp.eq.s32.totalorder %v13263_v1, %v13194_v14 }
 0x355   : > { %2205 = vmatprep.mubr.f32.mxu1 %v12524_v58  ;;  %5917 = vmatprep.subr.bf16.mxu1 %v13249_v48  ;;  %v13266_v48 = vld [vmem:[#allocation80_spill] sm:$0xff] }
 0x356   : > { %2207 = vmatmul.mubr.f32.gmra.mrb[18].mxu1 %v13260_v3  ;;  %6245 = vmatprep.subr.bf16.mxu0 %v13261_v40  ;;  %v13267_v3 = vld [vmem:[#allocation143_spill] sm:$0xff] }
 0x357   : > { %5919 = vmatpush1.bf16.msra.mxu1 %v13253_v31  ;;  %5639 = vmatmul.mubr.msk.f32.gmra.mrb[54].mxu0 %vm13262_vm11, %v13192_v51  ;;  %vm13268_vm11 = vcmp.eq.s32.totalorder %v13263_v1, %v9135_v25  ;;  %v13269_v31 = vld [vmem:[#allocation148_spill] sm:$0xff] }
 0x358   : > { %5640 = vmatprep.mubr.msk.f32.mxu0 %vm13264_vm12, %v13192_v51  ;;  %6247 = vmatpush1.bf16.msra.mxu0 %v13265_v24  ;;  %vm13270_vm12 = vcmp.eq.s32.totalorder %v13269_v31, %v13194_v14 }
 0x359   : > { %2212 = vmatprep.mubr.f32.mxu1 %v12524_v58  ;;  %5921 = vmatprep.subr.bf16.mxu1 %v13255_v41  ;;  %v13272_v41 = vld [vmem:[#allocation210_spill] sm:$0xff] }
 0x35a   : > { %2214 = vmatmul.mubr.f32.gmra.mrb[20].mxu1 %v13266_v48  ;;  %6249 = vmatprep.subr.bf16.mxu0 %v13267_v3  ;;  %v13273_v48 = vld [vmem:[#allocation54_spill] sm:$0xff] }
 0x35b   : > { %5923 = vmatpush1.bf16.msra.mxu1 %v13259_v63  ;;  %5641 = vmatmul.mubr.msk.f32.gmra.mrb[56].mxu0 %vm13268_vm11, %v13192_v51  ;;  %vm13274_vm11 = vcmp.eq.s32.totalorder %v13269_v31, %v9135_v25  ;;  %v13275_v63 = vld [vmem:[#allocation81_spill] sm:$0xff] }
 0x35c   : > { %5642 = vmatprep.mubr.msk.f32.mxu0 %vm13270_vm12, %v13192_v51  ;;  %6251 = vmatpush1.bf16.msra.mxu0 %v13271_v52  ;;  %vm13276_vm12 = vcmp.eq.s32.totalorder %v13275_v63, %v13194_v14 }
 0x35d   : > { %2219 = vmatprep.mubr.f32.mxu1 %v12524_v58  ;;  %5925 = vmatprep.subr.bf16.mxu1 %v13261_v40  ;;  %v13278_v40 = vld [vmem:[#allocation211_spill] sm:$0xff] }
 0x35e   : > { %2221 = vmatmul.mubr.f32.gmra.mrb[22].mxu1 %v13272_v41  ;;  %6253 = vmatprep.subr.bf16.mxu0 %v13273_v48  ;;  %v13279_v41 = vld [vmem:[#allocation150_spill] sm:$0xff] }
 0x35f   : > { %5927 = vmatpush1.bf16.msra.mxu1 %v13265_v24  ;;  %5643 = vmatmul.mubr.msk.f32.gmra.mrb[58].mxu0 %vm13274_vm11, %v13192_v51  ;;  %vm13324_vm11 = vcmp.eq.s32.totalorder %v13257_v17, %v13194_v14 }
 0x360   : > { %5644 = vmatprep.mubr.msk.f32.mxu0 %vm13276_vm12, %v13192_v51  ;;  %6255 = vmatpush1.bf16.msra.mxu0 %v13277_v30  ;;  %vm13327_vm12 = vcmp.eq.s32.totalorder %v13257_v17, %v9135_v25 }
 0x361   : > { %2226 = vmatprep.mubr.f32.mxu1 %v12524_v58  ;;  %5929 = vmatprep.subr.bf16.mxu1 %v13267_v3  ;;  %v13282_v3 = vld [vmem:[#allocation88_spill] sm:$0xff] }
 0x362   : > { %2228 = vmatmul.mubr.f32.gmra.mrb[24].mxu1 %v13278_v40  ;;  %6257 = vmatprep.subr.bf16.mxu0 %v13279_v41  ;;  %v13283_v40 = vld [vmem:[#allocation56_spill] sm:$0xff] }
 0x363   : > { %5931 = vmatpush1.bf16.msra.mxu1 %v13271_v52  ;;  %5645 = vmatmul.mubr.msk.f32.gmra.mrb[60].mxu0 %vm2565_vm13, %v13192_v51  ;;  %v13284_v52 = vld [vmem:[#allocation58_spill] sm:$0xff] }
 0x364   : > { %5646 = vmatprep.mubr.msk.f32.mxu0 %vm2568_vm15, %v13192_v51  ;;  %6259 = vmatpush1.bf16.msra.mxu0 %v13281_v32 }
 0x365   : > { %2233 = vmatprep.mubr.f32.mxu1 %v12524_v58  ;;  %5933 = vmatprep.subr.bf16.mxu1 %v13273_v48  ;;  %v13285_v48 = vld [vmem:[#allocation189_spill] sm:$0xff] }
 0x366   : > { %2235 = vmatmul.mubr.f32.gmra.mrb[26].mxu1 %v13282_v3  ;;  %6261 = vmatprep.subr.bf16.mxu0 %v13283_v40  ;;  %v13286_v3 = vld [vmem:[#allocation246_spill] sm:$0xff] }
 0x367   : > { %5935 = vmatpush1.bf16.msra.mxu1 %v13277_v30  ;;  %5647 = vmatmul.mubr.msk.f32.gmra.mrb[62].mxu0 %vm2567_vm14, %v13192_v51  ;;  %v13287_v30 = vand.u32 4294901760, %v13286_v3 }
 0x368   : > { %6263 = vmatpush1.bf16.msra.mxu0 %v13284_v52  ;;  %5648 = vmatprep.mubr.msk.f32.mxu0 %vm2538_vm0, %v13192_v51  ;;  %vm13303_vm0 = vcmp.eq.s32.totalorder %v13222_v45, %v9135_v25 }
 0x369   : > { %2240 = vmatprep.mubr.f32.mxu1 %v12524_v58  ;;  %5937 = vmatprep.subr.bf16.mxu1 %v13279_v41  ;;  %v2828_v46 = vsub.f32 %v13286_v3, %v13287_v30  ;;  %v13290_v41 = vld [vmem:[#allocation99_spill] sm:$0xff] }
 0x36a   : > { %2242 = vmatmul.mubr.f32.gmra.mrb[28].mxu1 %v13285_v48  ;;  %v13292_v3 = vld [vmem:[#allocation207_spill] sm:$0xff] }
 0x36b   : > { %5939 = vmatpush1.bf16.msra.mxu1 %v13281_v32  ;;  %5649 = vmatmul.mubr.msk.f32.vlgmr.msra.gmra.mrb[32].mxu0 %vm2537_vm1, %v13192_v51  ;;  %v13291_v32 = vand.u32 4294901760, %v13290_v41  ;;  %v2829_v21 = vand.u32 4294901760, %v2828_v46  ;;  %v13295_v46 = vld [vmem:[#allocation104_spill] sm:$0xff]  ;;  %vm13304_vm1 = vcmp.eq.s32.totalorder %v13227_v39, %v13194_v14 }
 0x36c   : > { %5650 = vmatprep.mubr.msk.f32.mxu0 %vm2540_vm2, %v13192_v51  ;;  %2247 = vmatprep.mubr.f32.mxu1 %v12524_v58  ;;  %v13293_v58 = vld [vmem:[#allocation101_spill] sm:$0xff]  ;;  %vm13307_vm2 = vcmp.eq.s32.totalorder %v13227_v39, %v9135_v25 }
 0x36d   : > { %5941 = vmatprep.subr.bf16.mxu1 %v13283_v40  ;;  %v2844_v48 = vsub.f32 %v13290_v41, %v13291_v32  ;;  %v13294_v38 = vand.u32 4294901760, %v13293_v58  ;;  %v13296_v41 = vand.u32 4294901760, %v13295_v46  ;;  %v2866_v32 = vsub.f32 %v9599_v43, %v13297_v49 }
 0x36e   : > { %2249 = vmatmul.mubr.f32.gmra.mrb[30].mxu1 %v13292_v3  ;;  %v13298_v3 = vand.u32 4294901760, %v9609_v34  ;;  %v13299_v43 = vand.u32 4294901760, %v9630_v16 }
 0x36f   : > { %5943 = vmatpush1.bf16.msra.mxu1 %v13284_v52  ;;  %5651 = vmatmul.mubr.msk.f32.gmra.mrb[34].mxu0 %vm2539_vm3, %v13192_v51  ;;  %v2850_v40 = vsub.f32 %v13293_v58, %v13294_v38  ;;  %v2845_v30 = vand.u32 4294901760, %v2844_v48  ;;  %v2860_v52 = vsub.f32 %v13295_v46, %v13296_v41  ;;  %v2867_v29 = vand.u32 4294901760, %v2866_v32 }
 0x370   : > { %2830 = vmatprep.mubr.f32.mxu1 %v2829_v21  ;;  %5652 = vmatprep.mubr.msk.f32.mxu0 %vm2542_vm4, %v13192_v51  ;;  %v2876_v21 = vsub.f32 %v9609_v34, %v13298_v3  ;;  %v13300_v34 = vand.u32 4294901760, %v9640_v19  ;;  %vm13308_vm3 = vcmp.eq.s32.totalorder %v13233_v0, %v13194_v14  ;;  %vm13311_vm4 = vcmp.eq.s32.totalorder %v13233_v0, %v9135_v25 }
 0x371   : > { %v2851_v37 = vand.u32 4294901760, %v2850_v40  ;;  %v2861_v48 = vand.u32 4294901760, %v2860_v52 }
 0x372   : > { %2836 = vmatmul.mubr.f32.vlgmr.msra.gmra.mrb[32].mxu1 %v2835_v5  ;;  %v2882_v5 = vsub.f32 %v9630_v16, %v13299_v43  ;;  %v2877_v58 = vand.u32 4294901760, %v2876_v21  ;;  %v2892_v38 = vsub.f32 %v9640_v19, %v13300_v34  ;;  %v13301_v16 = vand.u32 4294901760, %v9662_v50 }
 0x373   : > { %5653 = vmatmul.mubr.msk.f32.gmra.mrb[36].mxu0 %vm2541_vm5, %v13192_v51  ;;  %2846 = vmatprep.mubr.f32.mxu1 %v2845_v30  ;;  %v13302_v19 = vand.u32 4294901760, %v9672_v60  ;;  %vm13312_vm5 = vcmp.eq.s32.totalorder %v13239_v26, %v13194_v14 }
 0x374   : > { %5654 = vmatprep.mubr.msk.f32.mxu0 %vm2544_vm6, %v13192_v51  ;;  %v2883_v33 = vand.u32 4294901760, %v2882_v5  ;;  %v2898_v40 = vsub.f32 %v9662_v50, %v13301_v16  ;;  %v2893_v30 = vand.u32 4294901760, %v2892_v38  ;;  %v13305_v50 = vand.u32 4294901760, %v9693_v36 }
 0x375   : > { %v2908_v46 = vsub.f32 %v9672_v60, %v13302_v19  ;;  %v13306_v60 = vand.u32 4294901760, %v9704_v57  ;;  %vm13315_vm6 = vcmp.eq.s32.totalorder %v13239_v26, %v9135_v25 }
 0x376   : > { %2852 = vmatmul.mubr.f32.gmra.mrb[34].mxu1 %v2851_v37  ;;  %v2899_v12 = vand.u32 4294901760, %v2898_v40  ;;  %v2914_v41 = vsub.f32 %v9693_v36, %v13305_v50  ;;  %v13309_v36 = vand.u32 4294901760, %v9725_v13 }
 0x377   : > { %5655 = vmatmul.mubr.msk.f32.gmra.mrb[38].mxu0 %vm2543_vm7, %v13192_v51  ;;  %2862 = vmatprep.mubr.f32.mxu1 %v2861_v48  ;;  %v2909_v52 = vand.u32 4294901760, %v2908_v46  ;;  %v2924_v37 = vsub.f32 %v9704_v57, %v13306_v60  ;;  %v13310_v57 = vand.u32 4294901760, %v9736_v9  ;;  %vm13316_vm7 = vcmp.eq.s32.totalorder %v13245_v18, %v13194_v14 }
 0x378   : > { %5656 = vmatprep.mubr.msk.f32.mxu0 %vm2546_vm8, %v13192_v51  ;;  %v2915_v45 = vand.u32 4294901760, %v2914_v41  ;;  %v2930_v49 = vsub.f32 %v9725_v13, %v13309_v36  ;;  %v13313_v13 = vand.u32 4294901760, %v9757_v23  ;;  %vm13319_vm8 = vcmp.eq.s32.totalorder %v13245_v18, %v9135_v25 }
 0x379   : > { %v2925_v32 = vand.u32 4294901760, %v2924_v37  ;;  %v2940_v48 = vsub.f32 %v9736_v9, %v13310_v57  ;;  %v13314_v9 = vand.u32 4294901760, %v13082_v27 }
 0x37a   : > { %2868 = vmatmul.mubr.f32.gmra.mrb[36].mxu1 %v2867_v29  ;;  %v2931_v39 = vand.u32 4294901760, %v2930_v49  ;;  %v2946_v3 = vsub.f32 %v9757_v23, %v13313_v13  ;;  %v13317_v23 = vand.u32 4294901760, %v9789_v61 }
 0x37b   : > { %5657 = vmatmul.mubr.msk.f32.gmra.mrb[40].mxu0 %vm2545_vm9, %v13192_v51  ;;  %2878 = vmatprep.mubr.f32.mxu1 %v2877_v58  ;;  %v2941_v21 = vand.u32 4294901760, %v2940_v48  ;;  %v2956_v29 = vsub.f32 %v13082_v27, %v13314_v9  ;;  %v13318_v27 = vand.u32 4294901760, %v13103_v6  ;;  %vm13320_vm9 = vcmp.eq.s32.totalorder %v13251_v35, %v13194_v14 }
 0x37c   : > { %5658 = vmatprep.mubr.msk.f32.mxu0 %vm2548_vm10, %v13192_v51  ;;  %v2947_v0 = vand.u32 4294901760, %v2946_v3  ;;  %v2962_v43 = vsub.f32 %v9789_v61, %v13317_v23  ;;  %v13321_v61 = vand.u32 4294901760, %v9821_v11  ;;  %vm13323_vm10 = vcmp.eq.s32.totalorder %v13251_v35, %v9135_v25 }
 0x37d   : > { %v2957_v5 = vand.u32 4294901760, %v2956_v29  ;;  %v2972_v58 = vsub.f32 %v13103_v6, %v13318_v27  ;;  %v13322_v6 = vand.u32 4294901760, %v13123_v53 }
 0x37e   : > { %2884 = vmatmul.mubr.f32.gmra.mrb[38].mxu1 %v2883_v33  ;;  %v2963_v26 = vand.u32 4294901760, %v2962_v43  ;;  %v2978_v34 = vsub.f32 %v9821_v11, %v13321_v61  ;;  %v13325_v11 = vand.u32 4294901760, %v9857_v28 }
 0x37f   : > { %5659 = vmatmul.mubr.msk.f32.gmra.mrb[42].mxu0 %vm13303_vm0, %v13192_v51  ;;  %2894 = vmatprep.mubr.f32.mxu1 %v2893_v30  ;;  %v2973_v38 = vand.u32 4294901760, %v2972_v58  ;;  %v2988_v33 = vsub.f32 %v13123_v53, %v13322_v6  ;;  %v13326_v53 = vand.u32 4294901760, %v13135_v2  ;;  %vm13328_vm0 = vcmp.eq.s32.totalorder %v13263_v1, %v13194_v14 }
 0x380   : > { %5660 = vmatprep.mubr.msk.f32.mxu0 %vm13304_vm1, %v13192_v51  ;;  %v2979_v18 = vand.u32 4294901760, %v2978_v34  ;;  %v2994_v16 = vsub.f32 %v9857_v28, %v13325_v11  ;;  %v13329_v28 = vand.u32 4294901760, %v9888_v20  ;;  %vm13331_vm1 = vcmp.eq.s32.totalorder %v13263_v1, %v9135_v25  ;;  %v13344_v11 = vld [vmem:[#allocation57_spill] sm:$0xff] }
 0x381   : > { %v2989_v40 = vand.u32 4294901760, %v2988_v33  ;;  %v3004_v30 = vsub.f32 %v13135_v2, %v13326_v53  ;;  %v13330_v2 = vand.u32 4294901760, %v13149_v10 }
 0x382   : > { %2900 = vmatmul.mubr.f32.gmra.mrb[40].mxu1 %v2899_v12  ;;  %v2995_v35 = vand.u32 4294901760, %v2994_v16  ;;  %v3010_v19 = vsub.f32 %v9888_v20, %v13329_v28  ;;  %v13333_v20 = vand.u32 4294901760, %v9918_v8  ;;  %v13346_v28 = vld [vmem:[#allocation155_spill] sm:$0xff] }
 0x383   : > { %5661 = vmatmul.mubr.msk.f32.gmra.mrb[44].mxu0 %vm13307_vm2, %v13192_v51  ;;  %2910 = vmatprep.mubr.f32.mxu1 %v2909_v52  ;;  %v3005_v46 = vand.u32 4294901760, %v3004_v30  ;;  %v3020_v12 = vsub.f32 %v13149_v10, %v13330_v2  ;;  %vm13332_vm2 = vcmp.eq.s32.totalorder %v13269_v31, %v13194_v14  ;;  %v13334_v10 = vand.u32 4294901760, %v13162_v22 }
 0x384   : > { %5662 = vmatprep.mubr.msk.f32.mxu0 %vm13308_vm3, %v13192_v51  ;;  %v3011_v17 = vand.u32 4294901760, %v3010_v19  ;;  %v3026_v50 = vsub.f32 %v9918_v8, %v13333_v20  ;;  %vm13335_vm3 = vcmp.eq.s32.totalorder %v13269_v31, %v9135_v25  ;;  %v13337_v8 = vand.u32 4294901760, %v9948_v7  ;;  %v13343_v25 = vld [vmem:[#allocation168_spill] sm:$0xff] }
 0x385   : > { %v3021_v41 = vand.u32 4294901760, %v3020_v12  ;;  %v3036_v52 = vsub.f32 %v13162_v22, %v13334_v10  ;;  %v13338_v22 = vand.u32 4294901760, %v9958_v62 }
 0x386   : > { %2916 = vmatmul.mubr.f32.gmra.mrb[42].mxu1 %v2915_v45  ;;  %v3027_v1 = vand.u32 4294901760, %v3026_v50  ;;  %v3042_v60 = vsub.f32 %v9948_v7, %v13337_v8  ;;  %v13339_v7 = vand.u32 4294901760, %v9978_v4  ;;  %v13348_v50 = vld [vmem:[#allocation163_spill] sm:$0xff] }
 0x387   : > { %5663 = vmatmul.mubr.msk.f32.gmra.mrb[46].mxu0 %vm13311_vm4, %v13192_v51  ;;  %2926 = vmatprep.mubr.f32.mxu1 %v2925_v32  ;;  %vm13336_vm4 = vcmp.eq.s32.totalorder %v13275_v63, %v13194_v14  ;;  %v3037_v37 = vand.u32 4294901760, %v3036_v52  ;;  %v3052_v45 = vsub.f32 %v9958_v62, %v13338_v22  ;;  %v13340_v62 = vand.u32 4294901760, %v9988_v15  ;;  %v13349_v52 = vld [vmem:[#allocation59_spill] sm:$0xff]  ;;  %v13350_v22 = vld [vmem:[#allocation60_spill] sm:$0xff] }
 0x388   : > { %5664 = vmatprep.mubr.msk.f32.mxu0 %vm13312_vm5, %v13192_v51  ;;  %v3043_v31 = vand.u32 4294901760, %v3042_v60  ;;  %v3058_v36 = vsub.f32 %v9978_v4, %v13339_v7  ;;  %v13341_v14 = vand.u32 4294901760, %v10004_v44  ;;  %v13351_v7 = vld [vmem:[#allocation164_spill] sm:$0xff] }
 0x389   : > { %v3053_v49 = vand.u32 4294901760, %v3052_v45  ;;  %v3068_v32 = vsub.f32 %v9988_v15, %v13340_v62  ;;  %v862_v15 = vld [vmem:[%s11561_s6] sm:$0x3] }
 0x38a   : > { %2932 = vmatmul.mubr.f32.gmra.mrb[44].mxu1 %v2931_v39  ;;  %v3059_v63 = vand.u32 4294901760, %v3058_v36  ;;  %v3074_v57 = vsub.f32 %v10004_v44, %v13341_v14  ;;  %v13342_v39 = vld [vmem:[#allocation212_spill] sm:$0xff] }
 0x38b   : > { %5665 = vmatmul.mubr.msk.f32.gmra.mrb[48].mxu0 %vm13315_vm6, %v13192_v51  ;;  %2942 = vmatprep.mubr.f32.mxu1 %v2941_v21  ;;  %v3069_v48 = vand.u32 4294901760, %v3068_v32  ;;  %v10862_v13 = vrot.slane %v862_v15, %v13342_v39 }
 0x38c   : > { %5666 = vmatprep.mubr.msk.f32.mxu0 %vm13316_vm7, %v13192_v51  ;;  %v3075_v4 = vand.u32 4294901760, %v3074_v57 }
 0x38e   : > { %2948 = vmatmul.mubr.f32.gmra.mrb[46].mxu1 %v2947_v0 }
 0x38f   : > { %5667 = vmatmul.mubr.msk.f32.gmra.mrb[50].mxu0 %vm13319_vm8, %v13192_v51  ;;  %2958 = vmatprep.mubr.f32.mxu1 %v2957_v5 }
 0x390   : > { %5668 = vmatprep.mubr.msk.f32.mxu0 %vm13320_vm9, %v13192_v51 }
 0x392   : > { %2964 = vmatmul.mubr.f32.gmra.mrb[48].mxu1 %v2963_v26 }
 0x393   : > { %5669 = vmatmul.mubr.msk.f32.gmra.mrb[52].mxu0 %vm13323_vm10, %v13192_v51  ;;  %2974 = vmatprep.mubr.f32.mxu1 %v2973_v38 }
 0x394   : > { %5670 = vmatprep.mubr.msk.f32.mxu0 %vm13324_vm11, %v13192_v51 }
 0x396   : > { %2980 = vmatmul.mubr.f32.gmra.mrb[50].mxu1 %v2979_v18 }
 0x397   : > { %5671 = vmatmul.mubr.msk.f32.gmra.mrb[54].mxu0 %vm13327_vm12, %v13192_v51  ;;  %2990 = vmatprep.mubr.f32.mxu1 %v2989_v40  ;;  %v13345_v40 = vld [vmem:[#allocation152_spill] sm:$0xff] }
 0x398   : > { %5672 = vmatprep.mubr.msk.f32.mxu0 %vm13328_vm0, %v13192_v51 }
 0x39a   : > { %2996 = vmatmul.mubr.f32.gmra.mrb[52].mxu1 %v2995_v35 }
 0x39b   : > { %5673 = vmatmul.mubr.msk.f32.gmra.mrb[56].mxu0 %vm13331_vm1, %v13192_v51  ;;  %3006 = vmatprep.mubr.f32.mxu1 %v3005_v46  ;;  %v13347_v46 = vld [vmem:[#allocation162_spill] sm:$0xff] }
 0x39c   : > { %5674 = vmatprep.mubr.msk.f32.mxu0 %vm13332_vm2, %v13192_v51 }
 0x39e   : > { %3012 = vmatmul.mubr.f32.gmra.mrb[54].mxu1 %v3011_v17 }
 0x39f   : > { %5675 = vmatmul.mubr.msk.f32.gmra.mrb[58].mxu0 %vm13335_vm3, %v13192_v51  ;;  %3022 = vmatprep.mubr.f32.mxu1 %v3021_v41 }
 0x3a0   : > { %5676 = vmatprep.mubr.msk.f32.mxu0 %vm13336_vm4, %v13192_v51 }
 0x3a2   : > { %3028 = vmatmul.mubr.f32.gmra.mrb[56].mxu1 %v3027_v1 }
 0x3a3   : > { %5677 = vmatmul.mubr.msk.f32.gmra.mrb[60].mxu0 %vm2565_vm13, %v13192_v51  ;;  %3038 = vmatprep.mubr.f32.mxu1 %v3037_v37 }
 0x3a4   : > { %5678 = vmatprep.mubr.msk.f32.mxu0 %vm2568_vm15, %v13192_v51 }
 0x3a6   : > { %3044 = vmatmul.mubr.f32.gmra.mrb[58].mxu1 %v3043_v31 }
 0x3a7   : > { %5679 = vmatmul.mubr.msk.f32.gmra.mrb[62].mxu0 %vm2567_vm14, %v13192_v51  ;;  %3054 = vmatprep.mubr.f32.mxu1 %v3053_v49  ;;  %v10865_v51 = vrot.slane %v862_v15, %v13343_v25 }
 0x3aa   : > { %3060 = vmatmul.mubr.f32.gmra.mrb[60].mxu1 %v3059_v63  ;;  %v13352_v63 = vld [vmem:[#allocation166_spill] sm:$0xff] }
 0x3ab   : > { %3070 = vmatprep.mubr.f32.mxu1 %v3069_v48  ;;  %v13353_v48 = vld [vmem:[#allocation167_spill] sm:$0xff] }
 0x3ae   : > { %3076 = vmatmul.mubr.f32.gmra.mrb[62].mxu1 %v3075_v4 }
 0x405   : > { %v2145_v24 = vpop.f32.mrb[0].mxu1 }
 0x406   : > { %v6264_v3 = vadd.f32 %v2145_v24, %v10862_v13  ;;  %v2147_v21 = vpop.f32.mrb[1].mxu1 }
 0x407   : > { %v6268_v44 = vadd.f32 %v2147_v21, %v10865_v51  ;;  %v13354_v21 = vld [vmem:[#allocation171_spill] sm:$0xff] }
 0x408   : > { %v10870_v9 = vadd.f32 %v6264_v3, %v10123_v42 }
 0x409   : > { %v2152_v29 = vpop.f32.mrb[2].mxu1  ;;  %v10873_v0 = vadd.f32 %v6268_v44, %v10127_v54 }
 0x40a   : > { %v6272_v23 = vadd.f32 %v2152_v29, %v10862_v13  ;;  %v2154_v43 = vpop.f32.mrb[3].mxu1 }
 0x40b   : > { %v6276_v5 = vadd.f32 %v2154_v43, %v10865_v51 }
 0x40c   : > { %v10878_v27 = vadd.f32 %v6272_v23, %v10152_v47  ;;  %v13355_v23 = vld [vmem:[#allocation62_spill] sm:$0xff] }
 0x40d   : > { %v2159_v58 = vpop.f32.mrb[4].mxu1  ;;  %v10881_v26 = vadd.f32 %v6276_v5, %v10156_v59 }
 0x40e   : > { %v6280_v61 = vadd.f32 %v2159_v58, %v10862_v13  ;;  %v2161_v42 = vpop.f32.mrb[5].mxu1 }
 0x40f   : > { %v6284_v34 = vadd.f32 %v2161_v42, %v10865_v51  ;;  %v13356_v42 = vld [vmem:[#allocation65_spill] sm:$0xff] }
 0x410   : > { %v10886_v54 = vadd.f32 %v6280_v61, %v10181_v55 }
 0x411   : > { %v2166_v38 = vpop.f32.mrb[6].mxu1  ;;  %v10889_v6 = vadd.f32 %v6284_v34, %v10185_v56 }
 0x412   : > { %v6288_v33 = vadd.f32 %v2166_v38, %v10862_v13  ;;  %v2168_v47 = vpop.f32.mrb[7].mxu1 }
 0x413   : > { %v6292_v18 = vadd.f32 %v2168_v47, %v10865_v51 }
 0x414   : > { %v10894_v59 = vadd.f32 %v6288_v33, %v13344_v11  ;;  %v13357_v33 = vld [vmem:[#allocation173_spill] sm:$0xff] }
 0x415   : > { %v2173_v16 = vpop.f32.mrb[8].mxu1  ;;  %v10897_v53 = vadd.f32 %v6292_v18, %v13345_v40  ;;  %v13358_v40 = vld [vmem:[#allocation176_spill] sm:$0xff] }
 0x416   : > { %v6296_v30 = vadd.f32 %v2173_v16, %v10862_v13  ;;  %v2175_v55 = vpop.f32.mrb[9].mxu1 }
 0x417   : > { %v6300_v35 = vadd.f32 %v2175_v55, %v10865_v51 }
 0x418   : > { %v10902_v56 = vadd.f32 %v6296_v30, %v13346_v28 }
 0x419   : > { %v2180_v19 = vpop.f32.mrb[10].mxu1  ;;  %v10905_v2 = vadd.f32 %v6300_v35, %v13347_v46  ;;  %v13359_v35 = vld [vmem:[#allocation181_spill] sm:$0xff] }
 0x41a   : > { %v6304_v12 = vadd.f32 %v2180_v19, %v10862_v13  ;;  %v2182_v17 = vpop.f32.mrb[11].mxu1 }
 0x41b   : > { %v6308_v20 = vadd.f32 %v2182_v17, %v10865_v51  ;;  %v13360_v17 = vld [vmem:[#allocation182_spill] sm:$0xff] }
 0x41c   : > { %v10910_v41 = vadd.f32 %v6304_v12, %v13348_v50 }
 0x41d   : > { %v2187_v10 = vpop.f32.mrb[12].mxu1  ;;  %v10913_v1 = vadd.f32 %v6308_v20, %v13349_v52 }
 0x41e   : > { %v6312_v8 = vadd.f32 %v2187_v10, %v10862_v13  ;;  %v2189_v60 = vpop.f32.mrb[13].mxu1  ;;  %v13361_v10 = vld [vmem:[#allocation68_spill] sm:$0xff] }
 0x41f   : > { %v6316_v37 = vadd.f32 %v2189_v60, %v10865_v51 }
 0x420   : > { %v10918_v45 = vadd.f32 %v6312_v8, %v13350_v22  ;;  %v13362_v22 = vld [vmem:[#allocation175_spill] sm:$0xff] }
 0x421   : > { %v2194_v31 = vpop.f32.mrb[14].mxu1  ;;  %v10921_v36 = vadd.f32 %v6316_v37, %v13351_v7 }
 0x422   : > { %v6320_v49 = vadd.f32 %v2194_v31, %v10862_v13  ;;  %v2196_v62 = vpop.f32.mrb[15].mxu1 }
 0x423   : > { %v6324_v32 = vadd.f32 %v2196_v62, %v10865_v51 }
 0x424   : > { %v10926_v14 = vadd.f32 %v6320_v49, %v13352_v63  ;;  %v13363_v49 = vld [vmem:[#allocation75_spill] sm:$0xff] }
 0x425   : > { %v2201_v57 = vpop.f32.mrb[16].mxu1  ;;  %v10929_v4 = vadd.f32 %v6324_v32, %v13353_v48  ;;  %v13364_v48 = vld [vmem:[#allocation184_spill] sm:$0xff] }
 0x426   : > { %v6328_v15 = vadd.f32 %v2201_v57, %v10862_v13  ;;  %v2203_v24 = vpop.f32.mrb[17].mxu1 }
 0x427   : > { %v6332_v3 = vadd.f32 %v2203_v24, %v10865_v51 }
 0x428   : > { %v10934_v44 = vadd.f32 %v6328_v15, %v13354_v21 }
 0x429   : > { %v2208_v29 = vpop.f32.mrb[18].mxu1  ;;  %v10937_v43 = vadd.f32 %v6332_v3, %v13355_v23  ;;  %v13365_v3 = vld [vmem:[#allocation185_spill] sm:$0xff] }
 0x42a   : > { %v6336_v5 = vadd.f32 %v2208_v29, %v10862_v13  ;;  %v2210_v58 = vpop.f32.mrb[19].mxu1 }
 0x42b   : > { %v6340_v61 = vadd.f32 %v2210_v58, %v10865_v51 }
 0x42c   : > { %v10942_v34 = vadd.f32 %v6336_v5, %v13356_v42  ;;  %v13366_v42 = vld [vmem:[#allocation186_spill] sm:$0xff] }
 0x42d   : > { %v2215_v38 = vpop.f32.mrb[20].mxu1  ;;  %v10945_v47 = vadd.f32 %v6340_v61, %v13357_v33 }
 0x42e   : > { %v6344_v18 = vadd.f32 %v2215_v38, %v10862_v13  ;;  %v2217_v11 = vpop.f32.mrb[21].mxu1 }
 0x42f   : > { %v6348_v16 = vadd.f32 %v2217_v11, %v10865_v51 }
 0x430   : > { %v10950_v30 = vadd.f32 %v6344_v18, %v13358_v40  ;;  %v13367_v18 = vld [vmem:[#allocation187_spill] sm:$0xff] }
 0x431   : > { %v2222_v55 = vpop.f32.mrb[22].mxu1  ;;  %v10953_v28 = vadd.f32 %v6348_v16, %v13359_v35 }
 0x432   : > { %v6352_v19 = vadd.f32 %v2222_v55, %v10862_v13  ;;  %v2224_v46 = vpop.f32.mrb[23].mxu1 }
 0x433   : > { %v6356_v12 = vadd.f32 %v2224_v46, %v10865_v51  ;;  %v13368_v46 = vld [vmem:[#allocation79_spill] sm:$0xff] }
 0x434   : > { %v10958_v20 = vadd.f32 %v6352_v19, %v13360_v17 }
 0x435   : > { %v2229_v50 = vpop.f32.mrb[24].mxu1  ;;  %v10961_v52 = vadd.f32 %v6356_v12, %v13361_v10 }
 0x436   : > { %v6360_v8 = vadd.f32 %v2229_v50, %v10862_v13  ;;  %v2231_v60 = vpop.f32.mrb[25].mxu1  ;;  %v13369_v50 = vld [vmem:[#allocation190_spill] sm:$0xff] }
 0x437   : > { %v6364_v37 = vadd.f32 %v2231_v60, %v10865_v51 }
 0x438   : > { %v10966_v31 = vadd.f32 %v6360_v8, %v13362_v22 }
 0x439   : > { %v2236_v7 = vpop.f32.mrb[26].mxu1  ;;  %v10969_v62 = vadd.f32 %v6364_v37, %v13363_v49 }
 0x43a   : > { %v6368_v32 = vadd.f32 %v2236_v7, %v10862_v13  ;;  %v2238_v63 = vpop.f32.mrb[27].mxu1 }
 0x43b   : > { %v6372_v57 = vadd.f32 %v2238_v63, %v10865_v51 }
 0x43c   : > { %v10974_v15 = vadd.f32 %v6368_v32, %v13364_v48  ;;  %v13370_v48 = vld [vmem:[#allocation21_spill] sm:$0xff] }
 0x43d   : > { %v2243_v24 = vpop.f32.mrb[28].mxu1  ;;  %v10977_v21 = vadd.f32 %v6372_v57, %v13365_v3 }
 0x43e   : > { %v6376_v29 = vadd.f32 %v2243_v24, %v10862_v13  ;;  %v4786_v23 = vpop.f32.mrb[32].mxu0  ;;  %v2245_v5 = vpop.f32.mrb[29].mxu1 }
 0x43f   : > { %v6380_v58 = vadd.f32 %v2245_v5, %v10865_v51  ;;  %v4788_v61 = vpop.f32.mrb[33].mxu0 }
 0x440   : > { %v10982_v38 = vadd.f32 %v6376_v29, %v13366_v42 }
 0x441   : > { %v2250_v33 = vpop.f32.mrb[30].mxu1  ;;  %v10985_v11 = vadd.f32 %v6380_v58, %v13367_v18 }
 0x442   : > { %v6384_v16 = vadd.f32 %v2250_v33, %v10862_v13  ;;  %v4794_v40 = vpop.f32.mrb[34].mxu0  ;;  %v2252_v55 = vpop.f32.mrb[31].mxu1  ;;  %v13371_v33 = vld [vmem:[#allocation22_spill] sm:$0xff] }
 0x443   : > { %v6388_v35 = vadd.f32 %v2252_v55, %v10865_v51  ;;  %v4796_v19 = vpop.f32.mrb[35].mxu0 }
 0x444   : > { %v10990_v12 = vadd.f32 %v6384_v16, %v13368_v46 }
 0x445   : > { %v2837_v17 = vpop.f32.mrb[32].mxu1  ;;  %v10993_v10 = vadd.f32 %v6388_v35, %v13369_v50 }
 0x446   : > { %v6266_v8 = vadd.f32 %v10870_v9, %v2837_v17  ;;  %v4802_v60 = vpop.f32.mrb[36].mxu0  ;;  %v2839_v37 = vpop.f32.mrb[33].mxu1 }
 0x447   : > { %v6270_v22 = vadd.f32 %v10873_v0, %v2839_v37  ;;  %v4804_v7 = vpop.f32.mrb[37].mxu0 }
 0x448   : > { %v6267_v13 = vadd.f32 %v6266_v8, %v4786_v23  ;;  %v13372_v8 = vld [vmem:[#allocation23_spill] sm:$0xff] }
 0x449   : > { %v6271_v49 = vadd.f32 %v6270_v22, %v4788_v61  ;;  %v2853_v32 = vpop.f32.mrb[34].mxu1 }
 0x44a   : > { %v6274_v51 = vadd.f32 %v10878_v27, %v2853_v32  ;;  %v4810_v63 = vpop.f32.mrb[38].mxu0  ;;  %v2855_v57 = vpop.f32.mrb[35].mxu1  ;;  %v10999_v24 = vmul.f32 %v6267_v13, %v13370_v48 }
 0x44b   : > { %v6278_v3 = vadd.f32 %v10881_v26, %v2855_v57  ;;  %v4812_v29 = vpop.f32.mrb[39].mxu0  ;;  %v11003_v9 = vmul.f32 %v6271_v49, %v13370_v48 }
 0x44c   : > { %v6275_v5 = vadd.f32 %v6274_v51, %v4794_v40 }
 0x44d   : > { %v6279_v58 = vadd.f32 %v6278_v3, %v4796_v19  ;;  %v2869_v0 = vpop.f32.mrb[36].mxu1  ;;  %v4975_v23 = vadd.f32 %v11003_v9, %v10999_v24  ;;  %v13373_v3 = vld [vmem:[#allocation24_spill] sm:$0xff] }
 0x44e   : > { %v6282_v61 = vadd.f32 %v10886_v54, %v2869_v0  ;;  %v4818_v27 = vpop.f32.mrb[40].mxu0  ;;  %v2871_v42 = vpop.f32.mrb[37].mxu1  ;;  %v11009_v18 = vmul.f32 %v6275_v5, %v13371_v33 }
 0x44f   : > { %v6286_v16 = vadd.f32 %v10889_v6, %v2871_v42  ;;  %v4820_v26 = vpop.f32.mrb[41].mxu0  ;;  %4976 = vadd.xlane.f32.xlu1 %v4975_v23  ;;  %v11013_v55 = vmul.f32 %v6279_v58, %v13371_v33 }
 0x450   : > { %v6283_v40 = vadd.f32 %v6282_v61, %v4802_v60 }
 0x451   : > { %v6287_v35 = vadd.f32 %v6286_v16, %v4804_v7  ;;  %v2885_v19 = vpop.f32.mrb[38].mxu1  ;;  %v4978_v46 = vadd.f32 %v11013_v55, %v11009_v18 }
 0x452   : > { %v6290_v54 = vadd.f32 %v10894_v59, %v2885_v19  ;;  %v4826_v17 = vpop.f32.mrb[42].mxu0  ;;  %v2887_v50 = vpop.f32.mrb[39].mxu1  ;;  %v11019_v37 = vmul.f32 %v6283_v40, %v13372_v8  ;;  %v13374_v40 = vld [vmem:[#allocation25_spill] sm:$0xff] }
 0x453   : > { %v6294_v6 = vadd.f32 %v10897_v53, %v2887_v50  ;;  %v4828_v22 = vpop.f32.mrb[43].mxu0  ;;  %4979 = vadd.xlane.f32.xlu0 %v4978_v46  ;;  %v11023_v13 = vmul.f32 %v6287_v35, %v13372_v8 }
 0x454   : > { %v6291_v60 = vadd.f32 %v6290_v54, %v4810_v63 }
 0x455   : > { %v6295_v7 = vadd.f32 %v6294_v6, %v4812_v29  ;;  %v2901_v49 = vpop.f32.mrb[40].mxu1  ;;  %v4981_v32 = vadd.f32 %v11023_v13, %v11019_v37 }
 0x456   : > { %v6298_v59 = vadd.f32 %v10902_v56, %v2901_v49  ;;  %v4834_v51 = vpop.f32.mrb[44].mxu0  ;;  %v2903_v57 = vpop.f32.mrb[41].mxu1  ;;  %v11029_v5 = vmul.f32 %v6291_v60, %v13373_v3 }
 0x457   : > { %v6302_v53 = vadd.f32 %v10905_v2, %v2903_v57  ;;  %v4836_v58 = vpop.f32.mrb[45].mxu0  ;;  %4982 = vadd.xlane.f32.xlu0 %v4981_v32  ;;  %v11033_v0 = vmul.f32 %v6295_v7, %v13373_v3  ;;  %v13375_v7 = vld [vmem:[#allocation26_spill] sm:$0xff] }
 0x458   : > { %v6299_v63 = vadd.f32 %v6298_v59, %v4818_v27 }
 0x459   : > { %v6303_v29 = vadd.f32 %v6302_v53, %v4820_v26  ;;  %v2917_v23 = vpop.f32.mrb[42].mxu1  ;;  %v4984_v61 = vadd.f32 %v11033_v0, %v11029_v5 }
 0x45a   : > { %v6306_v56 = vadd.f32 %v10910_v41, %v2917_v23  ;;  %v4842_v42 = vpop.f32.mrb[46].mxu0  ;;  %v2919_v16 = vpop.f32.mrb[43].mxu1  ;;  %v11039_v35 = vmul.f32 %v6299_v63, %v13374_v40  ;;  %v13376_v23 = vld [vmem:[#allocation27_spill] sm:$0xff] }
 0x45b   : > { %v6310_v2 = vadd.f32 %v10913_v1, %v2919_v16  ;;  %v4844_v19 = vpop.f32.mrb[47].mxu0  ;;  %4985 = vadd.xlane.f32.xlu1 %v4984_v61  ;;  %v11043_v46 = vmul.f32 %v6303_v29, %v13374_v40 }
 0x45c   : > { %v6307_v27 = vadd.f32 %v6306_v56, %v4826_v17 }
 0x45d   : > { %v6311_v26 = vadd.f32 %v6310_v2, %v4828_v22  ;;  %v2933_v54 = vpop.f32.mrb[44].mxu1  ;;  %v4987_v50 = vadd.f32 %v11043_v46, %v11039_v35 }
 0x45e   : > { %v6314_v41 = vadd.f32 %v10918_v45, %v2933_v54  ;;  %v4850_v6 = vpop.f32.mrb[48].mxu0  ;;  %v2935_v60 = vpop.f32.mrb[45].mxu1  ;;  %v11049_v49 = vmul.f32 %v6307_v27, %v13375_v7 }
 0x45f   : > { %v6318_v1 = vadd.f32 %v10921_v36, %v2935_v60  ;;  %v4852_v32 = vpop.f32.mrb[49].mxu0  ;;  %4988 = vadd.xlane.f32.xlu0 %v4987_v50  ;;  %v11053_v59 = vmul.f32 %v6311_v26, %v13375_v7  ;;  %v13377_v50 = vld [vmem:[#allocation28_spill] sm:$0xff] }
 0x460   : > { %v6315_v17 = vadd.f32 %v6314_v41, %v4834_v51 }
 0x461   : > { %v6319_v22 = vadd.f32 %v6318_v1, %v4836_v58  ;;  %v2949_v57 = vpop.f32.mrb[46].mxu1  ;;  %v4990_v53 = vadd.f32 %v11053_v59, %v11049_v49 }
 0x462   : > { %v6322_v45 = vadd.f32 %v10926_v14, %v2949_v57  ;;  %v4858_v63 = vpop.f32.mrb[50].mxu0  ;;  %v2951_v29 = vpop.f32.mrb[47].mxu1  ;;  %v11059_v61 = vmul.f32 %v6315_v17, %v13376_v23 }
 0x463   : > { %v6326_v36 = vadd.f32 %v10929_v4, %v2951_v29  ;;  %v4860_v56 = vpop.f32.mrb[51].mxu0  ;;  %4991 = vadd.xlane.f32.xlu1 %v4990_v53  ;;  %v11063_v16 = vmul.f32 %v6319_v22, %v13376_v23 }
 0x464   : > { %v6323_v51 = vadd.f32 %v6322_v45, %v4842_v42  ;;  %v13378_v45 = vld [vmem:[#allocation29_spill] sm:$0xff] }
 0x465   : > { %v6327_v58 = vadd.f32 %v6326_v36, %v4844_v19  ;;  %v2965_v2 = vpop.f32.mrb[48].mxu1  ;;  %v4993_v27 = vadd.f32 %v11063_v16, %v11059_v61 }
 0x466   : > { %v6330_v14 = vadd.f32 %v10934_v44, %v2965_v2  ;;  %v4866_v26 = vpop.f32.mrb[52].mxu0  ;;  %v2967_v54 = vpop.f32.mrb[49].mxu1  ;;  %v11069_v41 = vmul.f32 %v6323_v51, %v13377_v50 }
 0x467   : > { %v6334_v4 = vadd.f32 %v10937_v43, %v2967_v54  ;;  %v4868_v60 = vpop.f32.mrb[53].mxu0  ;;  %4994 = vadd.xlane.f32.xlu0 %v4993_v27  ;;  %v11073_v1 = vmul.f32 %v6327_v58, %v13377_v50  ;;  %v13379_v54 = vld [vmem:[#allocation30_spill] sm:$0xff] }
 0x468   : > { %v6331_v42 = vadd.f32 %v6330_v14, %v4850_v6 }
 0x469   : > { %v6335_v19 = vadd.f32 %v6334_v4, %v4852_v32  ;;  %v2981_v17 = vpop.f32.mrb[50].mxu1  ;;  %v4996_v22 = vadd.f32 %v11073_v1, %v11069_v41 }
 0x46a   : > { %v6338_v44 = vadd.f32 %v10942_v34, %v2981_v17  ;;  %v4874_v57 = vpop.f32.mrb[54].mxu0  ;;  %v2983_v53 = vpop.f32.mrb[51].mxu1  ;;  %v11079_v29 = vmul.f32 %v6331_v42, %v13378_v45 }
 0x46b   : > { %v6342_v43 = vadd.f32 %v10945_v47, %v2983_v53  ;;  %v4876_v36 = vpop.f32.mrb[55].mxu0  ;;  %4997 = vadd.xlane.f32.xlu1 %v4996_v22  ;;  %v11083_v51 = vmul.f32 %v6335_v19, %v13378_v45 }
 0x46c   : > { %v6339_v6 = vadd.f32 %v6338_v44, %v4858_v63 }
 0x46d   : > { %v6343_v32 = vadd.f32 %v6342_v43, %v4860_v56  ;;  %v2997_v58 = vpop.f32.mrb[52].mxu1  ;;  %v4999_v2 = vadd.f32 %v11083_v51, %v11079_v29  ;;  %v13380_v43 = vld [vmem:[#allocation31_spill] sm:$0xff] }
 0x46e   : > { %v6346_v34 = vadd.f32 %v10950_v30, %v2997_v58  ;;  %v4882_v27 = vpop.f32.mrb[56].mxu0  ;;  %v2999_v14 = vpop.f32.mrb[53].mxu1  ;;  %v11089_v4 = vmul.f32 %v6339_v6, %v13379_v54 }
 0x46f   : > { %v6350_v47 = vadd.f32 %v10953_v28, %v2999_v14  ;;  %v4884_v42 = vpop.f32.mrb[57].mxu0  ;;  %5000 = vadd.xlane.f32.xlu0 %v4999_v2  ;;  %v11093_v19 = vmul.f32 %v6343_v32, %v13379_v54 }
 0x470   : > { %v6347_v63 = vadd.f32 %v6346_v34, %v4866_v26 }
 0x471   : > { %v6351_v56 = vadd.f32 %v6350_v47, %v4868_v60  ;;  %v3013_v17 = vpop.f32.mrb[54].mxu1  ;;  %v5002_v22 = vadd.f32 %v11093_v19, %v11089_v4 }
 0x472   : > { %v6354_v30 = vadd.f32 %v10958_v20, %v3013_v17  ;;  %v4890_v44 = vpop.f32.mrb[58].mxu0  ;;  %v3015_v53 = vpop.f32.mrb[55].mxu1  ;;  %v11099_v6 = vmul.f32 %v6347_v63, %v13380_v43  ;;  %v13381_v17 = vld [vmem:[#allocation32_spill] sm:$0xff] }
 0x473   : > { %v6358_v28 = vadd.f32 %v10961_v52, %v3015_v53  ;;  %v4892_v58 = vpop.f32.mrb[59].mxu0  ;;  %5003 = vadd.xlane.f32.xlu1 %v5002_v22  ;;  %v11103_v32 = vmul.f32 %v6351_v56, %v13380_v43  ;;  %v13382_v43 = vld [vmem:[#allocation33_spill] sm:$0xff] }
 0x474   : > { %v6355_v26 = vadd.f32 %v6354_v30, %v4874_v57 }
 0x475   : > { %v6359_v60 = vadd.f32 %v6358_v28, %v4876_v36  ;;  %v3029_v2 = vpop.f32.mrb[56].mxu1  ;;  %v5005_v34 = vadd.f32 %v11103_v32, %v11099_v6 }
 0x476   : > { %v6362_v20 = vadd.f32 %v10966_v31, %v3029_v2  ;;  %v4898_v14 = vpop.f32.mrb[60].mxu0  ;;  %v3031_v47 = vpop.f32.mrb[57].mxu1  ;;  %v11109_v63 = vmul.f32 %v6355_v26, %v13381_v17 }
 0x477   : > { %v6366_v52 = vadd.f32 %v10969_v62, %v3031_v47  ;;  %v4900_v53 = vpop.f32.mrb[61].mxu0  ;;  %5006 = vadd.xlane.f32.xlu0 %v5005_v34  ;;  %v11113_v56 = vmul.f32 %v6359_v60, %v13381_v17 }
 0x478   : > { %v6363_v57 = vadd.f32 %v6362_v20, %v4882_v27 }
 0x479   : > { %v6367_v36 = vadd.f32 %v6366_v52, %v4884_v42  ;;  %v3045_v22 = vpop.f32.mrb[58].mxu1  ;;  %v5008_v30 = vadd.f32 %v11113_v56, %v11109_v63 }
 0x47a   : > { %v6370_v31 = vadd.f32 %v10974_v15, %v3045_v22  ;;  %v4906_v28 = vpop.f32.mrb[62].mxu0  ;;  %v3047_v2 = vpop.f32.mrb[59].mxu1  ;;  %v11119_v26 = vmul.f32 %v6363_v57, %v13382_v43  ;;  %v13383_v22 = vld [vmem:[#allocation34_spill] sm:$0xff] }
 0x47b   : > { %v6374_v62 = vadd.f32 %v10977_v21, %v3047_v2  ;;  %v4908_v47 = vpop.f32.mrb[63].mxu0  ;;  %5009 = vadd.xlane.f32.xlu1 %v5008_v30  ;;  %v11123_v60 = vmul.f32 %v6367_v36, %v13382_v43 }
 0x47c   : > { %v6371_v27 = vadd.f32 %v6370_v31, %v4890_v44 }
 0x47d   : > { %v6375_v42 = vadd.f32 %v6374_v62, %v4892_v58  ;;  %v3061_v34 = vpop.f32.mrb[60].mxu1  ;;  %v5011_v20 = vadd.f32 %v11123_v60, %v11119_v26 }
 0x47e   : > { %v6378_v15 = vadd.f32 %v10982_v38, %v3061_v34  ;;  %v3063_v52 = vpop.f32.mrb[61].mxu1  ;;  %v11129_v17 = vmul.f32 %v6371_v27, %v13383_v22  ;;  %v13384_v38 = vld [vmem:[#allocation35_spill] sm:$0xff] }
 0x47f   : > { %v6382_v57 = vadd.f32 %v10985_v11, %v3063_v52  ;;  %5012 = vadd.xlane.f32.xlu0 %v5011_v20  ;;  %v11133_v21 = vmul.f32 %v6375_v42, %v13383_v22 }
 0x480   : > { %v6379_v36 = vadd.f32 %v6378_v15, %v4898_v14 }
 0x481   : > { %v6383_v30 = vadd.f32 %v6382_v57, %v4900_v53  ;;  %v3077_v44 = vpop.f32.mrb[62].mxu1  ;;  %v5014_v58 = vadd.f32 %v11133_v21, %v11129_v17  ;;  %v13385_v53 = vld [vmem:[#allocation36_spill] sm:$0xff] }
 0x482   : > { %v6386_v31 = vadd.f32 %v10990_v12, %v3077_v44  ;;  %v3079_v2 = vpop.f32.mrb[63].mxu1  ;;  %v11139_v62 = vmul.f32 %v6379_v36, %v13384_v38 }
 0x483   : > { %v6390_v27 = vadd.f32 %v10993_v10, %v3079_v2  ;;  %5015 = vadd.xlane.f32.xlu1 %v5014_v58  ;;  %v11143_v11 = vmul.f32 %v6383_v30, %v13384_v38 }
 0x484   : > { %v6387_v42 = vadd.f32 %v6386_v31, %v4906_v28 }
 0x485   : > { %v6391_v34 = vadd.f32 %v6390_v27, %v4908_v47  ;;  %v5017_v14 = vadd.f32 %v11143_v11, %v11139_v62 }
 0x486   : > { %v11148_v20 = vmul.f32 %v6387_v42, %v13385_v53 }
 0x487   : > { %5018 = vadd.xlane.f32.xlu0 %v5017_v14  ;;  %v11151_v12 = vmul.f32 %v6391_v34, %v13385_v53 }
 0x489   : > { %v5020_v15 = vadd.f32 %v11151_v12, %v11148_v20 }
 0x48b   : > { %5021 = vadd.xlane.f32.xlu1 %v5020_v15 }
 0x4dc   : > { %v4977_v10 = vpop.xlane.xlu1 %4976 }
 0x4dd   : > { %v5024_v52 = vmul.f32 0.00390625, %v4977_v10 }
 0x4df   : > { %v11156_v57 = vsub.f32 %v10999_v24, %v5024_v52  ;;  %v11159_v28 = vsub.f32 %v11003_v9, %v5024_v52 }
 0x4e0   : > { %v4980_v47 = vpop.xlane.xlu0 %4979 }
 0x4e1   : > { %v5025_v36 = vmul.f32 0.00390625, %v4980_v47  ;;  %v5072_v30 = vmul.f32 %v11156_v57, %v11156_v57  ;;  %v5073_v44 = vmul.f32 %v11159_v28, %v11159_v28 }
 0x4e3   : > { %v11166_v58 = vsub.f32 %v11009_v18, %v5025_v36  ;;  %v11169_v31 = vsub.f32 %v11013_v55, %v5025_v36  ;;  %v5104_v2 = vadd.f32 %v5073_v44, %v5072_v30 }
 0x4e4   : > { %v4983_v24 = vpop.xlane.xlu0 %4982 }
 0x4e5   : > { %v5026_v27 = vmul.f32 0.00390625, %v4983_v24  ;;  %5105 = vadd.xlane.f32.xlu0 %v5104_v2  ;;  %v5074_v9 = vmul.f32 %v11166_v58, %v11166_v58  ;;  %v5075_v42 = vmul.f32 %v11169_v31, %v11169_v31 }
 0x4e7   : > { %v11176_v34 = vsub.f32 %v11019_v37, %v5026_v27  ;;  %v11179_v14 = vsub.f32 %v11023_v13, %v5026_v27  ;;  %v5107_v18 = vadd.f32 %v5075_v42, %v5074_v9 }
 0x4e8   : > { %v4986_v15 = vpop.xlane.xlu1 %4985 }
 0x4e9   : > { %v5027_v55 = vmul.f32 0.00390625, %v4986_v15  ;;  %5108 = vadd.xlane.f32.xlu1 %v5107_v18  ;;  %v5076_v10 = vmul.f32 %v11176_v34, %v11176_v34  ;;  %v5077_v52 = vmul.f32 %v11179_v14, %v11179_v14 }
 0x4eb   : > { %v11186_v47 = vsub.f32 %v11029_v5, %v5027_v55  ;;  %v11189_v36 = vsub.f32 %v11033_v0, %v5027_v55  ;;  %v5110_v37 = vadd.f32 %v5077_v52, %v5076_v10 }
 0x4ec   : > { %v4989_v30 = vpop.xlane.xlu0 %4988 }
 0x4ed   : > { %v5078_v13 = vmul.f32 %v11186_v47, %v11186_v47  ;;  %v5079_v44 = vmul.f32 %v11189_v36, %v11189_v36  ;;  %v5028_v2 = vmul.f32 0.00390625, %v4989_v30  ;;  %5111 = vadd.xlane.f32.xlu0 %v5110_v37 }
 0x4ef   : > { %v11196_v24 = vsub.f32 %v11039_v35, %v5028_v2  ;;  %v11199_v27 = vsub.f32 %v11043_v46, %v5028_v2  ;;  %v5113_v5 = vadd.f32 %v5079_v44, %v5078_v13 }
 0x4f0   : > { %v4992_v9 = vpop.xlane.xlu1 %4991 }
 0x4f1   : > { %v5029_v0 = vmul.f32 0.00390625, %v4992_v9  ;;  %5114 = vadd.xlane.f32.xlu1 %v5113_v5  ;;  %v5080_v42 = vmul.f32 %v11196_v24, %v11196_v24  ;;  %v5081_v18 = vmul.f32 %v11199_v27, %v11199_v27 }
 0x4f3   : > { %v11206_v15 = vsub.f32 %v11049_v49, %v5029_v0  ;;  %v11209_v55 = vsub.f32 %v11053_v59, %v5029_v0  ;;  %v5116_v35 = vadd.f32 %v5081_v18, %v5080_v42 }
 0x4f4   : > { %v4995_v10 = vpop.xlane.xlu0 %4994 }
 0x4f5   : > { %v5082_v46 = vmul.f32 %v11206_v15, %v11206_v15  ;;  %v5083_v52 = vmul.f32 %v11209_v55, %v11209_v55  ;;  %v5030_v37 = vmul.f32 0.00390625, %v4995_v10  ;;  %5117 = vadd.xlane.f32.xlu0 %v5116_v35 }
 0x4f7   : > { %v11216_v30 = vsub.f32 %v11059_v61, %v5030_v37  ;;  %v11219_v13 = vsub.f32 %v11063_v16, %v5030_v37  ;;  %v5119_v49 = vadd.f32 %v5083_v52, %v5082_v46 }
 0x4f8   : > { %v4998_v44 = vpop.xlane.xlu1 %4997 }
 0x4f9   : > { %v5031_v59 = vmul.f32 0.00390625, %v4998_v44  ;;  %5120 = vadd.xlane.f32.xlu1 %v5119_v49  ;;  %v5084_v2 = vmul.f32 %v11216_v30, %v11216_v30  ;;  %v5085_v5 = vmul.f32 %v11219_v13, %v11219_v13 }
 0x4fb   : > { %v11226_v9 = vsub.f32 %v11069_v41, %v5031_v59  ;;  %v11229_v0 = vsub.f32 %v11073_v1, %v5031_v59  ;;  %v5122_v61 = vadd.f32 %v5085_v5, %v5084_v2 }
 0x4fc   : > { %v5001_v42 = vpop.xlane.xlu0 %5000 }
 0x4fd   : > { %v5086_v16 = vmul.f32 %v11226_v9, %v11226_v9  ;;  %v5087_v18 = vmul.f32 %v11229_v0, %v11229_v0  ;;  %v5032_v35 = vmul.f32 0.00390625, %v5001_v42  ;;  %5123 = vadd.xlane.f32.xlu0 %v5122_v61 }
 0x4ff   : > { %v11236_v10 = vsub.f32 %v11079_v29, %v5032_v35  ;;  %v11239_v46 = vsub.f32 %v11083_v51, %v5032_v35  ;;  %v5125_v41 = vadd.f32 %v5087_v18, %v5086_v16 }
 0x500   : > { %v5004_v52 = vpop.xlane.xlu1 %5003 }
 0x501   : > { %v5033_v1 = vmul.f32 0.00390625, %v5004_v52  ;;  %5126 = vadd.xlane.f32.xlu1 %v5125_v41  ;;  %v5088_v37 = vmul.f32 %v11236_v10, %v11236_v10  ;;  %v5089_v49 = vmul.f32 %v11239_v46, %v11239_v46 }
 0x503   : > { %v11246_v44 = vsub.f32 %v11089_v4, %v5033_v1  ;;  %v11249_v59 = vsub.f32 %v11093_v19, %v5033_v1  ;;  %v5128_v29 = vadd.f32 %v5089_v49, %v5088_v37 }
 0x504   : > { %v5007_v2 = vpop.xlane.xlu0 %5006 }
 0x505   : > { %v5090_v51 = vmul.f32 %v11246_v44, %v11246_v44  ;;  %v5091_v5 = vmul.f32 %v11249_v59, %v11249_v59  ;;  %v5034_v61 = vmul.f32 0.00390625, %v5007_v2  ;;  %5129 = vadd.xlane.f32.xlu0 %v5128_v29 }
 0x507   : > { %v11256_v42 = vsub.f32 %v11099_v6, %v5034_v61  ;;  %v11259_v16 = vsub.f32 %v11103_v32, %v5034_v61  ;;  %v5131_v4 = vadd.f32 %v5091_v5, %v5090_v51 }
 0x508   : > { %v5010_v18 = vpop.xlane.xlu1 %5009 }
 0x509   : > { %v5035_v19 = vmul.f32 0.00390625, %v5010_v18  ;;  %5132 = vadd.xlane.f32.xlu1 %v5131_v4  ;;  %v5092_v35 = vmul.f32 %v11256_v42, %v11256_v42  ;;  %v5093_v41 = vmul.f32 %v11259_v16, %v11259_v16 }
 0x50b   : > { %v11266_v52 = vsub.f32 %v11109_v63, %v5035_v19  ;;  %v11269_v1 = vsub.f32 %v11113_v56, %v5035_v19  ;;  %v5134_v6 = vadd.f32 %v5093_v41, %v5092_v35 }
 0x50c   : > { %v5013_v37 = vpop.xlane.xlu0 %5012 }
 0x50d   : > { %v5094_v32 = vmul.f32 %v11266_v52, %v11266_v52  ;;  %v5095_v49 = vmul.f32 %v11269_v1, %v11269_v1  ;;  %v5036_v29 = vmul.f32 0.00390625, %v5013_v37  ;;  %5135 = vadd.xlane.f32.xlu0 %v5134_v6 }
 0x50f   : > { %v11276_v2 = vsub.f32 %v11119_v26, %v5036_v29  ;;  %v11279_v51 = vsub.f32 %v11123_v60, %v5036_v29  ;;  %v5137_v63 = vadd.f32 %v5095_v49, %v5094_v32 }
 0x510   : > { %v5016_v5 = vpop.xlane.xlu1 %5015 }
 0x511   : > { %v5037_v56 = vmul.f32 0.00390625, %v5016_v5  ;;  %5138 = vadd.xlane.f32.xlu1 %v5137_v63  ;;  %v5096_v61 = vmul.f32 %v11276_v2, %v11276_v2  ;;  %v5097_v4 = vmul.f32 %v11279_v51, %v11279_v51 }
 0x513   : > { %v11286_v18 = vsub.f32 %v11129_v17, %v5037_v56  ;;  %v11289_v19 = vsub.f32 %v11133_v21, %v5037_v56  ;;  %v5140_v26 = vadd.f32 %v5097_v4, %v5096_v61 }
 0x514   : > { %v5019_v35 = vpop.xlane.xlu0 %5018 }
 0x515   : > { %v5098_v60 = vmul.f32 %v11286_v18, %v11286_v18  ;;  %v5099_v41 = vmul.f32 %v11289_v19, %v11289_v19  ;;  %v5038_v6 = vmul.f32 0.00390625, %v5019_v35  ;;  %5141 = vadd.xlane.f32.xlu0 %v5140_v26 }
 0x517   : > { %v11296_v37 = vsub.f32 %v11139_v62, %v5038_v6  ;;  %v11299_v32 = vsub.f32 %v11143_v11, %v5038_v6  ;;  %v5143_v17 = vadd.f32 %v5099_v41, %v5098_v60 }
 0x518   : > { %v5022_v49 = vpop.xlane.xlu1 %5021 }
 0x519   : > { %v5039_v21 = vmul.f32 0.00390625, %v5022_v49  ;;  %5144 = vadd.xlane.f32.xlu1 %v5143_v17  ;;  %v5100_v29 = vmul.f32 %v11296_v37, %v11296_v37  ;;  %v5101_v63 = vmul.f32 %v11299_v32, %v11299_v32  ;;  %v5232_v49 = vld [vmem:[%s11564_s9] sm:$0x3] }
 0x51b   : > { %v11306_v5 = vsub.f32 %v11148_v20, %v5039_v21  ;;  %v11309_v56 = vsub.f32 %v11151_v12, %v5039_v21  ;;  %v5146_v62 = vadd.f32 %v5101_v63, %v5100_v29  ;;  %v5276_v63 = vld [vmem:[%s11565_s10] sm:$0x3] }
 0x51d   : > { %v5102_v11 = vmul.f32 %v11306_v5, %v11306_v5  ;;  %v5103_v61 = vmul.f32 %v11309_v56, %v11309_v56  ;;  %5147 = vadd.xlane.f32.xlu0 %v5146_v62 }
 0x51f   : > { %v5149_v4 = vadd.f32 %v5103_v61, %v5102_v11  ;;  %v11322_v11 = vrot.slane %v5232_v49, %v13342_v39  ;;  %v11325_v61 = vrot.slane %v5232_v49, %v13343_v25 }
 0x521   : > { %5150 = vadd.xlane.f32.xlu1 %v5149_v4 }
 0x572   : > { %v5106_v26 = vpop.xlane.xlu0 %5105 }
 0x573   : > { %v5152_v35 = vmul.f32 0.00390625, %v5106_v26 }
 0x575   : > { %v5168_v60 = vadd.f32 1e-05, %v5152_v35  ;;  %v11329_v35 = vrot.slane %v5276_v63, %v13342_v39 }
 0x576   : > { %v5109_v41 = vpop.xlane.xlu1 %5108 }
 0x577   : > { %6767 = vrsqrt.f32 %v5168_v60  ;;  %v5153_v20 = vmul.f32 0.00390625, %v5109_v41  ;;  %v11332_v60 = vrot.slane %v5276_v63, %v13343_v25 }
 0x579   : > { %v5169_v6 = vadd.f32 1e-05, %v5153_v20 }
 0x57a   : > { %v5112_v12 = vpop.xlane.xlu0 %5111 }
 0x57b   : > { %6769 = vrsqrt.f32 %v5169_v6  ;;  %v5154_v17 = vmul.f32 0.00390625, %v5112_v12 }
 0x57d   : > { %v5170_v21 = vadd.f32 1e-05, %v5154_v17 }
 0x57e   : > { %v5115_v29 = vpop.xlane.xlu1 %5114 }
 0x57f   : > { %6771 = vrsqrt.f32 %v5170_v21  ;;  %v5155_v62 = vmul.f32 0.00390625, %v5115_v29 }
 0x581   : > { %v6768_v4 = vpop.eup %6767  ;;  %v5171_v26 = vadd.f32 1e-05, %v5155_v62 }
 0x582   : > { %v5200_v41 = vmul.f32 %v6768_v4, %v11156_v57  ;;  %v5201_v20 = vmul.f32 %v6768_v4, %v11159_v28  ;;  %v5118_v6 = vpop.xlane.xlu0 %5117 }
 0x583   : > { %6773 = vrsqrt.f32 %v5171_v26  ;;  %v5156_v12 = vmul.f32 0.00390625, %v5118_v6 }
 0x584   : > { %v5244_v17 = vmul.f32 %v11322_v11, %v5200_v41  ;;  %v5245_v49 = vmul.f32 %v11325_v61, %v5201_v20 }
 0x585   : > { %v6770_v21 = vpop.eup %6769  ;;  %v5172_v29 = vadd.f32 1e-05, %v5156_v12 }
 0x586   : > { %v5288_v39 = vadd.f32 %v11329_v35, %v5244_v17  ;;  %v5289_v25 = vadd.f32 %v11332_v60, %v5245_v49  ;;  %v5202_v63 = vmul.f32 %v6770_v21, %v11166_v58  ;;  %v5203_v57 = vmul.f32 %v6770_v21, %v11169_v31  ;;  %v5121_v28 = vpop.xlane.xlu1 %5120 }
 0x587   : > { %6775 = vrsqrt.f32 %v5172_v29  ;;  %v5157_v62 = vmul.f32 0.00390625, %v5121_v28 }
 0x588   : > { %v5320_v4 = vmul.f32 %v13370_v48, %v5288_v39  ;;  %v5321_v26 = vmul.f32 %v13370_v48, %v5289_v25  ;;  %v5246_v41 = vmul.f32 %v11322_v11, %v5202_v63  ;;  %v5247_v20 = vmul.f32 %v11325_v61, %v5203_v57 }
 0x589   : > { %v6772_v6 = vpop.eup %6771  ;;  %v5173_v12 = vadd.f32 1e-05, %v5157_v62 }
 0x58a   : > { %5352 = vst [vmem:[%s11348_s15] sm:$0xff] %v5320_v4  ;;  %5353 = vst [vmem:[%s11348_s15 + $0x8] sm:$0xff] %v5321_v26  ;;  %v5290_v58 = vadd.f32 %v11329_v35, %v5246_v41  ;;  %v5291_v31 = vadd.f32 %v11332_v60, %v5247_v20  ;;  %v5204_v48 = vmul.f32 %v6772_v6, %v11176_v34  ;;  %v5124_v49 = vpop.xlane.xlu0 %5123 }
 0x58b   : > { %v5205_v17 = vmul.f32 %v6772_v6, %v11179_v14  ;;  %6777 = vrsqrt.f32 %v5173_v12  ;;  %v5158_v21 = vmul.f32 0.00390625, %v5124_v49 }
 0x58c   : > { %v5322_v29 = vmul.f32 %v13371_v33, %v5290_v58  ;;  %v5323_v39 = vmul.f32 %v13371_v33, %v5291_v31  ;;  %v5248_v25 = vmul.f32 %v11322_v11, %v5204_v48 }
 0x58d   : > { %v5249_v63 = vmul.f32 %v11325_v61, %v5205_v17  ;;  %v6774_v57 = vpop.eup %6773  ;;  %v5174_v28 = vadd.f32 1e-05, %v5158_v21 }
 0x58e   : > { %5354 = vst [vmem:[%s11348_s15 + $0x10] sm:$0xff] %v5322_v29  ;;  %5355 = vst [vmem:[%s11348_s15 + $0x18] sm:$0xff] %v5323_v39  ;;  %v5292_v34 = vadd.f32 %v11329_v35, %v5248_v25  ;;  %v5206_v62 = vmul.f32 %v6774_v57, %v11186_v47  ;;  %v5207_v4 = vmul.f32 %v6774_v57, %v11189_v36  ;;  %v5127_v26 = vpop.xlane.xlu1 %5126 }
 0x58f   : > { %v5293_v14 = vadd.f32 %v11332_v60, %v5249_v63  ;;  %6779 = vrsqrt.f32 %v5174_v28  ;;  %v5159_v33 = vmul.f32 0.00390625, %v5127_v26 }
 0x590   : > { %v5324_v41 = vmul.f32 %v13372_v8, %v5292_v34  ;;  %v5250_v6 = vmul.f32 %v11322_v11, %v5206_v62  ;;  %v5251_v12 = vmul.f32 %v11325_v61, %v5207_v4 }
 0x591   : > { %v5325_v20 = vmul.f32 %v13372_v8, %v5293_v14  ;;  %v6776_v58 = vpop.eup %6775  ;;  %v5175_v31 = vadd.f32 1e-05, %v5159_v33 }
 0x592   : > { %5356 = vst [vmem:[%s11348_s15 + $0x20] sm:$0xff] %v5324_v41  ;;  %v5294_v47 = vadd.f32 %v11329_v35, %v5250_v6  ;;  %v5295_v36 = vadd.f32 %v11332_v60, %v5251_v12  ;;  %v5208_v48 = vmul.f32 %v6776_v58, %v11196_v24  ;;  %v5209_v17 = vmul.f32 %v6776_v58, %v11199_v27  ;;  %v5130_v49 = vpop.xlane.xlu0 %5129 }
 0x593   : > { %5357 = vst [vmem:[%s11348_s15 + $0x28] sm:$0xff] %v5325_v20  ;;  %6781 = vrsqrt.f32 %v5175_v31  ;;  %v5160_v8 = vmul.f32 0.00390625, %v5130_v49 }
 0x594   : > { %v5326_v21 = vmul.f32 %v13373_v3, %v5294_v47  ;;  %v5327_v29 = vmul.f32 %v13373_v3, %v5295_v36  ;;  %v5252_v39 = vmul.f32 %v11322_v11, %v5208_v48  ;;  %v5253_v25 = vmul.f32 %v11325_v61, %v5209_v17 }
 0x595   : > { %v6778_v63 = vpop.eup %6777  ;;  %v5176_v57 = vadd.f32 1e-05, %v5160_v8 }
 0x596   : > { %5358 = vst [vmem:[%s11348_s15 + $0x30] sm:$0xff] %v5326_v21  ;;  %5359 = vst [vmem:[%s11348_s15 + $0x38] sm:$0xff] %v5327_v29  ;;  %v5296_v24 = vadd.f32 %v11329_v35, %v5252_v39  ;;  %v5297_v27 = vadd.f32 %v11332_v60, %v5253_v25  ;;  %v5210_v28 = vmul.f32 %v6778_v63, %v11206_v15  ;;  %v5133_v14 = vpop.xlane.xlu1 %5132 }
 0x597   : > { %v5211_v34 = vmul.f32 %v6778_v63, %v11209_v55  ;;  %6783 = vrsqrt.f32 %v5176_v57  ;;  %v5161_v3 = vmul.f32 0.00390625, %v5133_v14 }
 0x598   : > { %v5328_v62 = vmul.f32 %v13374_v40, %v5296_v24  ;;  %v5329_v4 = vmul.f32 %v13374_v40, %v5297_v27  ;;  %v5254_v26 = vmul.f32 %v11322_v11, %v5210_v28 }
 0x599   : > { %v5255_v33 = vmul.f32 %v11325_v61, %v5211_v34  ;;  %v6780_v41 = vpop.eup %6779  ;;  %v5177_v20 = vadd.f32 1e-05, %v5161_v3 }
 0x59a   : > { %5360 = vst [vmem:[%s11348_s15 + $0x40] sm:$0xff] %v5328_v62  ;;  %5361 = vst [vmem:[%s11348_s15 + $0x48] sm:$0xff] %v5329_v4  ;;  %v5298_v15 = vadd.f32 %v11329_v35, %v5254_v26  ;;  %v5212_v6 = vmul.f32 %v6780_v41, %v11216_v30  ;;  %v5213_v12 = vmul.f32 %v6780_v41, %v11219_v13  ;;  %v5136_v58 = vpop.xlane.xlu0 %5135 }
 0x59b   : > { %v5299_v55 = vadd.f32 %v11332_v60, %v5255_v33  ;;  %6785 = vrsqrt.f32 %v5177_v20  ;;  %v5162_v40 = vmul.f32 0.00390625, %v5136_v58 }
 0x59c   : > { %v5330_v31 = vmul.f32 %v13375_v7, %v5298_v15  ;;  %v5256_v36 = vmul.f32 %v11322_v11, %v5212_v6  ;;  %v5257_v48 = vmul.f32 %v11325_v61, %v5213_v12 }
 0x59d   : > { %v5331_v47 = vmul.f32 %v13375_v7, %v5299_v55  ;;  %v6782_v17 = vpop.eup %6781  ;;  %v5178_v49 = vadd.f32 1e-05, %v5162_v40 }
 0x59e   : > { %5362 = vst [vmem:[%s11348_s15 + $0x50] sm:$0xff] %v5330_v31  ;;  %v5300_v30 = vadd.f32 %v11329_v35, %v5256_v36  ;;  %v5301_v13 = vadd.f32 %v11332_v60, %v5257_v48  ;;  %v5214_v8 = vmul.f32 %v6782_v17, %v11226_v9  ;;  %v5215_v21 = vmul.f32 %v6782_v17, %v11229_v0  ;;  %v5139_v29 = vpop.xlane.xlu1 %5138 }
 0x59f   : > { %5363 = vst [vmem:[%s11348_s15 + $0x58] sm:$0xff] %v5331_v47  ;;  %6787 = vrsqrt.f32 %v5178_v49  ;;  %v5163_v7 = vmul.f32 0.00390625, %v5139_v29 }
 0x5a0   : > { %v5332_v39 = vmul.f32 %v13376_v23, %v5300_v30  ;;  %v5333_v25 = vmul.f32 %v13376_v23, %v5301_v13  ;;  %v5258_v63 = vmul.f32 %v11322_v11, %v5214_v8  ;;  %v5259_v57 = vmul.f32 %v11325_v61, %v5215_v21 }
 0x5a1   : > { %v6784_v24 = vpop.eup %6783  ;;  %v5179_v27 = vadd.f32 1e-05, %v5163_v7 }
 0x5a2   : > { %5364 = vst [vmem:[%s11348_s15 + $0x60] sm:$0xff] %v5332_v39  ;;  %5365 = vst [vmem:[%s11348_s15 + $0x68] sm:$0xff] %v5333_v25  ;;  %v5302_v9 = vadd.f32 %v11329_v35, %v5258_v63  ;;  %v5303_v0 = vadd.f32 %v11332_v60, %v5259_v57  ;;  %v5216_v28 = vmul.f32 %v6784_v24, %v11236_v10  ;;  %v5142_v14 = vpop.xlane.xlu0 %5141  ;;  %v13386_v63 = vld [vmem:[#allocation31_spill] sm:$0xff] }
 0x5a3   : > { %v5217_v34 = vmul.f32 %v6784_v24, %v11239_v46  ;;  %6789 = vrsqrt.f32 %v5179_v27  ;;  %v5164_v23 = vmul.f32 0.00390625, %v5142_v14 }
 0x5a4   : > { %v5334_v3 = vmul.f32 %v13377_v50, %v5302_v9  ;;  %v5335_v62 = vmul.f32 %v13377_v50, %v5303_v0  ;;  %v5260_v4 = vmul.f32 %v11322_v11, %v5216_v28 }
 0x5a5   : > { %v5261_v26 = vmul.f32 %v11325_v61, %v5217_v34  ;;  %v6786_v33 = vpop.eup %6785  ;;  %v5180_v41 = vadd.f32 1e-05, %v5164_v23  ;;  %v13387_v23 = vld [vmem:[#allocation32_spill] sm:$0xff] }
 0x5a6   : > { %5366 = vst [vmem:[%s11348_s15 + $0x70] sm:$0xff] %v5334_v3  ;;  %5367 = vst [vmem:[%s11348_s15 + $0x78] sm:$0xff] %v5335_v62  ;;  %v5304_v10 = vadd.f32 %v11329_v35, %v5260_v4  ;;  %v5218_v20 = vmul.f32 %v6786_v33, %v11246_v44  ;;  %v5219_v15 = vmul.f32 %v6786_v33, %v11249_v59  ;;  %v5145_v55 = vpop.xlane.xlu1 %5144 }
 0x5a7   : > { %v5305_v46 = vadd.f32 %v11332_v60, %v5261_v26  ;;  %6791 = vrsqrt.f32 %v5180_v41  ;;  %v5165_v50 = vmul.f32 0.00390625, %v5145_v55 }
 0x5a8   : > { %v5336_v6 = vmul.f32 %v13378_v45, %v5304_v10  ;;  %v5262_v58 = vmul.f32 %v11322_v11, %v5218_v20  ;;  %v5263_v40 = vmul.f32 %v11325_v61, %v5219_v15 }
 0x5a9   : > { %v5337_v12 = vmul.f32 %v13378_v45, %v5305_v46  ;;  %v6788_v31 = vpop.eup %6787  ;;  %v5181_v47 = vadd.f32 1e-05, %v5165_v50 }
 0x5aa   : > { %5368 = vst [vmem:[%s11348_s15 + $0x80] sm:$0xff] %v5336_v6  ;;  %v5306_v44 = vadd.f32 %v11329_v35, %v5262_v58  ;;  %v5307_v59 = vadd.f32 %v11332_v60, %v5263_v40  ;;  %v5220_v36 = vmul.f32 %v6788_v31, %v11256_v42  ;;  %v5221_v48 = vmul.f32 %v6788_v31, %v11259_v16  ;;  %v5148_v17 = vpop.xlane.xlu0 %5147 }
 0x5ab   : > { %5369 = vst [vmem:[%s11348_s15 + $0x88] sm:$0xff] %v5337_v12  ;;  %6793 = vrsqrt.f32 %v5181_v47  ;;  %v5166_v45 = vmul.f32 0.00390625, %v5148_v17 }
 0x5ac   : > { %v5338_v49 = vmul.f32 %v13379_v54, %v5306_v44  ;;  %v5339_v30 = vmul.f32 %v13379_v54, %v5307_v59  ;;  %v5264_v13 = vmul.f32 %v11322_v11, %v5220_v36  ;;  %v5265_v8 = vmul.f32 %v11325_v61, %v5221_v48 }
 0x5ad   : > { %v6790_v21 = vpop.eup %6789  ;;  %v5182_v29 = vadd.f32 1e-05, %v5166_v45 }
 0x5ae   : > { %5370 = vst [vmem:[%s11348_s15 + $0x90] sm:$0xff] %v5338_v49  ;;  %5371 = vst [vmem:[%s11348_s15 + $0x98] sm:$0xff] %v5339_v30  ;;  %v5308_v42 = vadd.f32 %v11329_v35, %v5264_v13  ;;  %v5309_v16 = vadd.f32 %v11332_v60, %v5265_v8  ;;  %v5222_v7 = vmul.f32 %v6790_v21, %v11266_v52  ;;  %v5151_v25 = vpop.xlane.xlu1 %5150 }
 0x5af   : > { %v5223_v39 = vmul.f32 %v6790_v21, %v11269_v1  ;;  %6795 = vrsqrt.f32 %v5182_v29  ;;  %v5167_v54 = vmul.f32 0.00390625, %v5151_v25 }
 0x5b0   : > { %v5340_v57 = vmul.f32 %v13386_v63, %v5308_v42  ;;  %v5341_v24 = vmul.f32 %v13386_v63, %v5309_v16  ;;  %v5266_v27 = vmul.f32 %v11322_v11, %v5222_v7 }
 0x5b1   : > { %v5267_v9 = vmul.f32 %v11325_v61, %v5223_v39  ;;  %v6792_v0 = vpop.eup %6791  ;;  %v5183_v28 = vadd.f32 1e-05, %v5167_v54 }
 0x5b2   : > { %5372 = vst [vmem:[%s11348_s15 + $0xa0] sm:$0xff] %v5340_v57  ;;  %5373 = vst [vmem:[%s11348_s15 + $0xa8] sm:$0xff] %v5341_v24  ;;  %v5310_v52 = vadd.f32 %v11329_v35, %v5266_v27  ;;  %v5224_v34 = vmul.f32 %v6792_v0, %v11276_v2  ;;  %v5225_v14 = vmul.f32 %v6792_v0, %v11279_v51 }
 0x5b3   : > { %v5311_v1 = vadd.f32 %v11332_v60, %v5267_v9  ;;  %6797 = vrsqrt.f32 %v5183_v28 }
 0x5b4   : > { %v5342_v3 = vmul.f32 %v13387_v23, %v5310_v52  ;;  %v5268_v4 = vmul.f32 %v11322_v11, %v5224_v34  ;;  %v5269_v26 = vmul.f32 %v11325_v61, %v5225_v14 }
 0x5b5   : > { %v5343_v62 = vmul.f32 %v13387_v23, %v5311_v1  ;;  %v6794_v33 = vpop.eup %6793 }
 0x5b6   : > { %5374 = vst [vmem:[%s11348_s15 + $0xb0] sm:$0xff] %v5342_v3  ;;  %v5312_v41 = vadd.f32 %v11329_v35, %v5268_v4  ;;  %v5313_v2 = vadd.f32 %v11332_v60, %v5269_v26  ;;  %v5226_v51 = vmul.f32 %v6794_v33, %v11286_v18  ;;  %v5227_v10 = vmul.f32 %v6794_v33, %v11289_v19 }
 0x5b7   : > { %5375 = vst [vmem:[%s11348_s15 + $0xb8] sm:$0xff] %v5343_v62 }
 0x5b8   : > { %v5344_v46 = vmul.f32 %v13382_v43, %v5312_v41  ;;  %v5345_v20 = vmul.f32 %v13382_v43, %v5313_v2  ;;  %v5270_v15 = vmul.f32 %v11322_v11, %v5226_v51  ;;  %v5271_v55 = vmul.f32 %v11325_v61, %v5227_v10 }
 0x5b9   : > { %v6796_v50 = vpop.eup %6795 }
 0x5ba   : > { %5376 = vst [vmem:[%s11348_s15 + $0xc0] sm:$0xff] %v5344_v46  ;;  %5377 = vst [vmem:[%s11348_s15 + $0xc8] sm:$0xff] %v5345_v20  ;;  %v5314_v6 = vadd.f32 %v11329_v35, %v5270_v15  ;;  %v5315_v18 = vadd.f32 %v11332_v60, %v5271_v55  ;;  %v5228_v19 = vmul.f32 %v6796_v50, %v11296_v37 }
 0x5bb   : > { %v5229_v12 = vmul.f32 %v6796_v50, %v11299_v32 }
 0x5bc   : > { %v5346_v58 = vmul.f32 %v13383_v22, %v5314_v6  ;;  %v5347_v43 = vmul.f32 %v13383_v22, %v5315_v18  ;;  %v5272_v40 = vmul.f32 %v11322_v11, %v5228_v19 }
 0x5bd   : > { %v5273_v31 = vmul.f32 %v11325_v61, %v5229_v12  ;;  %v6798_v47 = vpop.eup %6797 }
 0x5be   : > { %5378 = vst [vmem:[%s11348_s15 + $0xd0] sm:$0xff] %v5346_v58  ;;  %5379 = vst [vmem:[%s11348_s15 + $0xd8] sm:$0xff] %v5347_v43  ;;  %v5316_v44 = vadd.f32 %v11329_v35, %v5272_v40  ;;  %v5230_v32 = vmul.f32 %v6798_v47, %v11306_v5  ;;  %v5231_v59 = vmul.f32 %v6798_v47, %v11309_v56 }
 0x5bf   : > { %v5317_v37 = vadd.f32 %v11332_v60, %v5273_v31 }
 0x5c0   : > { %v5348_v22 = vmul.f32 %v13384_v38, %v5316_v44  ;;  %v5274_v48 = vmul.f32 %v11322_v11, %v5230_v32  ;;  %v5275_v17 = vmul.f32 %v11325_v61, %v5231_v59 }
 0x5c1   : > { %v5349_v36 = vmul.f32 %v13384_v38, %v5317_v37 }
 0x5c2   : > { %5380 = vst [vmem:[%s11348_s15 + $0xe0] sm:$0xff] %v5348_v22  ;;  %v5318_v5 = vadd.f32 %v11329_v35, %v5274_v48  ;;  %v5319_v45 = vadd.f32 %v11332_v60, %v5275_v17 }
 0x5c3   : > { %5381 = vst [vmem:[%s11348_s15 + $0xe8] sm:$0xff] %v5349_v36 }
 0x5c4   : > { %v5350_v38 = vmul.f32 %v13385_v53, %v5318_v5  ;;  %v5351_v56 = vmul.f32 %v13385_v53, %v5319_v45 }
 0x5c6   : > { %5382 = vst [vmem:[%s11348_s15 + $0xf0] sm:$0xff] %v5350_v38  ;;  %5383 = vst [vmem:[%s11348_s15 + $0xf8] sm:$0xff] %v5351_v56 }
 0x5c7   : > { %6880 = shalt.err (!%p6877_p11)
}
 0x5c8   : > { %s6881_s16 = scalar_lea.hbm %s11499_s24, 4096  ;;  %s6885_s25 = scalar_lea.hbm %s11566_s11, 8192 }
 0x5c9   : > { %p6882_p12 = scmp.ne.s32.totalorder %s11499_s24, %s6881_s16  ;;  %p6886_p5 = scmp.lt.u32.totalorder %s11499_s24, %s11566_s11 }
 0x5ca   : > { %p6887_p9 = scmp.lt.u32.totalorder %s6885_s25, %s6881_s16  ;;  %p6889_p4 = scmp.lt.u32.totalorder %s6881_s16, %s11499_s24 }
 0x5cb   : > { %p6883_p0 = pnand %p6882_p12, %p13388_p13 }
 0x5cc   : > { %p6888_p6 = por %p6887_p9, %p6886_p5 }
 0x5cd   : > { %p6884_p3 = pneg %p6883_p0 }
 0x5ce   : > { %p6890_p1 = por %p6889_p4, %p6888_p6 }
 0x5d0   : > { %p6891_p2 = pnand %p6890_p1, %p6884_p3 }
 0x5d2   : > { %6894 = shalt.err (!%p6891_p2)
}
 0x5d3   : > { %s6966_s15 = smov 256   ;;  %s6967_s27 = smov 512  }
 0x5d4   : > { %s6968_s13 = smov 16  }
 0x5d5   : > { %6656 = dma.vmem_to_hbm [thread:$0]  (%p13388_p13), %s11501_s30, 4096, %s11499_s24, %s11509_s21, %s6966_s15, %s6967_s27, %s6968_s13  }
 0x5d6 PF: > { %s13389_s18 = sld [smem:[#allocation14_spill]]  ;;  %s13390_s19 = sld [smem:[#allocation18_spill]] }
 0x5d7   : > { %p6673_p7 = scmp.ge.s32.totalorder %s6955_s26, 2 }
 0x5dc   : > { %s5416_s22 = sand.u32 1, %s13389_s18   ;;  %p13391_p8 = scmp.ne.s32.totalorder %s13390_s19, 0 }
 0x5dd   : > { %s5417_s23 = scalar_lea.sflag [#allocation6], %s5416_s22 }
 0x5de   : > { %p6666_p10 = pnand %p6673_p7, %p13391_p8 }
 0x5e0   : > { %6930 = dma.done.wait (!%p6666_p10), %s5417_s23, 4096  }
 0x5e1   : > { %6932 = vsyncadd (!%p6666_p10), %s5417_s23, 4294963200  ;;  %s32_s26 = sadd.s32 1, %s6955_s26   ;;  %s13392_s14 = sld [smem:[#allocation15_spill]] }
 0x5e2   : > { %p29_p11 = scmp.ge.s32.totalorder %s32_s26, 4   ;;  %s13393_s23 = sld [smem:[#allocation19_spill]] }
 0x5e3   : > { %s13394_s24 = sld [smem:[#allocation16_spill]]  ;;  %s13395_s25 = sld [smem:[#allocation17_spill]] }
 0x5e4   : > { %s13396_s22 = smov %s6939_s0  ;;  %31 = sbr.rel (!%p29_p11) target bundleno = 21 (0x15), region = 107 }
 0x5e7   : > { %s13397_s0 = smov %s13392_s14 }
 0x5eb   :  { %5422 = vsyncpa [#allocation5], 1 }
 0x5ec   :  { %5424 = vsyncpa [#allocation5 + $0x1], 1 }
 0x5ed   :  { %5425 = vsyncpa [#allocation8], 1 }
 0x5ee   :  { %5426 = vsyncpa [#allocation6], 1 }
 0x5ef   :  { %5428 = vsyncpa [#allocation6 + $0x1], 1 }

</bundles_post_ra>
